<compile_context>
chip_gen: v7x
topology: tpu7x:2x2x1
jax: 0.10.0
libtpu: 0.0.40
codegen_flags: <defaults>
</compile_context>

<pallas_src>
import math
import functools

import jax
import jax.numpy as jnp
from jax.experimental import pallas as pl
from jax.experimental.pallas import tpu as pltpu


def _round_up(v, m):
    return -(-v // m) * m


# ----------------------------------------------------------------------------
# Kernel: one (batch, time-tile) grid step; all layers run back-to-back in VMEM.
# ----------------------------------------------------------------------------
def _filter_block_kernel(x_ref, xh_ref, cup_ref, cuph_ref, *refs,
                         kernel_size, dilations, halo, lx_tile):
    n_layers = len(dilations)
    w_refs = refs[:4 * n_layers]
    y_ref = refs[4 * n_layers]
    tap_ref = refs[4 * n_layers + 1]            # (max_cin, halo + W) f32 scratch
    K = kernel_size

    # window = [left halo | current tile] along the lane (time) axis
    cupw = jnp.concatenate([cuph_ref[0, 0], cup_ref[0]], axis=-1)        # (Cc, W) bf16
    h = jnp.concatenate([xh_ref[0, 0], x_ref[0]], axis=-1).astype(jnp.float32)
    W = h.shape[-1]

    # Columns whose ORIGINAL time index is < 0 (only the first tile's halo): the
    # PyTorch module zero-pads every causal conv's *input* there, so the modulated
    # activation must be forced to zero before each conv.
    col = jax.lax.broadcasted_iota(jnp.int32, (1, W), 1)
    neg = col < (halo - pl.program_id(1) * lx_tile)

    # Left gutter of the tap scratch stays zero: shifted taps only read into it
    # for the first (K-1)*d columns, which lie inside the halo and never reach
    # the stored output slice (halo >= cumulative receptive field).
    tap_ref[:, :halo] = jnp.zeros((tap_ref.shape[0], halo), jnp.float32)

    for li, d in enumerate(dilations):
        wmod, bmod, wconv, bconv = w_refs[4 * li: 4 * li + 4]
        cin = wmod.shape[0] // 2

        # FilterBlock.forward computes F.gelu(x) and discards it -> intentional no-op.

        # scale/shift: ONE stacked MXU matmul (bf16 operands, f32 accumulate)
        ss = jnp.dot(wmod[...], cupw, preferred_element_type=jnp.float32) + bmod[...]
        hm = h * ss[:cin] + ss[cin:]                        # (Cin, W) f32   (VPU, f32)
        hm = jnp.where(neg, 0.0, hm)                        # causal zero padding (t<0)

        # Dilated causal conv as ONE matmul: stack the K time-shifted taps along
        # sublanes (contraction = K*Cin) against the pre-stacked (Cout, K*Cin)
        # bf16 weight.  tap_k[:, t] = hm[:, t - (K-1-k)*d], zero-filled on the left.
        tap_ref[:cin, halo:] = hm
        taps = [tap_ref[:cin, pl.ds(halo - (K - 1 - k) * d, W)] for k in range(K - 1)]
        rhs = jnp.concatenate(taps + [hm], axis=0).astype(jnp.bfloat16)  # (K*Cin, W)
        h = jnp.dot(wconv[...], rhs, preferred_element_type=jnp.float32) + bconv[...]

    # store only the current tile's columns (lane-dense, 128-aligned slice offset)
    y_ref[0] = h[:, halo:].astype(y_ref.dtype)


# ----------------------------------------------------------------------------
# Wrapper: interpolation, halo slabs, stacked weights, BlockSpecs, grid.
# ----------------------------------------------------------------------------
def _interp_linear(v, out_len):
    """F.interpolate(v, out_len, mode='linear', align_corners=False), v: (N, C, L)."""
    L = v.shape[2]
    j = jnp.arange(out_len, dtype=jnp.float32)
    src = jnp.maximum((j + 0.5) * (float(L) / float(out_len)) - 0.5, 0.0)
    i0 = jnp.floor(src).astype(jnp.int32)
    i1 = jnp.minimum(i0 + 1, L - 1)
    lam = src - i0.astype(jnp.float32)
    return v[:, :, i0] * (1.0 - lam) + v[:, :, i1] * lam


def filter_block_forward(x, c, layer_weights, *, dilations, kernel_size=5,
                         lx_tile=512):
    """Equivalent of FilterBlock.forward(x, c).

    x: (N, Cin0, Lx)   c: (N, Cc, Lc)
    layer_weights: list of (ws, bs, wt, bt, wconv, bconv) with PyTorch shapes
      ws/wt: (Cin_l, Cc, 1), bs/bt: (Cin_l,), wconv: (Cout_l, Cin_l, K), bconv: (Cout_l,)
    lx_tile: time-tile width (multiple of 128); >=512 recommended on real shapes
      so the matmul RHS stays long (amortizes MXU weight pushes) while bounding VMEM.
    """
    N, Cin0, Lx = x.shape
    _, Cc, _ = c.shape
    K = kernel_size
    assert len(layer_weights) == len(dilations)

    # time tiling: lt-wide output tiles + a left halo covering the whole causal
    # receptive field of the stack, rounded up to a full 128-lane group.
    rf = (K - 1) * int(sum(dilations))
    halo = _round_up(max(rf, 1), 128)
    lt = _round_up(min(int(lx_tile), Lx), 128)
    lxp = _round_up(Lx, lt)
    nt = lxp // lt

    # Condition upsampled to the sample rate ONCE in plain XLA (tiny); the 1x1-conv
    # modulation commutes with linear interpolation so this is exact.  bf16 for MXU.
    cup = _interp_linear(c.astype(jnp.float32), Lx)
    cup = jnp.pad(cup, ((0, 0), (0, 0), (0, lxp - Lx)))
    xp = jnp.pad(x, ((0, 0), (0, 0), (0, lxp - Lx)))       # keep native dtype

    def halo_slabs(a):                                      # (N,C,Lxp) -> (N,nt,C,halo)
        al = jnp.pad(a, ((0, 0), (0, 0), (halo, 0)))        # zeros for the t<0 region
        idx = jnp.arange(nt)[:, None] * lt + jnp.arange(halo)[None, :]
        return jnp.transpose(al[:, :, idx], (0, 2, 1, 3))

    x_halo = halo_slabs(xp)
    cup_halo = halo_slabs(cup).astype(jnp.bfloat16)
    cup = cup.astype(jnp.bfloat16)

    args = [xp, x_halo, cup, cup_halo]
    in_specs = [
        pl.BlockSpec((1, Cin0, lt), lambda n, t: (n, 0, t)),
        pl.BlockSpec((1, 1, Cin0, halo), lambda n, t: (n, t, 0, 0)),
        pl.BlockSpec((1, Cc, lt), lambda n, t: (n, 0, t)),
        pl.BlockSpec((1, 1, Cc, halo), lambda n, t: (n, t, 0, 0)),
    ]

    max_cin = 0
    cout = None
    for (ws, bs, wt, bt, wc, bc) in layer_weights:
        cin_l = ws.shape[0]
        cout = wc.shape[0]
        max_cin = max(max_cin, cin_l)
        # stacked [scale; shift] 1x1-conv weight and stacked K-tap conv weight
        # (bf16 MXU operands); biases stay f32 (cheap VPU broadcast-adds; folding
        # them into the matmuls would force odd, padded contraction dims).
        wmod = jnp.concatenate([ws.reshape(cin_l, Cc), wt.reshape(cin_l, Cc)],
                               axis=0).astype(jnp.bfloat16)              # (2Cin, Cc)
        bmod = jnp.concatenate([bs, bt]).reshape(2 * cin_l, 1).astype(jnp.float32)
        wcv = jnp.transpose(wc, (0, 2, 1)).reshape(cout, K * cin_l).astype(jnp.bfloat16)
        bcv = bc.reshape(cout, 1).astype(jnp.float32)
        args += [wmod, bmod, wcv, bcv]
        in_specs += [
            pl.BlockSpec((2 * cin_l, Cc), lambda n, t: (0, 0)),
            pl.BlockSpec((2 * cin_l, 1), lambda n, t: (0, 0)),
            pl.BlockSpec((cout, K * cin_l), lambda n, t: (0, 0)),
            pl.BlockSpec((cout, 1), lambda n, t: (0, 0)),
        ]

    kern = functools.partial(
        _filter_block_kernel, kernel_size=K,
        dilations=tuple(int(d) for d in dilations), halo=halo, lx_tile=lt)

    y = pl.pallas_call(
        kern,
        out_shape=jax.ShapeDtypeStruct((N, cout, lxp), jnp.float32),
        grid=(N, nt),
        in_specs=in_specs,
        out_specs=pl.BlockSpec((1, cout, lt), lambda n, t: (n, 0, t)),
        scratch_shapes=[pltpu.VMEM((max_cin, halo + halo + lt), jnp.float32)],
        compiler_params=pltpu.CompilerParams(
            # both axes independent -> megacore / v7x dual-TC sharding even at N=1
            dimension_semantics=("parallel", "parallel"),
            # explicit, v7x-safe (64 MiB physical) scoped-VMEM budget
            vmem_limit_bytes=32 * 1024 * 1024),
    )(*args)
    return y[:, :, :Lx] if lxp != Lx else y


# ----------------------------------------------------------------------------
# Pure-JAX reference mirroring the PyTorch module (for validation).
# ----------------------------------------------------------------------------
def _causal_conv_ref(x, w, b, dilation):
    N, Cin, L = x.shape
    Cout, _, K = w.shape
    P = (K - 1) * dilation
    xp = jnp.pad(x, ((0, 0), (0, 0), (P, 0)))
    taps = jnp.stack([xp[:, :, k * dilation:k * dilation + L] for k in range(K)],
                     axis=-1)                                   # (N, Cin, L, K)
    return jnp.einsum('oik,nilk->nol', w, taps) + b[None, :, None]


def _reference_forward(x, c, layer_weights, dilations, kernel_size):
    Lx = x.shape[2]
    h = x.astype(jnp.float32)
    c = c.astype(jnp.float32)
    for (ws, bs, wt, bt, wc, bc), d in zip(layer_weights, dilations):
        # F.gelu(h) in FilterBlock.forward is computed and discarded -> no-op
        scale = jnp.einsum('oc,ncl->nol', ws[:, :, 0], c) + bs[None, :, None]
        shift = jnp.einsum('oc,ncl->nol', wt[:, :, 0], c) + bt[None, :, None]
        scale = _interp_linear(scale, Lx)
        shift = _interp_linear(shift, Lx)
        h = h * scale + shift
        h = _causal_conv_ref(h, wc, bc, d)
    return h


if __name__ == "__main__":
    # small shapes consistent with the module
    N, Cin, Cout, Cc = 2, 32, 64, 32          # batch, in/out/condition channels
    Lx, Lc, K, n_layers = 256, 64, 5, 3       # signal len, condition len, ksize, layers
    dilations = tuple(1 if l == 0 else 2 ** l for l in range(n_layers))  # (1, 2, 4)

    key = jax.random.PRNGKey(0)
    keys = jax.random.split(key, 2 + 6 * n_layers)
    x = jax.random.normal(keys[0], (N, Cin, Lx), jnp.float32)
    c = jax.random.normal(keys[1], (N, Cc, Lc), jnp.float32)

    layer_weights = []
    ki = 2
    in_ch = Cin
    for l in range(n_layers):
        b1 = 1.0 / math.sqrt(Cc)               # Conv1d 1x1 default init bound
        b2 = 1.0 / math.sqrt(in_ch * K)        # causal Conv1d default init bound
        ws = jax.random.uniform(keys[ki + 0], (in_ch, Cc, 1), jnp.float32, -b1, b1)
        bs = jax.random.uniform(keys[ki + 1], (in_ch,), jnp.float32, -b1, b1)
        wt = jax.random.uniform(keys[ki + 2], (in_ch, Cc, 1), jnp.float32, -b1, b1)
        bt = jax.random.uniform(keys[ki + 3], (in_ch,), jnp.float32, -b1, b1)
        wc = jax.random.uniform(keys[ki + 4], (Cout, in_ch, K), jnp.float32, -b2, b2)
        bc = jax.random.uniform(keys[ki + 5], (Cout,), jnp.float32, -b2, b2)
        layer_weights.append((ws, bs, wt, bt, wc, bc))
        ki += 6
        in_ch = Cout

    # lx_tile=128 -> grid=(N, 2): exercises the halo / multi-tile path at toy size.
    fwd = jax.jit(lambda x_, c_, lw_: filter_block_forward(
        x_, c_, lw_, dilations=dilations, kernel_size=K, lx_tile=128))
    y = jax.block_until_ready(fwd(x, c, layer_weights))

    ref = _reference_forward(x, c, layer_weights, dilations, K)
    assert y.shape == (N, Cout, Lx), y.shape
    max_err = float(jnp.max(jnp.abs(y - ref)))
    mean_err = float(jnp.mean(jnp.abs(y - ref)))
    # bf16 MXU operands vs. an f32 reference -> loose but meaningful tolerances
    assert max_err < 1.5e-1, (max_err, mean_err)
    assert mean_err < 2e-2, (max_err, mean_err)
    print("KERNEL_OK")
</pallas_src>

<mosaic_0001>
module attributes {stable_mosaic.version = 11 : i64} {
  func.func @_filter_block_kernel(%arg0: i32, %arg1: i32, %arg2: memref<1x32x128xf32, #tpu.memory_space<vmem>>, %arg3: memref<1x1x32x128xf32, #tpu.memory_space<vmem>>, %arg4: memref<1x32x128xbf16, #tpu.memory_space<vmem>>, %arg5: memref<1x1x32x128xbf16, #tpu.memory_space<vmem>>, %arg6: memref<64x32xbf16, #tpu.memory_space<vmem>>, %arg7: memref<64x1xf32, #tpu.memory_space<vmem>>, %arg8: memref<64x160xbf16, #tpu.memory_space<vmem>>, %arg9: memref<64x1xf32, #tpu.memory_space<vmem>>, %arg10: memref<128x32xbf16, #tpu.memory_space<vmem>>, %arg11: memref<128x1xf32, #tpu.memory_space<vmem>>, %arg12: memref<64x320xbf16, #tpu.memory_space<vmem>>, %arg13: memref<64x1xf32, #tpu.memory_space<vmem>>, %arg14: memref<128x32xbf16, #tpu.memory_space<vmem>>, %arg15: memref<128x1xf32, #tpu.memory_space<vmem>>, %arg16: memref<64x320xbf16, #tpu.memory_space<vmem>>, %arg17: memref<64x1xf32, #tpu.memory_space<vmem>>, %arg18: memref<1x64x128xf32, #tpu.memory_space<vmem>>, %arg19: memref<64x384xf32, #tpu.memory_space<vmem>>) attributes {dimension_semantics = [#tpu.dimension_semantics<parallel>, #tpu.dimension_semantics<parallel>], iteration_bounds = array<i64: 2, 2>, scalar_prefetch = 0 : i64, scratch_operands = 1 : i64, tpu.core_type = #tpu.core_type<tc>, window_params = [{transform_indices = @transform_0, window_bounds = array<i64: 1, 32, 128>}, {transform_indices = @transform_1, window_bounds = array<i64: 1, 1, 32, 128>}, {transform_indices = @transform_2, window_bounds = array<i64: 1, 32, 128>}, {transform_indices = @transform_3, window_bounds = array<i64: 1, 1, 32, 128>}, {pipeline_mode = #tpu.pipeline_mode<synchronous>, transform_indices = @transform_4, window_bounds = array<i64: 64, 32>}, {pipeline_mode = #tpu.pipeline_mode<synchronous>, transform_indices = @transform_5, window_bounds = array<i64: 64, 1>}, {pipeline_mode = #tpu.pipeline_mode<synchronous>, transform_indices = @transform_6, window_bounds = array<i64: 64, 160>}, {pipeline_mode = #tpu.pipeline_mode<synchronous>, transform_indices = @transform_7, window_bounds = array<i64: 64, 1>}, {pipeline_mode = #tpu.pipeline_mode<synchronous>, transform_indices = @transform_8, window_bounds = array<i64: 128, 32>}, {pipeline_mode = #tpu.pipeline_mode<synchronous>, transform_indices = @transform_9, window_bounds = array<i64: 128, 1>}, {pipeline_mode = #tpu.pipeline_mode<synchronous>, transform_indices = @transform_10, window_bounds = array<i64: 64, 320>}, {pipeline_mode = #tpu.pipeline_mode<synchronous>, transform_indices = @transform_11, window_bounds = array<i64: 64, 1>}, {pipeline_mode = #tpu.pipeline_mode<synchronous>, transform_indices = @transform_12, window_bounds = array<i64: 128, 32>}, {pipeline_mode = #tpu.pipeline_mode<synchronous>, transform_indices = @transform_13, window_bounds = array<i64: 128, 1>}, {pipeline_mode = #tpu.pipeline_mode<synchronous>, transform_indices = @transform_14, window_bounds = array<i64: 64, 320>}, {pipeline_mode = #tpu.pipeline_mode<synchronous>, transform_indices = @transform_15, window_bounds = array<i64: 64, 1>}, {transform_indices = @transform_16, window_bounds = array<i64: 1, 64, 128>}]} {
    %c0 = arith.constant 0 : index
    %c0_0 = arith.constant 0 : index
    %c0_1 = arith.constant 0 : index
    %c0_2 = arith.constant 0 : index
    %0 = vector.load %arg5[%c0, %c0_0, %c0_1, %c0_2] : memref<1x1x32x128xbf16, #tpu.memory_space<vmem>>, vector<1x1x32x128xbf16>
    %1 = vector.shape_cast %0 : vector<1x1x32x128xbf16> to vector<32x128xbf16>
    %c0_3 = arith.constant 0 : index
    %c0_4 = arith.constant 0 : index
    %c0_5 = arith.constant 0 : index
    %2 = vector.load %arg4[%c0_3, %c0_4, %c0_5] : memref<1x32x128xbf16, #tpu.memory_space<vmem>>, vector<1x32x128xbf16>
    %3 = vector.shape_cast %2 : vector<1x32x128xbf16> to vector<32x128xbf16>
    %4 = tpu.concatenate %1, %3 in 1 : vector<32x128xbf16>, vector<32x128xbf16> -> vector<32x256xbf16>
    %c0_6 = arith.constant 0 : index
    %c0_7 = arith.constant 0 : index
    %c0_8 = arith.constant 0 : index
    %c0_9 = arith.constant 0 : index
    %5 = vector.load %arg3[%c0_6, %c0_7, %c0_8, %c0_9] : memref<1x1x32x128xf32, #tpu.memory_space<vmem>>, vector<1x1x32x128xf32>
    %6 = vector.shape_cast %5 : vector<1x1x32x128xf32> to vector<32x128xf32>
    %c0_10 = arith.constant 0 : index
    %c0_11 = arith.constant 0 : index
    %c0_12 = arith.constant 0 : index
    %7 = vector.load %arg2[%c0_10, %c0_11, %c0_12] : memref<1x32x128xf32, #tpu.memory_space<vmem>>, vector<1x32x128xf32>
    %8 = vector.shape_cast %7 : vector<1x32x128xf32> to vector<32x128xf32>
    %9 = tpu.concatenate %6, %8 in 1 : vector<32x128xf32>, vector<32x128xf32> -> vector<32x256xf32>
    %10 = tpu.iota {dimensions = array<i32: 1>} : vector<1x256xi32>
    %c128_i32 = arith.constant 128 : i32
    %11 = arith.muli %arg1, %c128_i32 : i32
    %c128_i32_13 = arith.constant 128 : i32
    %12 = arith.subi %c128_i32_13, %11 : i32
    %13 = vector.broadcast %12 : i32 to vector<1x256xi32>
    %14 = arith.cmpi slt, %10, %13 : vector<1x256xi32>
    %cst = arith.constant 0.000000e+00 : f32
    %15 = vector.broadcast %cst : f32 to vector<64x128xf32>
    %c0_14 = arith.constant 0 : index
    %c0_15 = arith.constant 0 : index
    %16 = vector.load %arg19[%c0_14, %c0_15] : memref<64x384xf32, #tpu.memory_space<vmem>>, vector<64x128xf32>
    tpu.vector_store %arg19[%c0_14, %c0_15], %15 {strides = array<i32>} : memref<64x384xf32, #tpu.memory_space<vmem>>, vector<64x128xf32>,
    %c0_16 = arith.constant 0 : index
    %c0_17 = arith.constant 0 : index
    %17 = vector.load %arg6[%c0_16, %c0_17] : memref<64x32xbf16, #tpu.memory_space<vmem>>, vector<64x32xbf16>
    %cst_18 = arith.constant dense<0.000000e+00> : vector<64x256xf32>
    %18 = tpu.matmul %17, %4, %cst_18 {dimension_numbers = #tpu.dot_dimension_numbers<[1], [0], [0], [1], [0, 0, 1, 1], [], []>} : vector<64x32xbf16>, vector<32x256xbf16>, vector<64x256xf32> -> vector<64x256xf32>
    %c0_19 = arith.constant 0 : index
    %c0_20 = arith.constant 0 : index
    %19 = vector.load %arg7[%c0_19, %c0_20] : memref<64x1xf32, #tpu.memory_space<vmem>>, vector<64x1xf32>
    %20 = vector.broadcast %19 : vector<64x1xf32> to vector<64x256xf32>
    %21 = arith.addf %18, %20 : vector<64x256xf32>
    %22 = vector.extract_strided_slice %21 {offsets = [0, 0], sizes = [32, 256], strides = [1, 1]} : vector<64x256xf32> to vector<32x256xf32>
    %23 = arith.mulf %9, %22 : vector<32x256xf32>
    %24 = vector.extract_strided_slice %21 {offsets = [32, 0], sizes = [32, 256], strides = [1, 1]} : vector<64x256xf32> to vector<32x256xf32>
    %25 = arith.addf %23, %24 : vector<32x256xf32>
    %cst_21 = arith.constant 0.000000e+00 : f32
    %26 = vector.shape_cast %14 : vector<1x256xi1> to vector<1x256xi1>
    %27 = vector.broadcast %26 : vector<1x256xi1> to vector<32x256xi1>
    %28 = vector.broadcast %cst_21 : f32 to vector<32x256xf32>
    %29 = arith.select %27, %28, %25 : vector<32x256xi1>, vector<32x256xf32>
    %c0_22 = arith.constant 0 : index
    %c128 = arith.constant 128 : index
    %30 = vector.load %arg19[%c0_22, %c128] : memref<64x384xf32, #tpu.memory_space<vmem>>, vector<32x256xf32>
    tpu.vector_store %arg19[%c0_22, %c128], %29 {strides = array<i32>} : memref<64x384xf32, #tpu.memory_space<vmem>>, vector<32x256xf32>,
    %c0_23 = arith.constant 0 : index
    %c124 = arith.constant 124 : index
    %31 = vector.load %arg19[%c0_23, %c124] : memref<64x384xf32, #tpu.memory_space<vmem>>, vector<32x256xf32>
    %c0_24 = arith.constant 0 : index
    %c125 = arith.constant 125 : index
    %32 = vector.load %arg19[%c0_24, %c125] : memref<64x384xf32, #tpu.memory_space<vmem>>, vector<32x256xf32>
    %c0_25 = arith.constant 0 : index
    %c126 = arith.constant 126 : index
    %33 = vector.load %arg19[%c0_25, %c126] : memref<64x384xf32, #tpu.memory_space<vmem>>, vector<32x256xf32>
    %c0_26 = arith.constant 0 : index
    %c127 = arith.constant 127 : index
    %34 = vector.load %arg19[%c0_26, %c127] : memref<64x384xf32, #tpu.memory_space<vmem>>, vector<32x256xf32>
    %35 = tpu.concatenate %31, %32, %33, %34, %29 in 0 : vector<32x256xf32>, vector<32x256xf32>, vector<32x256xf32>, vector<32x256xf32>, vector<32x256xf32> -> vector<160x256xf32>
    %36 = arith.truncf %35 : vector<160x256xf32> to vector<160x256xbf16>
    %c0_27 = arith.constant 0 : index
    %c0_28 = arith.constant 0 : index
    %37 = vector.load %arg8[%c0_27, %c0_28] : memref<64x160xbf16, #tpu.memory_space<vmem>>, vector<64x160xbf16>
    %cst_29 = arith.constant dense<0.000000e+00> : vector<64x256xf32>
    %38 = tpu.matmul %37, %36, %cst_29 {dimension_numbers = #tpu.dot_dimension_numbers<[1], [0], [0], [1], [0, 0, 1, 1], [], []>} : vector<64x160xbf16>, vector<160x256xbf16>, vector<64x256xf32> -> vector<64x256xf32>
    %c0_30 = arith.constant 0 : index
    %c0_31 = arith.constant 0 : index
    %39 = vector.load %arg9[%c0_30, %c0_31] : memref<64x1xf32, #tpu.memory_space<vmem>>, vector<64x1xf32>
    %40 = vector.broadcast %39 : vector<64x1xf32> to vector<64x256xf32>
    %41 = arith.addf %38, %40 : vector<64x256xf32>
    %c0_32 = arith.constant 0 : index
    %c0_33 = arith.constant 0 : index
    %42 = vector.load %arg10[%c0_32, %c0_33] : memref<128x32xbf16, #tpu.memory_space<vmem>>, vector<128x32xbf16>
    %cst_34 = arith.constant dense<0.000000e+00> : vector<128x256xf32>
    %43 = tpu.matmul %42, %4, %cst_34 {dimension_numbers = #tpu.dot_dimension_numbers<[1], [0], [0], [1], [0, 0, 1, 1], [], []>} : vector<128x32xbf16>, vector<32x256xbf16>, vector<128x256xf32> -> vector<128x256xf32>
    %c0_35 = arith.constant 0 : index
    %c0_36 = arith.constant 0 : index
    %44 = vector.load %arg11[%c0_35, %c0_36] : memref<128x1xf32, #tpu.memory_space<vmem>>, vector<128x1xf32>
    %45 = vector.broadcast %44 : vector<128x1xf32> to vector<128x256xf32>
    %46 = arith.addf %43, %45 : vector<128x256xf32>
    %47 = vector.extract_strided_slice %46 {offsets = [0, 0], sizes = [64, 256], strides = [1, 1]} : vector<128x256xf32> to vector<64x256xf32>
    %48 = arith.mulf %41, %47 : vector<64x256xf32>
    %49 = vector.extract_strided_slice %46 {offsets = [64, 0], sizes = [64, 256], strides = [1, 1]} : vector<128x256xf32> to vector<64x256xf32>
    %50 = arith.addf %48, %49 : vector<64x256xf32>
    %cst_37 = arith.constant 0.000000e+00 : f32
    %51 = vector.shape_cast %14 : vector<1x256xi1> to vector<1x256xi1>
    %52 = vector.broadcast %51 : vector<1x256xi1> to vector<64x256xi1>
    %53 = vector.broadcast %cst_37 : f32 to vector<64x256xf32>
    %54 = arith.select %52, %53, %50 : vector<64x256xi1>, vector<64x256xf32>
    %c0_38 = arith.constant 0 : index
    %c128_39 = arith.constant 128 : index
    %55 = vector.load %arg19[%c0_38, %c128_39] : memref<64x384xf32, #tpu.memory_space<vmem>>, vector<64x256xf32>
    tpu.vector_store %arg19[%c0_38, %c128_39], %54 {strides = array<i32>} : memref<64x384xf32, #tpu.memory_space<vmem>>, vector<64x256xf32>,
    %c0_40 = arith.constant 0 : index
    %c120 = arith.constant 120 : index
    %56 = vector.load %arg19[%c0_40, %c120] : memref<64x384xf32, #tpu.memory_space<vmem>>, vector<64x256xf32>
    %c0_41 = arith.constant 0 : index
    %c122 = arith.constant 122 : index
    %57 = vector.load %arg19[%c0_41, %c122] : memref<64x384xf32, #tpu.memory_space<vmem>>, vector<64x256xf32>
    %c0_42 = arith.constant 0 : index
    %c124_43 = arith.constant 124 : index
    %58 = vector.load %arg19[%c0_42, %c124_43] : memref<64x384xf32, #tpu.memory_space<vmem>>, vector<64x256xf32>
    %c0_44 = arith.constant 0 : index
    %c126_45 = arith.constant 126 : index
    %59 = vector.load %arg19[%c0_44, %c126_45] : memref<64x384xf32, #tpu.memory_space<vmem>>, vector<64x256xf32>
    %60 = tpu.concatenate %56, %57, %58, %59, %54 in 0 : vector<64x256xf32>, vector<64x256xf32>, vector<64x256xf32>, vector<64x256xf32>, vector<64x256xf32> -> vector<320x256xf32>
    %61 = arith.truncf %60 : vector<320x256xf32> to vector<320x256xbf16>
    %c0_46 = arith.constant 0 : index
    %c0_47 = arith.constant 0 : index
    %62 = vector.load %arg12[%c0_46, %c0_47] : memref<64x320xbf16, #tpu.memory_space<vmem>>, vector<64x320xbf16>
    %cst_48 = arith.constant dense<0.000000e+00> : vector<64x256xf32>
    %63 = tpu.matmul %62, %61, %cst_48 {dimension_numbers = #tpu.dot_dimension_numbers<[1], [0], [0], [1], [0, 0, 1, 1], [], []>} : vector<64x320xbf16>, vector<320x256xbf16>, vector<64x256xf32> -> vector<64x256xf32>
    %c0_49 = arith.constant 0 : index
    %c0_50 = arith.constant 0 : index
    %64 = vector.load %arg13[%c0_49, %c0_50] : memref<64x1xf32, #tpu.memory_space<vmem>>, vector<64x1xf32>
    %65 = vector.broadcast %64 : vector<64x1xf32> to vector<64x256xf32>
    %66 = arith.addf %63, %65 : vector<64x256xf32>
    %c0_51 = arith.constant 0 : index
    %c0_52 = arith.constant 0 : index
    %67 = vector.load %arg14[%c0_51, %c0_52] : memref<128x32xbf16, #tpu.memory_space<vmem>>, vector<128x32xbf16>
    %cst_53 = arith.constant dense<0.000000e+00> : vector<128x256xf32>
    %68 = tpu.matmul %67, %4, %cst_53 {dimension_numbers = #tpu.dot_dimension_numbers<[1], [0], [0], [1], [0, 0, 1, 1], [], []>} : vector<128x32xbf16>, vector<32x256xbf16>, vector<128x256xf32> -> vector<128x256xf32>
    %c0_54 = arith.constant 0 : index
    %c0_55 = arith.constant 0 : index
    %69 = vector.load %arg15[%c0_54, %c0_55] : memref<128x1xf32, #tpu.memory_space<vmem>>, vector<128x1xf32>
    %70 = vector.broadcast %69 : vector<128x1xf32> to vector<128x256xf32>
    %71 = arith.addf %68, %70 : vector<128x256xf32>
    %72 = vector.extract_strided_slice %71 {offsets = [0, 0], sizes = [64, 256], strides = [1, 1]} : vector<128x256xf32> to vector<64x256xf32>
    %73 = arith.mulf %66, %72 : vector<64x256xf32>
    %74 = vector.extract_strided_slice %71 {offsets = [64, 0], sizes = [64, 256], strides = [1, 1]} : vector<128x256xf32> to vector<64x256xf32>
    %75 = arith.addf %73, %74 : vector<64x256xf32>
    %cst_56 = arith.constant 0.000000e+00 : f32
    %76 = vector.shape_cast %14 : vector<1x256xi1> to vector<1x256xi1>
    %77 = vector.broadcast %76 : vector<1x256xi1> to vector<64x256xi1>
    %78 = vector.broadcast %cst_56 : f32 to vector<64x256xf32>
    %79 = arith.select %77, %78, %75 : vector<64x256xi1>, vector<64x256xf32>
    %c0_57 = arith.constant 0 : index
    %c128_58 = arith.constant 128 : index
    %80 = vector.load %arg19[%c0_57, %c128_58] : memref<64x384xf32, #tpu.memory_space<vmem>>, vector<64x256xf32>
    tpu.vector_store %arg19[%c0_57, %c128_58], %79 {strides = array<i32>} : memref<64x384xf32, #tpu.memory_space<vmem>>, vector<64x256xf32>,
    %c0_59 = arith.constant 0 : index
    %c112 = arith.constant 112 : index
    %81 = vector.load %arg19[%c0_59, %c112] : memref<64x384xf32, #tpu.memory_space<vmem>>, vector<64x256xf32>
    %c0_60 = arith.constant 0 : index
    %c116 = arith.constant 116 : index
    %82 = vector.load %arg19[%c0_60, %c116] : memref<64x384xf32, #tpu.memory_space<vmem>>, vector<64x256xf32>
    %c0_61 = arith.constant 0 : index
    %c120_62 = arith.constant 120 : index
    %83 = vector.load %arg19[%c0_61, %c120_62] : memref<64x384xf32, #tpu.memory_space<vmem>>, vector<64x256xf32>
    %c0_63 = arith.constant 0 : index
    %c124_64 = arith.constant 124 : index
    %84 = vector.load %arg19[%c0_63, %c124_64] : memref<64x384xf32, #tpu.memory_space<vmem>>, vector<64x256xf32>
    %85 = tpu.concatenate %81, %82, %83, %84, %79 in 0 : vector<64x256xf32>, vector<64x256xf32>, vector<64x256xf32>, vector<64x256xf32>, vector<64x256xf32> -> vector<320x256xf32>
    %86 = arith.truncf %85 : vector<320x256xf32> to vector<320x256xbf16>
    %c0_65 = arith.constant 0 : index
    %c0_66 = arith.constant 0 : index
    %87 = vector.load %arg16[%c0_65, %c0_66] : memref<64x320xbf16, #tpu.memory_space<vmem>>, vector<64x320xbf16>
    %cst_67 = arith.constant dense<0.000000e+00> : vector<64x256xf32>
    %88 = tpu.matmul %87, %86, %cst_67 {dimension_numbers = #tpu.dot_dimension_numbers<[1], [0], [0], [1], [0, 0, 1, 1], [], []>} : vector<64x320xbf16>, vector<320x256xbf16>, vector<64x256xf32> -> vector<64x256xf32>
    %c0_68 = arith.constant 0 : index
    %c0_69 = arith.constant 0 : index
    %89 = vector.load %arg17[%c0_68, %c0_69] : memref<64x1xf32, #tpu.memory_space<vmem>>, vector<64x1xf32>
    %90 = vector.broadcast %89 : vector<64x1xf32> to vector<64x256xf32>
    %91 = arith.addf %88, %90 : vector<64x256xf32>
    %92 = vector.extract_strided_slice %91 {offsets = [0, 128], sizes = [64, 128], strides = [1, 1]} : vector<64x256xf32> to vector<64x128xf32>
    %c0_70 = arith.constant 0 : index
    %c0_71 = arith.constant 0 : index
    %c0_72 = arith.constant 0 : index
    %93 = vector.load %arg18[%c0_70, %c0_71, %c0_72] : memref<1x64x128xf32, #tpu.memory_space<vmem>>, vector<1x64x128xf32>
    %94 = vector.shape_cast %93 : vector<1x64x128xf32> to vector<64x128xf32>
    %95 = vector.shape_cast %92 : vector<64x128xf32> to vector<1x64x128xf32>
    tpu.vector_store %arg18[%c0_70, %c0_71, %c0_72], %95 {strides = array<i32>} : memref<1x64x128xf32, #tpu.memory_space<vmem>>, vector<1x64x128xf32>,
    return
  }
  func.func @transform_0(%arg0: i32, %arg1: i32) -> (i32, i32, i32) {
    %c0_i32 = arith.constant 0 : i32
    %c0_i32_0 = arith.constant 0 : i32
    return %arg0, %c0_i32, %arg1 : i32, i32, i32
  }
  func.func @transform_1(%arg0: i32, %arg1: i32) -> (i32, i32, i32, i32) {
    %c0_i32 = arith.constant 0 : i32
    %c0_i32_0 = arith.constant 0 : i32
    %c0_i32_1 = arith.constant 0 : i32
    return %arg0, %arg1, %c0_i32, %c0_i32_0 : i32, i32, i32, i32
  }
  func.func @transform_2(%arg0: i32, %arg1: i32) -> (i32, i32, i32) {
    %c0_i32 = arith.constant 0 : i32
    %c0_i32_0 = arith.constant 0 : i32
    return %arg0, %c0_i32, %arg1 : i32, i32, i32
  }
  func.func @transform_3(%arg0: i32, %arg1: i32) -> (i32, i32, i32, i32) {
    %c0_i32 = arith.constant 0 : i32
    %c0_i32_0 = arith.constant 0 : i32
    %c0_i32_1 = arith.constant 0 : i32
    return %arg0, %arg1, %c0_i32, %c0_i32_0 : i32, i32, i32, i32
  }
  func.func @transform_4(%arg0: i32, %arg1: i32) -> (i32, i32) {
    %c0_i32 = arith.constant 0 : i32
    %c0_i32_0 = arith.constant 0 : i32
    %c0_i32_1 = arith.constant 0 : i32
    return %c0_i32, %c0_i32_0 : i32, i32
  }
  func.func @transform_5(%arg0: i32, %arg1: i32) -> (i32, i32) {
    %c0_i32 = arith.constant 0 : i32
    %c0_i32_0 = arith.constant 0 : i32
    %c0_i32_1 = arith.constant 0 : i32
    return %c0_i32, %c0_i32_0 : i32, i32
  }
  func.func @transform_6(%arg0: i32, %arg1: i32) -> (i32, i32) {
    %c0_i32 = arith.constant 0 : i32
    %c0_i32_0 = arith.constant 0 : i32
    %c0_i32_1 = arith.constant 0 : i32
    return %c0_i32, %c0_i32_0 : i32, i32
  }
  func.func @transform_7(%arg0: i32, %arg1: i32) -> (i32, i32) {
    %c0_i32 = arith.constant 0 : i32
    %c0_i32_0 = arith.constant 0 : i32
    %c0_i32_1 = arith.constant 0 : i32
    return %c0_i32, %c0_i32_0 : i32, i32
  }
  func.func @transform_8(%arg0: i32, %arg1: i32) -> (i32, i32) {
    %c0_i32 = arith.constant 0 : i32
    %c0_i32_0 = arith.constant 0 : i32
    %c0_i32_1 = arith.constant 0 : i32
    return %c0_i32, %c0_i32_0 : i32, i32
  }
  func.func @transform_9(%arg0: i32, %arg1: i32) -> (i32, i32) {
    %c0_i32 = arith.constant 0 : i32
    %c0_i32_0 = arith.constant 0 : i32
    %c0_i32_1 = arith.constant 0 : i32
    return %c0_i32, %c0_i32_0 : i32, i32
  }
  func.func @transform_10(%arg0: i32, %arg1: i32) -> (i32, i32) {
    %c0_i32 = arith.constant 0 : i32
    %c0_i32_0 = arith.constant 0 : i32
    %c0_i32_1 = arith.constant 0 : i32
    return %c0_i32, %c0_i32_0 : i32, i32
  }
  func.func @transform_11(%arg0: i32, %arg1: i32) -> (i32, i32) {
    %c0_i32 = arith.constant 0 : i32
    %c0_i32_0 = arith.constant 0 : i32
    %c0_i32_1 = arith.constant 0 : i32
    return %c0_i32, %c0_i32_0 : i32, i32
  }
  func.func @transform_12(%arg0: i32, %arg1: i32) -> (i32, i32) {
    %c0_i32 = arith.constant 0 : i32
    %c0_i32_0 = arith.constant 0 : i32
    %c0_i32_1 = arith.constant 0 : i32
    return %c0_i32, %c0_i32_0 : i32, i32
  }
  func.func @transform_13(%arg0: i32, %arg1: i32) -> (i32, i32) {
    %c0_i32 = arith.constant 0 : i32
    %c0_i32_0 = arith.constant 0 : i32
    %c0_i32_1 = arith.constant 0 : i32
    return %c0_i32, %c0_i32_0 : i32, i32
  }
  func.func @transform_14(%arg0: i32, %arg1: i32) -> (i32, i32) {
    %c0_i32 = arith.constant 0 : i32
    %c0_i32_0 = arith.constant 0 : i32
    %c0_i32_1 = arith.constant 0 : i32
    return %c0_i32, %c0_i32_0 : i32, i32
  }
  func.func @transform_15(%arg0: i32, %arg1: i32) -> (i32, i32) {
    %c0_i32 = arith.constant 0 : i32
    %c0_i32_0 = arith.constant 0 : i32
    %c0_i32_1 = arith.constant 0 : i32
    return %c0_i32, %c0_i32_0 : i32, i32
  }
  func.func @transform_16(%arg0: i32, %arg1: i32) -> (i32, i32, i32) {
    %c0_i32 = arith.constant 0 : i32
    %c0_i32_0 = arith.constant 0 : i32
    return %arg0, %c0_i32, %arg1 : i32, i32, i32
  }
}

</mosaic_0001>

<bundles_post_ra>
// kernel: _lambda_.1
= control target key start
LH: loop header
LB: loop body
LE: loop exit
PB: predicated region body
PF: predicated region fallthrough
CT: control target
= control target key end

     0   :  { %s7321_s0 = inlined_call_operand.vmem [shape: f32[2,32,256], index: 0, kind: input, shape index: {}]   ;;  %s7322_s1 = inlined_call_operand.vmem [shape: f32[2,2,32,128], index: 1, kind: input, shape index: {}]   ;;  %s7323_s2 = inlined_call_operand.vmem [shape: bf16[2,32,256], index: 2, kind: input, shape index: {}]   ;;  %s7324_s3 = inlined_call_operand.vmem [shape: bf16[2,2,32,128], index: 3, kind: input, shape index: {}]   ;;  %s7325_s4 = inlined_call_operand.vmem [shape: bf16[64,32], index: 4, kind: input, shape index: {}]   ;;  %s7326_s5 = inlined_call_operand.vmem [shape: f32[64,1], index: 5, kind: input, shape index: {}]   ;;  %s7327_s6 = inlined_call_operand.vmem [shape: bf16[64,160], index: 6, kind: input, shape index: {}]   ;;  %s7328_s7 = inlined_call_operand.vmem [shape: f32[64,1], index: 7, kind: input, shape index: {}]   ;;  %s7329_s8 = inlined_call_operand.vmem [shape: bf16[128,32], index: 8, kind: input, shape index: {}]   ;;  %s7330_s9 = inlined_call_operand.vmem [shape: f32[128,1], index: 9, kind: input, shape index: {}]   ;;  %s7331_s10 = inlined_call_operand.vmem [shape: bf16[64,320], index: 10, kind: input, shape index: {}]   ;;  %s7332_s11 = inlined_call_operand.vmem [shape: f32[64,1], index: 11, kind: input, shape index: {}]   ;;  %s7333_s12 = inlined_call_operand.vmem [shape: bf16[128,32], index: 12, kind: input, shape index: {}]   ;;  %s7334_s13 = inlined_call_operand.vmem [shape: f32[128,1], index: 13, kind: input, shape index: {}]   ;;  %s7335_s14 = inlined_call_operand.vmem [shape: bf16[64,320], index: 14, kind: input, shape index: {}]   ;;  %s7336_s15 = inlined_call_operand.vmem [shape: f32[64,1], index: 15, kind: input, shape index: {}]   ;;  %s7337_s16 = inlined_call_operand.hbm [shape: f32[2,64,256], index: 16, kind: output, shape index: {}]  }
   0x1   :  { %7358 = sst [smem:[#allocation16_spill]] %s7321_s0 }
   0x2   :  { %7359 = sst [smem:[#allocation17_spill]] %s7322_s1 }
   0x3   :  { %7360 = sst [smem:[#allocation18_spill]] %s7323_s2 }
   0x4   :  { %7361 = sst [smem:[#allocation19_spill]] %s7334_s13 }
   0x5   :  { %7362 = sst [smem:[#allocation20_spill]] %s7335_s14 }
   0x6   :  { %7363 = sst [smem:[#allocation21_spill]] %s7336_s15 }
   0x7   :  { %7364 = sst [smem:[#allocation22_spill]] %s7337_s16 }
   0x8   :  { %21 = vsyncpa [#allocation6], 0 }
   0x9   :  { %23 = vsyncpa [#allocation6 + $0x1], 0  ;;  %s5458_s21 = smov 0   ;;  %s5460_s22 = smov 0  }
   0xa   :  { %s5462_s23 = smov 0   ;;  %s5464_s24 = smov 0  }
   0xb   :  { %s5466_s25 = smov 0   ;;  %s5468_s26 = smov 0  }
   0xc   :  { %s5470_s27 = smov 0   ;;  %s5472_s28 = smov 0  }
   0xd LB: > { %7365 = sst [smem:[#allocation8_spill]] %s5326_s21  ;;  %s4375_s29 = sadd.s32 4294967295, %s5354_s28   ;;  %s5354_s28 = sphi %s5472_s28, %s29_s28   ;;  %s5350_s27 = sphi %s5470_s27, %s7401_s27   ;;  %s5346_s26 = sphi %s5468_s26, %s7400_s26   ;;  %s5342_s25 = sphi %s5466_s25, %s7399_s25   ;;  %s5338_s24 = sphi %s5464_s24, %s7398_s24   ;;  %s5334_s23 = sphi %s5462_s23, %s7404_s23   ;;  %s5330_s22 = sphi %s5460_s22, %s7403_s22   ;;  %s5326_s21 = sphi %s5458_s21, %s7402_s21  }
   0xe   : > { %7366 = sst [smem:[#allocation9_spill]] %s5346_s26  ;;  %s4376_s30 = sadd.s32 4294967294, %s5354_s28  }
   0xf   : > { %7367 = sst [smem:[#allocation10_spill]] %s5350_s27  ;;  %s38_s0 = sadd.s32 1, %s5346_s26 }
  0x10   : > { %p39_p0 = scmp.ge.s32.totalorder %s38_s0, 2  ;;  %s41_s17 = sadd.s32 1, %s5350_s27 }
  0x11   : > { %p57_p1 = scmp.ne.s32.totalorder %s5334_s23, %s5330_s22  ;;  %p58_p2 = scmp.eq.s32.totalorder %s5354_s28, 0 }
  0x12   : > { %s7406_s0 = smov (%p39_p0, %s38_s0), 0  ;;  %s7408_s17 = smov (!%p39_p0, %s41_s17), %s5350_s27 }
  0x13   : > { %7368 = sst [smem:[#allocation11_spill]] %s7406_s0  ;;  %s46_s18 = ssub.s32 %s5346_s26, %s7406_s0 }
  0x14   : > { %p5510_p3 = por %p58_p2, %p57_p1  ;;  %p43_p4 = scmp.ge.s32.totalorder %s7408_s17, 2 }
  0x15   : > { %p425_p5 = scmp.eq.s32.totalorder %s4375_s29, 3  ;;  %p430_p6 = scmp.ne.s32.totalorder %s5330_s22, %s5326_s21 }
  0x16   : > { %p431_p7 = scmp.eq.s32.totalorder %s4376_s30, 3  ;;  %s7410_s17 = smov (%p43_p4, %s7408_s17), 0 }
  0x17   : > { %7370 = sst [smem:[#allocation12_spill]] %s7410_s17  ;;  %p5518_p8 = por %p425_p5, %p57_p1 }
  0x18   : > { %p5522_p9 = por %p431_p7, %p430_p6  ;;  %s45_s0 = ssub.s32 %s5350_s27, %s7410_s17 }
  0x19   : > { %s7371_s20 = scalar_select %p5518_p8, 1, 0 }
  0x1a   : > { %s7373_s16 = scalar_select %p5522_p9, 1, 0 }
  0x1b   : > { %7372 = sst [smem:[#allocation13_spill]] %s7371_s20  ;;  %s47_s15 = sor.u32 %s46_s18, %s45_s0 }
  0x1c   : > { %7374 = sst [smem:[#allocation14_spill]] %s7373_s16  ;;  %s50_s14 = sadd.s32 1, %s5334_s23 }
  0x1d   : > { %p48_p10 = scmp.eq.s32.totalorder %s47_s15, 0  ;;  %p4378_p11 = scmp.ge.s32.totalorder %s5354_s28, 4 }
  0x1f   : > { %s5530_s13 = scalar_select %p48_p10, %s5334_s23, %s50_s14  }
  0x20   : > { %483 = sbr.rel (%p4378_p11) target bundleno = 63 (0x3f), region = 64 }
  0x21   : > { %7375 = sst [smem:[#allocation15_spill]] %s5530_s13 }
  0x27   : > { %486 = sbr.rel (!%p5510_p3) target bundleno = 51 (0x33), region = 68  ;;  %s488_s29 = sand.u32 (%p5510_p3), 1, %s5334_s23  }
  0x28   : > { %s4380_s30 = sshll.u32 (%p5510_p3), %s5350_s27, 3  ;;  %s4379_s21 = sshll.u32 (%p5510_p3), %s488_s29, 5 }
  0x29   : > { %s492_s20 = sadd.s32 (%p5510_p3), %s5346_s26, %s4380_s30  ;;  %s7376_s18 = sld [smem:[#allocation16_spill]] (%p5510_p3) }
  0x2a   : > { %s4381_s16 = sshll.u32 (%p5510_p3), %s492_s20, 3  ;;  %s490_s14 = scalar_lea.vmem (%p5510_p3), [#allocation3], %s4379_s21 }
  0x2f   : > { %s494_s15 = scalar_lea.vmem %s7376_s18, %s4381_s16 }
  0x30   : > { %v528_v0 = vld [vmem:[%s494_s15] sm:$0xff]  ;;  %v530_v1 = vld [vmem:[%s494_s15 + $0x10] sm:$0xff] }
  0x31   : > { %v532_v2 = vld [vmem:[%s494_s15 + $0x20] sm:$0xff]  ;;  %529 = vst [vmem:[%s490_s14] sm:$0xff] %v528_v0  ;;  %531 = vst [vmem:[%s490_s14 + $0x8] sm:$0xff] %v530_v1  ;;  %v534_v3 = vld [vmem:[%s494_s15 + $0x30] sm:$0xff] }
  0x32   : > { %533 = vst [vmem:[%s490_s14 + $0x10] sm:$0xff] %v532_v2  ;;  %535 = vst [vmem:[%s490_s14 + $0x18] sm:$0xff] %v534_v3 }
  0x33 PF: > { %553 = sbr.rel (!%p5510_p3) target bundleno = 63 (0x3f), region = 110  ;;  %s555_s20 = sand.u32 (%p5510_p3), 1, %s5334_s23  }
  0x34   : > { %s4383_s29 = sshll.u32 (%p5510_p3), %s5350_s27, 3  ;;  %s4382_s17 = sshll.u32 (%p5510_p3), %s555_s20, 4 }
  0x35   : > { %s559_s16 = sadd.s32 (%p5510_p3), %s5346_s26, %s4383_s29  ;;  %s7377_s2 = sld [smem:[#allocation18_spill]] (%p5510_p3) }
  0x36   : > { %s4384_s30 = sshll.u32 (%p5510_p3), %s559_s16, 2  ;;  %s557_s15 = scalar_lea.vmem (%p5510_p3), [#allocation4], %s4382_s17 }
  0x3b   : > { %s561_s21 = scalar_lea.vmem %s7377_s2, %s4384_s30 }
  0x3c   : > { %v577_v4 = vld [vmem:[%s561_s21] sm:$0xf]  ;;  %v579_v5 = vld [vmem:[%s561_s21 + $0x8] sm:$0xf]  ;;  %v581_v6 = vld [vmem:[%s561_s21 + $0x10] sm:$0xf] }
  0x3d   : > { %578 = vst [vmem:[%s557_s15] sm:$0xf] %v577_v4  ;;  %580 = vst [vmem:[%s557_s15 + $0x4] sm:$0xf] %v579_v5  ;;  %v583_v7 = vld [vmem:[%s561_s21 + $0x18] sm:$0xf] }
  0x3e   : > { %582 = vst [vmem:[%s557_s15 + $0x8] sm:$0xf] %v581_v6  ;;  %584 = vst [vmem:[%s557_s15 + $0xc] sm:$0xf] %v583_v7 }
  0x3f PF: > { %p4385_p12 = scmp.ge.s32.totalorder %s5354_s28, 1  ;;  %p626_p13 = scmp.lt.s32.totalorder %s5354_s28, 5 }
  0x41   : > { %p627_p0 = pnand %p4385_p12, %p626_p13 }
  0x42   : > { %s5552_s19 = sand.u32 (!%p627_p0), 1, %s5330_s22   ;;  %v7354_v8 = vmov (!%p627_p0), 0   ;;  %p711_p1 = scmp.lt.s32.totalorder (!%p627_p0), %s5342_s25, 1  ;;  %v794_v10 = vld [vmem:[%s7326_s5] sm:$0xff] (!%p627_p0)  ;;  %v795_v12 = vld [vmem:[%s7326_s5 + $0x8] sm:$0xff] (!%p627_p0)  ;;  %v796_v15 = vld [vmem:[%s7326_s5 + $0x10] sm:$0xff] (!%p627_p0)  ;;  %v770_v47 = vlaneseq (!%p627_p0) }
  0x43   : > { %630 = sbr.rel (%p627_p0) target bundleno = 2033 (0x7f1), region = 155  ;;  %s4387_s14 = sshll.u32 (!%p627_p0), %s5552_s19, 4  ;;  %907 = vmatprep.mubr.bf16.mxu0 (!%p627_p0), %v7354_v8  ;;  %4636 = vset.pattern.permute.xlu0 (!%p627_p0), %v7354_v8  ;;  %v798_v11 = vld [vmem:[%s7326_s5 + $0x20] sm:$0xff] (!%p627_p0)  ;;  %v799_v13 = vld [vmem:[%s7326_s5 + $0x28] sm:$0xff] (!%p627_p0)  ;;  %v797_v17 = vld [vmem:[%s7326_s5 + $0x18] sm:$0xff] (!%p627_p0)  ;;  %vm862_vm0 = vcmask (!%p627_p0), 261120  }
  0x44   : > { %4637 = vset.pattern.permute.xlu1 (!%p627_p0), %v7354_v8  ;;  %s5559_s20 = scalar_lea.vmem (!%p627_p0), [#allocation4], %s4387_s14  ;;  %p713_p2 = scmp.lt.s32.totalorder (!%p627_p0), %s5338_s24, 1  ;;  %804 = vperm.xlu0 (!%p627_p0), %4636, %v794_v10   ;;  %v800_v19 = vld [vmem:[%s7326_s5 + $0x30] sm:$0xff] (!%p627_p0)  ;;  %v5192_v20 = vld [vmem:[%s7325_s4] sm:$0xff] (!%p627_p0)   ;;  %v801_v21 = vld [vmem:[%s7326_s5 + $0x38] sm:$0xff] (!%p627_p0)  ;;  %v7352_v25 = vmov (!%p627_p0), 0.0  }
  0x45   : > { %v5188_v9 = vld [vmem:[%s5559_s20] sm:$0xff] (!%p627_p0)   ;;  %824 = vperm.xlu1 (!%p627_p0), %4637, %v798_v11   ;;  %v5190_v14 = vld [vmem:[%s5559_s20 + $0x8] sm:$0xff] (!%p627_p0)   ;;  %s7378_s1 = sld [smem:[#allocation17_spill]] (!%p627_p0)  ;;  %s4399_s26 = sshll.u32 (!%p627_p0), %s5338_s24, 7  ;;  %v771_v58 = vand.u32 (!%p627_p0), 127, %v770_v47  ;;  %vm1032_vm3 = vcmask (!%p627_p0), 1039360  }
  0x46   : > { %875 = vmatprep.subr.bf16.mxu0 (!%p627_p0), %v5188_v9  ;;  %v5193_v22 = vld [vmem:[%s7325_s4 + $0x8] sm:$0xff] (!%p627_p0)   ;;  %v5194_v23 = vld [vmem:[%s7325_s4 + $0x10] sm:$0xff] (!%p627_p0)   ;;  %v5195_v24 = vld [vmem:[%s7325_s4 + $0x18] sm:$0xff] (!%p627_p0)   ;;  %s774_s27 = ssub.s32 (!%p627_p0), 128, %s4399_s26  ;;  %s5360_s18 = smov (!%p627_p0), 125   ;;  %vm1077_vm4 = vcmask (!%p627_p0), 1031168  }
  0x47   : > { %v5196_v26 = vld [vmem:[%s7329_s8] sm:$0xff] (!%p627_p0)   ;;  %v5197_v27 = vld [vmem:[%s7329_s8 + $0x8] sm:$0xff] (!%p627_p0)   ;;  %v5198_v28 = vld [vmem:[%s7329_s8 + $0x10] sm:$0xff] (!%p627_p0)   ;;  %v775_v63 = vstv (!%p627_p0), %s774_s27  ;;  %v772_v0 = vadd.s32 (!%p627_p0), 128, %v771_v58  ;;  %vm1122_vm5 = vcmask (!%p627_p0), 1022976   ;;  %vm1396_vm6 = vcmask (!%p627_p0), 31744  }
  0x48   : > { %809 = vperm.xlu0 (!%p627_p0), %4636, %v795_v12   ;;  %v5199_v29 = vld [vmem:[%s7329_s8 + $0x18] sm:$0xff] (!%p627_p0)   ;;  %v5200_v30 = vld [vmem:[%s7329_s8 + $0x20] sm:$0xff] (!%p627_p0)   ;;  %v5201_v31 = vld [vmem:[%s7329_s8 + $0x28] sm:$0xff] (!%p627_p0)   ;;  %vm5673_vm1 = vcmp.lt.s32.totalorder (!%p627_p0), %v771_v58, %v775_v63  ;;  %v7350_v58 = vmov (!%p627_p0), 0.0|0.0   ;;  %vm1167_vm7 = vcmask (!%p627_p0), 1014784   ;;  %vm2633_vm8 = vcmask (!%p627_p0), 64512  }
  0x49   : > { %829 = vperm.xlu1 (!%p627_p0), %4637, %v799_v13   ;;  %v5202_v60 = vld [vmem:[%s7329_s8 + $0x30] sm:$0xff] (!%p627_p0)   ;;  %vm5677_vm2 = vcmp.lt.s32.totalorder (!%p627_p0), %v772_v0, %v775_v63  ;;  %vm2147_vm9 = vcmask (!%p627_p0), 998400   ;;  %vm2236_vm10 = vcmask (!%p627_p0), 982016   ;;  %vm2714_vm11 = vcmask (!%p627_p0), 523264   ;;  %s7388_s27 = sld [smem:[#allocation21_spill]] (!%p627_p0)  ;;  %s4388_s26 = sshll.u32 (!%p627_p0), %s5552_s19, 6 }
  0x4a   : > { %s712_s29 = scalar_select %p711_p1, %s5342_s25, 1  ;;  %vm3587_vm12 = vcmask 916480   ;;  %vm3984_vm13 = vcmask 130048   ;;  %vm3498_vm14 = vcmask 949248  }
  0x4b   : > { %s714_s17 = scalar_select %p713_p2, %s5338_s24, 1 }
  0x4c   : > { %s4390_s21 = sshll.u32 %s712_s29, 3  ;;  %814 = vperm.xlu0 %4636, %v796_v15   ;;  %s5368_s29 = smov 16  }
  0x4d   : > { %s4389_s15 = sshll.u32 %s714_s17, 2  ;;  %819 = vperm.xlu1 %4637, %v797_v17  }
  0x4e   : > { %s5577_s13 = sadd.s32 %s4390_s21, %s4389_s15  ;;  %s5358_s21 = smov 127  }
  0x4f   : > { %s4394_s16 = sshll.u32 %s5577_s13, 2  ;;  %s5359_s15 = smov 126  }
  0x50   : > { %s5587_s17 = scalar_lea.vmem %s7324_s3, %s4394_s16  ;;  %834 = vperm.xlu0 %4636, %v800_v19   ;;  %s4391_s0 = sshll.u32 %s5577_s13, 3 }
  0x51   : > { %v5189_v16 = vld [vmem:[%s5587_s17] sm:$0xff]   ;;  %v5191_v18 = vld [vmem:[%s5587_s17 + $0x8] sm:$0xff]   ;;  %839 = vperm.xlu1 %4637, %v801_v21   ;;  %s719_s2 = scalar_lea.vmem %s7378_s1, %s4391_s0  ;;  %s4386_s13 = sshll.u32 %s5552_s19, 5 }
  0x52   : > { %876 = vmatpush1.bf16.msra.mxu0 %v5189_v16  ;;  %v762_v34 = vld [vmem:[%s719_s2] sm:$0xff]  ;;  %v763_v39 = vld [vmem:[%s719_s2 + $0x8] sm:$0xff]  ;;  %v764_v48 = vld [vmem:[%s719_s2 + $0x10] sm:$0xff]  ;;  %s5667_s30 = scalar_lea.vmem [#allocation3], %s4386_s13  ;;  %s5364_s13 = smov 122  }
  0x53   : > { %877 = vmatprep.subr.bf16.mxu0 %v5190_v14  ;;  %v765_v53 = vld [vmem:[%s719_s2 + $0x18] sm:$0xff]  ;;  %v766_v62 = vld [vmem:[%s5667_s30] sm:$0xff]  ;;  %v767_v3 = vld [vmem:[%s5667_s30 + $0x8] sm:$0xff]  ;;  %s5361_s2 = smov 124  }
  0x54   : > { %4639 = vrot.lane.b32.xlu0 %v7352_v25, %s5358_s21 }
  0x55   : > { %4644 = vrot.lane.b32.xlu1 %v7352_v25, %s5358_s21 }
  0x56   : > { %878 = vmatpush1.bf16.msra.mxu0 %v5191_v18 }
  0x57   : > { %1698 = vmatprep.subr.bf16.mxu0 %v5188_v9 }
  0x58   : > { %4649 = vrot.lane.b32.xlu0 %v7352_v25, %s5359_s15 }
  0x59   : > { %4404 = vmatmul.mubr.msk.bf16.vlgmr.msra.gmra.mrb[0].mxu0 %vm862_vm0, %v5192_v20  ;;  %4654 = vrot.lane.b32.xlu1 %v7352_v25, %s5359_s15 }
  0x5a   : > { %917 = vmatprep.mubr.bf16.mxu0 %v7354_v8  ;;  %1699 = vmatpush1.bf16.msra.mxu0 %v5189_v16 }
  0x5b   : > { %1700 = vmatprep.subr.bf16.mxu0 %v5190_v14 }
  0x5e   : > { %1701 = vmatpush1.bf16.msra.mxu0 %v5191_v18 }
  0x61   : > { %4405 = vmatmul.mubr.msk.bf16.gmra.mrb[4].mxu0 %vm862_vm0, %v5193_v22 }
  0x62   : > { %927 = vmatprep.mubr.bf16.mxu0 %v7354_v8 }
  0x69   : > { %4406 = vmatmul.mubr.msk.bf16.gmra.mrb[8].mxu0 %vm862_vm0, %v5194_v23  ;;  %v768_v23 = vld [vmem:[%s5667_s30 + $0x10] sm:$0xff] }
  0x6a   : > { %937 = vmatprep.mubr.bf16.mxu0 %v7354_v8 }
  0x71   : > { %4407 = vmatmul.mubr.msk.bf16.gmra.mrb[12].mxu0 %vm862_vm0, %v5195_v24 }
  0x72   : > { %1730 = vmatprep.mubr.bf16.mxu0 %v7354_v8 }
  0x79   : > { %4428 = vmatmul.mubr.msk.bf16.vlgmr.msra.gmra.mrb[16].mxu0 %vm862_vm0, %v5196_v26 }
  0x7a   : > { %1740 = vmatprep.mubr.bf16.mxu0 %v7354_v8 }
  0x81   : > { %4429 = vmatmul.mubr.msk.bf16.gmra.mrb[20].mxu0 %vm862_vm0, %v5197_v27 }
  0x82   : > { %1750 = vmatprep.mubr.bf16.mxu0 %v7354_v8 }
  0x89   : > { %4430 = vmatmul.mubr.msk.bf16.gmra.mrb[24].mxu0 %vm862_vm0, %v5198_v28 }
  0x8a   : > { %1760 = vmatprep.mubr.bf16.mxu0 %v7354_v8 }
  0x91   : > { %4431 = vmatmul.mubr.msk.bf16.gmra.mrb[28].mxu0 %vm862_vm0, %v5199_v29 }
  0x92   : > { %1770 = vmatprep.mubr.bf16.mxu0 %v7354_v8 }
  0x99   : > { %4432 = vmatmul.mubr.msk.bf16.gmra.mrb[32].mxu0 %vm862_vm0, %v5200_v30 }
  0x9a   : > { %1780 = vmatprep.mubr.bf16.mxu0 %v7354_v8 }
  0xa1   : > { %4433 = vmatmul.mubr.msk.bf16.gmra.mrb[36].mxu0 %vm862_vm0, %v5201_v31 }
  0xa2   : > { %1790 = vmatprep.mubr.bf16.mxu0 %v7354_v8 }
  0xa9   : > { %4434 = vmatmul.mubr.msk.bf16.gmra.mrb[40].mxu0 %vm862_vm0, %v5202_v60 }
  0xaa   : > { %1800 = vmatprep.mubr.bf16.mxu0 %v7354_v8 }
  0xc3   : > { %v805_v32 = vpop.permute.xlu0 %804 }
  0xc4   : > { %v825_v33 = vpop.permute.xlu1 %824 }
  0xc7   : > { %v810_v36 = vpop.permute.xlu0 %809 }
  0xc8   : > { %v830_v41 = vpop.permute.xlu1 %829 }
  0xcb   : > { %v815_v46 = vpop.permute.xlu0 %814 }
  0xcc   : > { %v820_v50 = vpop.permute.xlu1 %819 }
  0xcf   : > { %v835_v28 = vpop.permute.xlu0 %834 }
 0x12c   : > { %v909_v35 = vpop.f32.mrb[0].mxu0 }
 0x12d   : > { %v910_v37 = vadd.f32 %v909_v35, %v805_v32  ;;  %v911_v38 = vpop.f32.mrb[1].mxu0 }
 0x12e   : > { %v913_v40 = vpop.f32.mrb[2].mxu0  ;;  %v912_v61 = vadd.f32 %v911_v38, %v805_v32  ;;  %v769_v32 = vld [vmem:[%s5667_s30 + $0x18] sm:$0xff]  ;;  %v840_v38 = vpop.permute.xlu1 %839  ;;  %s5366_s30 = smov 120  }
 0x12f   : > { %v948_v42 = vmul.f32 %v910_v37, %v762_v34  ;;  %v914_v43 = vadd.f32 %v913_v40, %v810_v36  ;;  %v915_v44 = vpop.f32.mrb[3].mxu0 }
 0x130   : > { %v916_v1 = vadd.f32 %v915_v44, %v810_v36  ;;  %v949_v6 = vmul.f32 %v912_v61, %v766_v62  ;;  %v5203_v36 = vld [vmem:[%s7329_s8 + $0x38] sm:$0xff]  }
 0x131   : > { %v950_v45 = vmul.f32 %v914_v43, %v763_v39  ;;  %4435 = vmatmul.mubr.msk.bf16.gmra.mrb[44].mxu0 %vm862_vm0, %v5203_v36 }
 0x132   : > { %v951_v15 = vmul.f32 %v916_v1, %v767_v3  ;;  %v4645_v60 = vpop.permute.xlu1 %4644 }
 0x134   : > { %v919_v49 = vpop.f32.mrb[4].mxu0 }
 0x135   : > { %v920_v51 = vadd.f32 %v919_v49, %v815_v46  ;;  %v921_v52 = vpop.f32.mrb[5].mxu0 }
 0x136   : > { %v923_v54 = vpop.f32.mrb[6].mxu0  ;;  %v922_v20 = vadd.f32 %v921_v52, %v815_v46  ;;  %v5725_v62 = vpop.permute.xlu1 %4654 }
 0x137   : > { %v952_v55 = vmul.f32 %v920_v51, %v764_v48  ;;  %v924_v56 = vadd.f32 %v923_v54, %v820_v50  ;;  %v925_v57 = vpop.f32.mrb[7].mxu0 }
 0x138   : > { %v926_v27 = vadd.f32 %v925_v57, %v820_v50  ;;  %v953_v37 = vmul.f32 %v922_v20, %v768_v23 }
 0x139   : > { %v954_v59 = vmul.f32 %v924_v56, %v765_v53 }
 0x13c   : > { %v929_v2 = vpop.f32.mrb[8].mxu0 }
 0x13d   : > { %v930_v4 = vadd.f32 %v929_v2, %v825_v33  ;;  %v931_v5 = vpop.f32.mrb[9].mxu0 }
 0x13e   : > { %v932_v9 = vadd.f32 %v931_v5, %v825_v33  ;;  %v933_v10 = vpop.f32.mrb[10].mxu0 }
 0x13f   : > { %v956_v11 = vadd.f32 %v948_v42, %v930_v4  ;;  %v934_v13 = vadd.f32 %v933_v10, %v830_v41  ;;  %v935_v14 = vpop.f32.mrb[11].mxu0 }
 0x140   : > { %v957_v16 = vadd.f32 %v949_v6, %v932_v9  ;;  %v936_v17 = vadd.f32 %v935_v14, %v830_v41 }
 0x141   : > { %v968_v18 = vsel %vm5673_vm1, 0.0, %v956_v11  ;;  %v958_v19 = vadd.f32 %v950_v45, %v934_v13  ;;  %v955_v45 = vmul.f32 %v926_v27, %v769_v32 }
 0x142   : > { %v969_v21 = vsel %vm5677_vm2, 0.0, %v957_v16  ;;  %v959_v22 = vadd.f32 %v951_v15, %v936_v17 }
 0x143   : > { %v970_v24 = vsel %vm5673_vm1, 0.0, %v958_v19  ;;  %v4658_v26 = vpack.i.bf16 %v969_v21, %v968_v18 }
 0x144   : > { %v971_v29 = vsel %vm5677_vm2, 0.0, %v959_v22  ;;  %v939_v30 = vpop.f32.mrb[12].mxu0  ;;  %v1185_v31 = vpack.c.bf16 %v970_v24, %v968_v18 }
 0x145   : > { %v940_v33 = vadd.f32 %v939_v30, %v835_v28  ;;  %v941_v34 = vpop.f32.mrb[13].mxu0  ;;  %4659 = vrot.lane.b32.xlu0 %v4658_v26, %s5358_s21  ;;  %v4668_v35 = vpack.i.bf16 %v971_v29, %v970_v24  ;;  %v1186_v41 = vpack.c.bf16 %v971_v29, %v969_v21  ;;  %v4646_v30 = vunpack.i.l.bf16 %v4645_v60 }
 0x146   : > { %v942_v39 = vadd.f32 %v941_v34, %v835_v28  ;;  %v943_v40 = vpop.f32.mrb[14].mxu0 }
 0x147   : > { %v960_v42 = vadd.f32 %v952_v55, %v940_v33  ;;  %v944_v43 = vadd.f32 %v943_v40, %v840_v38  ;;  %v945_v44 = vpop.f32.mrb[15].mxu0  ;;  %4669 = vrot.lane.b32.xlu1 %v4668_v35, %s5358_s21 }
 0x148   : > { %v961_v46 = vadd.f32 %v953_v37, %v942_v39  ;;  %v946_v47 = vadd.f32 %v945_v44, %v840_v38 }
 0x149   : > { %v972_v48 = vsel %vm5673_vm1, 0.0, %v960_v42  ;;  %v962_v49 = vadd.f32 %v954_v59, %v944_v43  ;;  %4664 = vrot.lane.b32.xlu0 %v4658_v26, %s5359_s15  ;;  %v4640_v59 = vpop.permute.xlu0 %4639  ;;  %v4657_v42 = vunpack.i.h.bf16 %v5725_v62 }
 0x14a   : > { %v973_v50 = vsel %vm5677_vm2, 0.0, %v961_v46  ;;  %v963_v51 = vadd.f32 %v955_v45, %v946_v47  ;;  %v4642_v1 = vunpack.i.h.bf16 %v4640_v59  ;;  %v4641_v3 = vunpack.i.l.bf16 %v4640_v59 }
 0x14b   : > { %v974_v52 = vsel %vm5673_vm1, 0.0, %v962_v49  ;;  %4674 = vrot.lane.b32.xlu1 %v4668_v35, %s5359_s15  ;;  %v4678_v53 = vpack.i.bf16 %v973_v50, %v972_v48  ;;  %v4656_v47 = vunpack.i.l.bf16 %v5725_v62 }
 0x14c   : > { %v975_v54 = vsel %vm5677_vm2, 0.0, %v963_v51  ;;  %v1188_v55 = vpack.c.bf16 %v974_v52, %v972_v48 }
 0x14d   : > { %v4688_v56 = vpack.i.bf16 %v975_v54, %v974_v52  ;;  %v1189_v57 = vpack.c.bf16 %v975_v54, %v973_v50  ;;  %v4650_v61 = vpop.permute.xlu0 %4649 }
 0x14e   : > { %v4652_v15 = vunpack.i.h.bf16 %v4650_v61  ;;  %v4651_v18 = vunpack.i.l.bf16 %v4650_v61 }
 0x14f   : > { %4679 = vrot.lane.b32.xlu1 %v4678_v53, %s5358_s21  ;;  %4689 = vrot.lane.b32.xlu0 %v4688_v56, %s5358_s21  ;;  %s5362_s21 = smov 4  }
 0x153   : > { %4684 = vrot.lane.b32.xlu1 %v4678_v53, %s5359_s15  ;;  %4694 = vrot.lane.b32.xlu0 %v4658_v26, %s5360_s18 }
 0x157   : > { %4699 = vrot.lane.b32.xlu1 %v4668_v35, %s5360_s18  ;;  %4704 = vrot.lane.b32.xlu0 %v4688_v56, %s5359_s15 }
 0x15b   : > { %4714 = vrot.lane.b32.xlu1 %v4678_v53, %s5360_s18  ;;  %4709 = vrot.lane.b32.xlu0 %v7352_v25, %s5360_s18 }
 0x15f   : > { %4719 = vrot.lane.b32.xlu1 %v7352_v25, %s5360_s18  ;;  %4724 = vrot.lane.b32.xlu0 %v4688_v56, %s5360_s18  ;;  %s7384_s18 = sld [smem:[#allocation19_spill]] }
 0x163   : > { %4734 = vrot.lane.b32.xlu1 %v4668_v35, %s5361_s2  ;;  %4729 = vrot.lane.b32.xlu0 %v4658_v26, %s5361_s2  ;;  %v4647_v26 = vunpack.i.h.bf16 %v4645_v60 }
 0x167   : > { %4744 = vrot.lane.b32.xlu1 %v4688_v56, %s5361_s2  ;;  %4739 = vrot.lane.b32.xlu0 %v4678_v53, %s5361_s2 }
 0x16b   : > { %1338 = vrot.lane.b32.xlu0 %v1185_v31, %s5362_s21  ;;  %1340 = vrot.lane.b32.xlu1 %v1186_v41, %s5362_s21 }
 0x16f   : > { %1336 = vrot.lane.b32.xlu0 %v7350_v58, %s5362_s21  ;;  %1342 = vrot.lane.b32.xlu1 %v7350_v58, %s5362_s21 }
 0x173   : > { %1346 = vrot.lane.b32.xlu0 %v1189_v57, %s5362_s21  ;;  %1344 = vrot.lane.b32.xlu1 %v1188_v55, %s5362_s21 }
 0x1b7   : > { %v4660_v63 = vpop.permute.xlu0 %4659 }
 0x1b8   : > { %v4661_v0 = vunpack.i.l.bf16 %v4660_v63  ;;  %v4662_v4 = vunpack.i.h.bf16 %v4660_v63 }
 0x1b9   : > { %v4670_v2 = vpop.permute.xlu1 %4669 }
 0x1ba   : > { %v4672_v5 = vunpack.i.h.bf16 %v4670_v2  ;;  %v4671_v6 = vunpack.i.l.bf16 %v4670_v2  ;;  %v1033_v13 = vsel %vm1032_vm3, %v4641_v3, %v4661_v0  ;;  %v1034_v34 = vsel %vm1032_vm3, %v4661_v0, %v4662_v4 }
 0x1bb   : > { %v4665_v9 = vpop.permute.xlu0 %4664 }
 0x1bc   : > { %v4666_v10 = vunpack.i.l.bf16 %v4665_v9  ;;  %v1192_v11 = vpack.c.bf16 %v4672_v5, %v4662_v4  ;;  %v1035_v14 = vsel %vm1032_vm3, %v4642_v1, %v4671_v6  ;;  %v4667_v19 = vunpack.i.h.bf16 %v4665_v9 }
 0x1bd   : > { %v4675_v16 = vpop.permute.xlu1 %4674  ;;  %v1190_v17 = vpack.c.bf16 %v1035_v14, %v1033_v13  ;;  %v1036_v33 = vsel %vm1032_vm3, %v4671_v6, %v4672_v5 }
 0x1be   : > { %v4677_v20 = vunpack.i.h.bf16 %v4675_v16  ;;  %v4676_v21 = vunpack.i.l.bf16 %v4675_v16  ;;  %1352 = vrot.lane.b32.xlu1 %v1192_v11, %s5362_s21  ;;  %v1078_v23 = vsel %vm1077_vm4, %v4651_v18, %v4666_v10  ;;  %v1191_v39 = vpack.c.bf16 %v1036_v33, %v1034_v34 }
 0x1bf   : > { %1348 = vrot.lane.b32.xlu0 %v1190_v17, %s5362_s21  ;;  %v1079_v46 = vsel %vm1077_vm4, %v4666_v10, %v4667_v19 }
 0x1c0   : > { %v1198_v22 = vpack.c.bf16 %v4677_v20, %v4667_v19  ;;  %v1080_v24 = vsel %vm1077_vm4, %v4652_v15, %v4676_v21  ;;  %v1081_v41 = vsel %vm1077_vm4, %v4676_v21, %v4677_v20 }
 0x1c1   : > { %v4680_v27 = vpop.permute.xlu1 %4679  ;;  %v4690_v28 = vpop.permute.xlu0 %4689  ;;  %v1196_v29 = vpack.c.bf16 %v1080_v24, %v1078_v23  ;;  %v1197_v51 = vpack.c.bf16 %v1081_v41, %v1079_v46 }
 0x1c2   : > { %v4681_v31 = vunpack.i.l.bf16 %v4680_v27  ;;  %v4691_v32 = vunpack.i.l.bf16 %v4690_v28  ;;  %1364 = vrot.lane.b32.xlu1 %v1198_v22, %s5362_s21  ;;  %v4682_v48 = vunpack.i.h.bf16 %v4680_v27  ;;  %v4692_v52 = vunpack.i.h.bf16 %v4690_v28 }
 0x1c3   : > { %1360 = vrot.lane.b32.xlu0 %v1196_v29, %s5362_s21 }
 0x1c4   : > { %v1037_v35 = vsel %vm1032_vm3, %v4646_v30, %v4681_v31  ;;  %v1039_v36 = vsel %vm1032_vm3, %v4647_v26, %v4691_v32  ;;  %v1038_v1 = vsel %vm1032_vm3, %v4681_v31, %v4682_v48  ;;  %v1040_v2 = vsel %vm1032_vm3, %v4691_v32, %v4692_v52 }
 0x1c5   : > { %v4685_v37 = vpop.permute.xlu1 %4684  ;;  %v4695_v38 = vpop.permute.xlu0 %4694  ;;  %v1193_v40 = vpack.c.bf16 %v1039_v36, %v1037_v35  ;;  %v1195_v6 = vpack.c.bf16 %v4692_v52, %v4682_v48  ;;  %v1194_v9 = vpack.c.bf16 %v1040_v2, %v1038_v1 }
 0x1c6   : > { %v4686_v43 = vunpack.i.l.bf16 %v4685_v37  ;;  %v4697_v44 = vunpack.i.h.bf16 %v4695_v38  ;;  %v4696_v45 = vunpack.i.l.bf16 %v4695_v38  ;;  %v4687_v10 = vunpack.i.h.bf16 %v4685_v37 }
 0x1c7   : > { %1350 = vrot.lane.b32.xlu0 %v1191_v39, %s5362_s21  ;;  %1354 = vrot.lane.b32.xlu1 %v1193_v40, %s5362_s21 }
 0x1c8   : > { %v1124_v56 = vsel %vm1122_vm5, %v4696_v45, %v4697_v44  ;;  %v1082_v59 = vsel %vm1077_vm4, %v4656_v47, %v4686_v43  ;;  %v1083_v26 = vsel %vm1077_vm4, %v4686_v43, %v4687_v10 }
 0x1c9   : > { %v4700_v49 = vpop.permute.xlu1 %4699  ;;  %v4705_v50 = vpop.permute.xlu0 %4704 }
 0x1ca   : > { %v4702_v53 = vunpack.i.h.bf16 %v4700_v49  ;;  %v4701_v54 = vunpack.i.l.bf16 %v4700_v49  ;;  %v4706_v55 = vunpack.i.l.bf16 %v4705_v50  ;;  %v4707_v3 = vunpack.i.h.bf16 %v4705_v50 }
 0x1cb   : > { %1362 = vrot.lane.b32.xlu0 %v1197_v51, %s5362_s21 }
 0x1cc   : > { %v1126_v57 = vsel %vm1122_vm5, %v4701_v54, %v4702_v53  ;;  %v1084_v60 = vsel %vm1077_vm4, %v4657_v42, %v4706_v55  ;;  %v1201_v14 = vpack.c.bf16 %v4707_v3, %v4687_v10  ;;  %v1204_v15 = vpack.c.bf16 %v4702_v53, %v4697_v44 }
 0x1cd   : > { %v4715_v61 = vpop.permute.xlu1 %4714  ;;  %v4710_v62 = vpop.permute.xlu0 %4709  ;;  %v1203_v63 = vpack.c.bf16 %v1126_v57, %v1124_v56  ;;  %v1199_v0 = vpack.c.bf16 %v1084_v60, %v1082_v59  ;;  %v1085_v21 = vsel %vm1077_vm4, %v4706_v55, %v4707_v3  ;;  %v5206_v57 = vld [vmem:[%s7327_s6 + $0x4] ss:$8 sps:$4 sm:$0xff]  }
 0x1ce   : > { %v4712_v11 = vunpack.i.h.bf16 %v4710_v62  ;;  %v4711_v13 = vunpack.i.l.bf16 %v4710_v62  ;;  %v4716_v24 = vunpack.i.l.bf16 %v4715_v61  ;;  %v1200_v27 = vpack.c.bf16 %v1085_v21, %v1083_v26  ;;  %v5787_v59 = vpop.f32.mrb[16].mxu0  ;;  %4416 = vmatprep.mubr.msk.bf16.mxu1 %vm862_vm0, %v5206_v57  ;;  %v1538_v21 = vld [vmem:[%s7330_s9] sm:$0xff]  ;;  %v1544_v57 = vld [vmem:[%s7330_s9 + $0x30] sm:$0xff] }
 0x1cf   : > { %1374 = vrot.lane.b32.xlu0 %v1203_v63, %s5362_s21  ;;  %1366 = vrot.lane.b32.xlu1 %v1199_v0, %s5362_s21  ;;  %v4717_v38 = vunpack.i.h.bf16 %v4715_v61 }
 0x1d0   : > { %v1123_v22 = vsel %vm1122_vm5, %v4711_v13, %v4696_v45  ;;  %v1125_v23 = vsel %vm1122_vm5, %v4712_v11, %v4701_v54 }
 0x1d1   : > { %v4720_v4 = vpop.permute.xlu1 %4719  ;;  %v4725_v5 = vpop.permute.xlu0 %4724  ;;  %v1202_v31 = vpack.c.bf16 %v1125_v23, %v1123_v22  ;;  %v1128_v47 = vsel %vm1122_vm5, %v4716_v24, %v4717_v38  ;;  %v1223_v22 = vld [vmem:[%s7328_s7 + $0x8] sm:$0xff] }
 0x1d2   : > { %v4722_v16 = vunpack.i.h.bf16 %v4720_v4  ;;  %v4721_v17 = vunpack.i.l.bf16 %v4720_v4  ;;  %v4726_v18 = vunpack.i.l.bf16 %v4725_v5  ;;  %v4727_v28 = vunpack.i.h.bf16 %v4725_v5  ;;  %v5794_v4 = vpop.f32.mrb[17].mxu0 }
 0x1d3   : > { %1358 = vrot.lane.b32.xlu0 %v1195_v6, %s5362_s21  ;;  %1356 = vrot.lane.b32.xlu1 %v1194_v9, %s5362_s21  ;;  %v5798_v5 = vpop.f32.mrb[18].mxu0 }
 0x1d4   : > { %v1127_v32 = vsel %vm1122_vm5, %v4721_v17, %v4716_v24  ;;  %v1129_v33 = vsel %vm1122_vm5, %v4722_v16, %v4726_v18  ;;  %v1207_v41 = vpack.c.bf16 %v4727_v28, %v4717_v38  ;;  %v1130_v46 = vsel %vm1122_vm5, %v4726_v18, %v4727_v28  ;;  %v5800_v6 = vpop.f32.mrb[19].mxu0  ;;  %v1546_v28 = vld [vmem:[%s7330_s9 + $0x40] sm:$0xff]  ;;  %v1225_v38 = vld [vmem:[%s7328_s7 + $0x18] sm:$0xff] }
 0x1d5   : > { %v4735_v19 = vpop.permute.xlu1 %4734  ;;  %v4730_v20 = vpop.permute.xlu0 %4729  ;;  %v1205_v42 = vpack.c.bf16 %v1129_v33, %v1127_v32  ;;  %v1206_v52 = vpack.c.bf16 %v1130_v46, %v1128_v47  ;;  %v1542_v47 = vld [vmem:[%s7330_s9 + $0x20] sm:$0xff] }
 0x1d6   : > { %v4737_v34 = vunpack.i.h.bf16 %v4735_v19  ;;  %v4736_v35 = vunpack.i.l.bf16 %v4735_v19  ;;  %v4732_v36 = vunpack.i.h.bf16 %v4730_v20  ;;  %v4731_v37 = vunpack.i.l.bf16 %v4730_v20  ;;  %v5802_v11 = vpop.f32.mrb[20].mxu0 }
 0x1d7   : > { %1370 = vrot.lane.b32.xlu0 %v1201_v14, %s5362_s21  ;;  %1376 = vrot.lane.b32.xlu1 %v1204_v15, %s5362_s21  ;;  %v5804_v13 = vpop.f32.mrb[21].mxu0  ;;  %v1222_v15 = vld [vmem:[%s7328_s7] sm:$0xff] }
 0x1d8   : > { %v1168_v44 = vsel %vm1167_vm7, %v4731_v37, %v4732_v36  ;;  %v1169_v45 = vsel %vm1167_vm7, %v4736_v35, %v4737_v34  ;;  %v1208_v62 = vpack.c.bf16 %v4736_v35, %v4731_v37  ;;  %v1210_v63 = vpack.c.bf16 %v4737_v34, %v4732_v36  ;;  %v5808_v14 = vpop.f32.mrb[22].mxu0  ;;  %v1224_v34 = vld [vmem:[%s7328_s7 + $0x10] sm:$0xff]  ;;  %v1547_v35 = vld [vmem:[%s7330_s9 + $0x48] sm:$0xff] }
 0x1d9   : > { %v5762_v29 = vpop.permute.xlu1 %4744  ;;  %v5764_v30 = vpop.permute.xlu0 %4739  ;;  %v1209_v51 = vpack.c.bf16 %v1169_v45, %v1168_v44  ;;  %v1540_v37 = vld [vmem:[%s7330_s9 + $0x10] sm:$0xff]  ;;  %v1226_v44 = vld [vmem:[%s7328_s7 + $0x20] sm:$0xff]  ;;  %v1549_v45 = vld [vmem:[%s7330_s9 + $0x58] sm:$0xff] }
 0x1da   : > { %v4747_v48 = vunpack.i.h.bf16 %v5762_v29  ;;  %v4746_v53 = vunpack.i.l.bf16 %v5762_v29  ;;  %v4742_v54 = vunpack.i.h.bf16 %v5764_v30  ;;  %v4741_v55 = vunpack.i.l.bf16 %v5764_v30  ;;  %v5813_v16 = vpop.f32.mrb[23].mxu0  ;;  %v1539_v29 = vld [vmem:[%s7330_s9 + $0x8] sm:$0xff] }
 0x1db   : > { %1372 = vrot.lane.b32.xlu0 %v1202_v31, %s5362_s21  ;;  %1368 = vrot.lane.b32.xlu1 %v1200_v27, %s5362_s21  ;;  %v5815_v18 = vpop.f32.mrb[24].mxu0 }
 0x1dc   : > { %v1170_v2 = vsel %vm1167_vm7, %v4741_v55, %v4742_v54  ;;  %v1171_v3 = vsel %vm1167_vm7, %v4746_v53, %v4747_v48  ;;  %v1213_v9 = vpack.c.bf16 %v4747_v48, %v4742_v54  ;;  %v1211_v17 = vpack.c.bf16 %v4746_v53, %v4741_v55  ;;  %v5817_v19 = vpop.f32.mrb[25].mxu0  ;;  %v1227_v48 = vld [vmem:[%s7328_s7 + $0x28] sm:$0xff]  ;;  %v1228_v53 = vld [vmem:[%s7328_s7 + $0x30] sm:$0xff] }
 0x1dd   : > { %v1339_v39 = vpop.permute.xlu0 %1338  ;;  %v1341_v40 = vpop.permute.xlu1 %1340  ;;  %v1212_v10 = vpack.c.bf16 %v1171_v3, %v1170_v2  ;;  %v1551_v54 = vld [vmem:[%s7330_s9 + $0x68] sm:$0xff] }
 0x1de   : > { %v1398_v43 = vsel %vm1396_vm6, %v1339_v39, %v1341_v40  ;;  %v5820_v20 = vpop.f32.mrb[26].mxu0  ;;  %v1548_v40 = vld [vmem:[%s7330_s9 + $0x50] sm:$0xff] }
 0x1df   : > { %1382 = vrot.lane.b32.xlu0 %v1207_v41, %s5362_s21  ;;  %1378 = vrot.lane.b32.xlu1 %v1205_v42, %s5362_s21  ;;  %v5828_v23 = vpop.f32.mrb[27].mxu0  ;;  %v1541_v41 = vld [vmem:[%s7330_s9 + $0x18] sm:$0xff] }
 0x1e0   : > { %1449 = vmatprep.subr.bf16.mxu1 %v1398_v43  ;;  %v5830_v24 = vpop.f32.mrb[28].mxu0 }
 0x1e1   : > { %v1337_v49 = vpop.permute.xlu0 %1336  ;;  %v1343_v50 = vpop.permute.xlu1 %1342 }
 0x1e2   : > { %v1397_v56 = vsel %vm1396_vm6, %v1337_v49, %v1339_v39  ;;  %v5832_v26 = vpop.f32.mrb[29].mxu0  ;;  %v1550_v49 = vld [vmem:[%s7330_s9 + $0x60] sm:$0xff] }
 0x1e3   : > { %1386 = vrot.lane.b32.xlu0 %v1209_v51, %s5362_s21  ;;  %1380 = vrot.lane.b32.xlu1 %v1206_v52, %s5362_s21  ;;  %v5834_v27 = vpop.f32.mrb[30].mxu0 }
 0x1e4   : > { %1450 = vmatpush1.bf16.msra.mxu1 %v1397_v56  ;;  %v5842_v30 = vpop.f32.mrb[31].mxu0 }
 0x1e5   : > { %v1347_v60 = vpop.permute.xlu0 %1346  ;;  %v1345_v61 = vpop.permute.xlu1 %1344 }
 0x1e6   : > { %v1400_v0 = vsel %vm1396_vm6, %v1345_v61, %v1347_v60  ;;  %v1399_v1 = vsel %vm1396_vm6, %v1343_v50, %v1345_v61  ;;  %v5844_v31 = vpop.f32.mrb[32].mxu0  ;;  %v1543_v50 = vld [vmem:[%s7330_s9 + $0x28] sm:$0xff]  ;;  %v1229_v60 = vld [vmem:[%s7328_s7 + $0x38] sm:$0xff]  ;;  %v1552_v61 = vld [vmem:[%s7330_s9 + $0x70] sm:$0xff] }
 0x1e7   : > { %1384 = vrot.lane.b32.xlu0 %v1208_v62, %s5362_s21  ;;  %1388 = vrot.lane.b32.xlu1 %v1210_v63, %s5362_s21  ;;  %v5846_v32 = vpop.f32.mrb[33].mxu0  ;;  %v1545_v62 = vld [vmem:[%s7330_s9 + $0x38] sm:$0xff] }
 0x1e8   : > { %1451 = vmatprep.subr.bf16.mxu1 %v1400_v0  ;;  %v5848_v33 = vpop.f32.mrb[34].mxu0 }
 0x1e9   : > { %1452 = vmatpush1.bf16.msra.mxu1 %v1399_v1  ;;  %v5856_v36 = vpop.f32.mrb[35].mxu0  ;;  %v1553_v1 = vld [vmem:[%s7330_s9 + $0x78] sm:$0xff] }
 0x1ea   : > { %v5864_v39 = vpop.f32.mrb[36].mxu0 }
 0x1eb   : > { %1394 = vrot.lane.b32.xlu0 %v1213_v9, %s5362_s21  ;;  %1392 = vrot.lane.b32.xlu1 %v1212_v10, %s5362_s21  ;;  %v5872_v42 = vpop.f32.mrb[37].mxu0 }
 0x1ec   : > { %v5874_v43 = vpop.f32.mrb[38].mxu0 }
 0x1ed   : > { %v5882_v46 = vpop.f32.mrb[39].mxu0 }
 0x1ee   : > { %v5896_v51 = vpop.f32.mrb[40].mxu0 }
 0x1ef   : > { %1232 = vperm.xlu0 %4636, %v1222_v15   ;;  %1390 = vrot.lane.b32.xlu1 %v1211_v17, %s5362_s21  ;;  %v5898_v52 = vpop.f32.mrb[41].mxu0  ;;  %s5369_s21 = smov 112  }
 0x1f0   : > { %v5906_v55 = vpop.f32.mrb[42].mxu0 }
 0x1f1   : > { %v5908_v56 = vpop.f32.mrb[43].mxu0 }
 0x1f3   : > { %1556 = vperm.xlu0 %4636, %v1538_v21   ;;  %1237 = vperm.xlu1 %4637, %v1223_v22  }
 0x1f7   : > { %1596 = vperm.xlu0 %4636, %v1546_v28   ;;  %1561 = vperm.xlu1 %4637, %v1539_v29  }
 0x1fb   : > { %1242 = vperm.xlu0 %4636, %v1224_v34   ;;  %1601 = vperm.xlu1 %4637, %v1547_v35  }
 0x1ff   : > { %1566 = vperm.xlu0 %4636, %v1540_v37   ;;  %1247 = vperm.xlu1 %4637, %v1225_v38  }
 0x203   : > { %1606 = vperm.xlu0 %4636, %v1548_v40   ;;  %1571 = vperm.xlu1 %4637, %v1541_v41  }
 0x204   : > { %v5922_v63 = vpop.f32.mrb[44].mxu0 }
 0x205   : > { %v5924_v0 = vpop.f32.mrb[45].mxu0 }
 0x206   : > { %v5929_v2 = vpop.f32.mrb[46].mxu0 }
 0x207   : > { %1252 = vperm.xlu0 %4636, %v1226_v44   ;;  %1611 = vperm.xlu1 %4637, %v1549_v45   ;;  %v5931_v3 = vpop.f32.mrb[47].mxu0 }
 0x20b   : > { %1576 = vperm.xlu0 %4636, %v1542_v47   ;;  %1257 = vperm.xlu1 %4637, %v1227_v48  }
 0x20f   : > { %1616 = vperm.xlu0 %4636, %v1550_v49   ;;  %1581 = vperm.xlu1 %4637, %v1543_v50  }
 0x213   : > { %1262 = vperm.xlu0 %4636, %v1228_v53   ;;  %1621 = vperm.xlu1 %4637, %v1551_v54  }
 0x217   : > { %1586 = vperm.xlu0 %4636, %v1544_v57   ;;  %1267 = vperm.xlu1 %4637, %v1229_v60  }
 0x21b   : > { %1626 = vperm.xlu0 %4636, %v1552_v61   ;;  %1591 = vperm.xlu1 %4637, %v1545_v62  }
 0x21f   : > { %1631 = vperm.xlu1 %4637, %v1553_v1   ;;  %4749 = vrot.lane.b32.xlu0 %v7352_v25, %s5359_s15 }
 0x223   : > { %4754 = vrot.lane.b32.xlu1 %v7352_v25, %s5359_s15  ;;  %4759 = vrot.lane.b32.xlu0 %v7352_v25, %s5359_s15 }
 0x227   : > { %4764 = vrot.lane.b32.xlu1 %v7352_v25, %s5359_s15  ;;  %4769 = vrot.lane.b32.xlu0 %v7352_v25, %s5361_s2 }
 0x22b   : > { %4774 = vrot.lane.b32.xlu1 %v7352_v25, %s5361_s2  ;;  %4779 = vrot.lane.b32.xlu0 %v7352_v25, %s5361_s2 }
 0x22f   : > { %4784 = vrot.lane.b32.xlu1 %v7352_v25, %s5361_s2  ;;  %4789 = vrot.lane.b32.xlu0 %v7352_v25, %s5364_s13 }
 0x230   : > { %v1353_v9 = vpop.permute.xlu1 %1352 }
 0x231   : > { %v1349_v10 = vpop.permute.xlu0 %1348 }
 0x233   : > { %4794 = vrot.lane.b32.xlu1 %v7352_v25, %s5364_s13  ;;  %4799 = vrot.lane.b32.xlu0 %v7352_v25, %s5364_s13 }
 0x234   : > { %v1365_v17 = vpop.permute.xlu1 %1364 }
 0x235   : > { %v1361_v15 = vpop.permute.xlu0 %1360 }
 0x237   : > { %4804 = vrot.lane.b32.xlu1 %v7352_v25, %s5364_s13 }
 0x239   : > { %v1351_v21 = vpop.permute.xlu0 %1350  ;;  %v1355_v29 = vpop.permute.xlu1 %1354 }
 0x23a   : > { %v1402_v22 = vsel %vm1396_vm6, %v1351_v21, %v1353_v9  ;;  %v1401_v28 = vsel %vm1396_vm6, %v1349_v10, %v1351_v21 }
 0x23b   : > { %1453 = vmatprep.subr.bf16.mxu1 %v1402_v22 }
 0x23c   : > { %1454 = vmatpush1.bf16.msra.mxu1 %v1401_v28 }
 0x23d   : > { %v1363_v34 = vpop.permute.xlu0 %1362 }
 0x23e   : > { %v1406_v45 = vsel %vm1396_vm6, %v1363_v34, %v1365_v17  ;;  %v1405_v49 = vsel %vm1396_vm6, %v1361_v15, %v1363_v34 }
 0x241   : > { %v1375_v35 = vpop.permute.xlu0 %1374  ;;  %v1367_v37 = vpop.permute.xlu1 %1366 }
 0x245   : > { %v1359_v38 = vpop.permute.xlu0 %1358  ;;  %v1357_v40 = vpop.permute.xlu1 %1356 }
 0x246   : > { %v1404_v41 = vsel %vm1396_vm6, %v1357_v40, %v1359_v38  ;;  %v1403_v44 = vsel %vm1396_vm6, %v1355_v29, %v1357_v40 }
 0x247   : > { %1455 = vmatprep.subr.bf16.mxu1 %v1404_v41  ;;  %v5204_v41 = vld [vmem:[%s7327_s6] ss:$8 sps:$4 sm:$0xff]  }
 0x248   : > { %1456 = vmatpush1.bf16.msra.mxu1 %v1403_v44  ;;  %v5207_v44 = vld [vmem:[%s7327_s6 + $0x14] ss:$8 sps:$4 sm:$0xff]  }
 0x249   : > { %v1371_v47 = vpop.permute.xlu0 %1370  ;;  %1457 = vmatprep.subr.bf16.mxu1 %v1406_v45  ;;  %v1377_v48 = vpop.permute.xlu1 %1376  ;;  %v5256_v45 = vld [vmem:[%s5559_s20] sm:$0xff]  }
 0x24a   : > { %v1410_v60 = vsel %vm1396_vm6, %v1375_v35, %v1377_v48  ;;  %v5258_v48 = vld [vmem:[%s5559_s20 + $0x8] sm:$0xff]   ;;  %s7389_s20 = smov %s7388_s27 }
 0x24c   : > { %1458 = vmatpush1.bf16.msra.mxu1 %v1405_v49  ;;  %v5209_v49 = vld [vmem:[%s7327_s6 + $0x10] ss:$8 sps:$4 sm:$0xff]  }
 0x24d   : > { %v1373_v50 = vpop.permute.xlu0 %1372  ;;  %v1369_v53 = vpop.permute.xlu1 %1368 }
 0x24e   : > { %v1408_v54 = vsel %vm1396_vm6, %v1369_v53, %v1371_v47  ;;  %v1407_v57 = vsel %vm1396_vm6, %v1367_v37, %v1369_v53  ;;  %v1409_v1 = vsel %vm1396_vm6, %v1373_v50, %v1375_v35  ;;  %v5257_v47 = vld [vmem:[%s5587_s17] sm:$0xff]   ;;  %v5259_v53 = vld [vmem:[%s5587_s17 + $0x8] sm:$0xff]   ;;  %s7357_s17 = smov 8  }
 0x24f   : > { %1459 = vmatprep.subr.bf16.mxu1 %v1408_v54  ;;  %v5210_v50 = vld [vmem:[%s7327_s6 + $0x24] ss:$8 sps:$4 sm:$0xff]   ;;  %v5212_v54 = vld [vmem:[%s7327_s6 + $0x20] ss:$8 sps:$4 sm:$0xff]   ;;  %2513 = vrot.lane.b32.xlu0 %v7350_v58, %s7357_s17 }
 0x250   : > { %1460 = vmatpush1.bf16.msra.mxu1 %v1407_v57  ;;  %v5213_v57 = vld [vmem:[%s7327_s6 + $0x34] ss:$8 sps:$4 sm:$0xff]   ;;  %2519 = vrot.lane.b32.xlu1 %v7350_v58, %s7357_s17 }
 0x251   : > { %v1383_v61 = vpop.permute.xlu0 %1382  ;;  %1461 = vmatprep.subr.bf16.mxu1 %v1410_v60  ;;  %v1379_v62 = vpop.permute.xlu1 %1378  ;;  %v5215_v60 = vld [vmem:[%s7327_s6 + $0x30] ss:$8 sps:$4 sm:$0xff]  }
 0x253   : > { %2525 = vrot.lane.b32.xlu0 %v7350_v58, %s7357_s17 }
 0x254   : > { %1462 = vmatpush1.bf16.msra.mxu1 %v1409_v1  ;;  %2531 = vrot.lane.b32.xlu1 %v7350_v58, %s7357_s17 }
 0x255   : > { %v1387_v9 = vpop.permute.xlu0 %1386  ;;  %v1381_v10 = vpop.permute.xlu1 %1380 }
 0x256   : > { %v1412_v15 = vsel %vm1396_vm6, %v1381_v10, %v1383_v61  ;;  %v1411_v17 = vsel %vm1396_vm6, %v1379_v62, %v1381_v10 }
 0x257   : > { %1463 = vmatprep.subr.bf16.mxu1 %v1412_v15 }
 0x258   : > { %1464 = vmatpush1.bf16.msra.mxu1 %v1411_v17 }
 0x259   : > { %v1385_v21 = vpop.permute.xlu0 %1384  ;;  %v1389_v22 = vpop.permute.xlu1 %1388 }
 0x25a   : > { %v1414_v28 = vsel %vm1396_vm6, %v1387_v9, %v1389_v22  ;;  %v1413_v29 = vsel %vm1396_vm6, %v1385_v21, %v1387_v9 }
 0x25b   : > { %1465 = vmatprep.subr.bf16.mxu1 %v1414_v28 }
 0x25c   : > { %1466 = vmatpush1.bf16.msra.mxu1 %v1413_v29 }
 0x25d   : > { %v1395_v34 = vpop.permute.xlu0 %1394  ;;  %v1393_v35 = vpop.permute.xlu1 %1392 }
 0x25e   : > { %v1416_v37 = vsel %vm1396_vm6, %v1393_v35, %v1395_v34 }
 0x25f   : > { %1467 = vmatprep.subr.bf16.mxu1 %v1416_v37 }
 0x261   : > { %v1391_v38 = vpop.permute.xlu1 %1390 }
 0x262   : > { %v1415_v40 = vsel %vm1396_vm6, %v1391_v38, %v1393_v35 }
 0x263   : > { %1468 = vmatpush1.bf16.msra.mxu1 %v1415_v40 }
 0x264   : > { %3049 = vmatprep.subr.bf16.mxu1 %v5256_v45 }
 0x266   : > { %1482 = vmatmul.mubr.bf16.vlgmr.msra.gmra.mrb[0].mxu1 %v5204_v41 }
 0x267   : > { %4417 = vmatprep.mubr.msk.bf16.mxu1 %vm862_vm0, %v5207_v44  ;;  %3050 = vmatpush1.bf16.msra.mxu1 %v5257_v47 }
 0x268   : > { %3051 = vmatprep.subr.bf16.mxu1 %v5258_v48 }
 0x26b   : > { %3052 = vmatpush1.bf16.msra.mxu1 %v5259_v53 }
 0x26e   : > { %1492 = vmatmul.mubr.bf16.gmra.mrb[4].mxu1 %v5209_v49  ;;  %v1233_v61 = vpop.permute.xlu0 %1232 }
 0x26f   : > { %4418 = vmatprep.mubr.msk.bf16.mxu1 %vm862_vm0, %v5210_v50 }
 0x272   : > { %v1238_v62 = vpop.permute.xlu1 %1237  ;;  %v1557_v1 = vpop.permute.xlu0 %1556 }
 0x273   : > { %v1733_v41 = vadd.f32 %v5787_v59, %v1557_v1  ;;  %v1735_v44 = vadd.f32 %v5794_v4, %v1557_v1 }
 0x276   : > { %1502 = vmatmul.mubr.bf16.gmra.mrb[8].mxu1 %v5212_v54  ;;  %v1562_v9 = vpop.permute.xlu1 %1561  ;;  %v1597_v10 = vpop.permute.xlu0 %1596 }
 0x277   : > { %4419 = vmatprep.mubr.msk.bf16.mxu1 %vm862_vm0, %v5213_v57  ;;  %v1773_v45 = vadd.f32 %v5844_v31, %v1597_v10  ;;  %v1775_v48 = vadd.f32 %v5846_v32, %v1597_v10  ;;  %v1737_v49 = vadd.f32 %v5798_v5, %v1562_v9  ;;  %v1739_v50 = vadd.f32 %v5800_v6, %v1562_v9 }
 0x27a   : > { %v1602_v15 = vpop.permute.xlu1 %1601  ;;  %v1243_v17 = vpop.permute.xlu0 %1242 }
 0x27b   : > { %v1779_v58 = vadd.f32 %v5856_v36, %v1602_v15 }
 0x27e   : > { %1512 = vmatmul.mubr.bf16.gmra.mrb[12].mxu1 %v5215_v60  ;;  %v6010_v21 = vpop.permute.xlu1 %1247  ;;  %v1567_v22 = vpop.permute.xlu0 %1566  ;;  %v1777_v60 = vadd.f32 %v5848_v33, %v1602_v15 }
 0x27f   : > { %3081 = vmatprep.mubr.bf16.mxu1 %v7354_v8  ;;  %v1743_v59 = vadd.f32 %v5802_v11, %v1567_v22  ;;  %v1745_v31 = vadd.f32 %v5804_v13, %v1567_v22 }
 0x282   : > { %v1572_v28 = vpop.permute.xlu1 %1571  ;;  %v1607_v29 = vpop.permute.xlu0 %1606 }
 0x283   : > { %v1783_v1 = vadd.f32 %v5864_v39, %v1607_v29  ;;  %v1785_v6 = vadd.f32 %v5872_v42, %v1607_v29  ;;  %v1747_v9 = vadd.f32 %v5808_v14, %v1572_v28  ;;  %v1749_v36 = vadd.f32 %v5813_v16, %v1572_v28 }
 0x286   : > { %v1612_v34 = vpop.permute.xlu1 %1611  ;;  %v6012_v35 = vpop.permute.xlu0 %1252 }
 0x287   : > { %v1787_v11 = vadd.f32 %v5874_v43, %v1612_v34  ;;  %v1789_v13 = vadd.f32 %v5882_v46, %v1612_v34 }
 0x28a   : > { %v6014_v37 = vpop.permute.xlu1 %1257  ;;  %v1577_v38 = vpop.permute.xlu0 %1576 }
 0x28b   : > { %v1753_v39 = vadd.f32 %v5815_v18, %v1577_v38 }
 0x28e   : > { %v6016_v40 = vpop.permute.xlu1 %1581  ;;  %v1617_v53 = vpop.permute.xlu0 %1616 }
 0x28f   : > { %v6039_v42 = vadd.f32 %v5896_v51, %v1617_v53  ;;  %v6048_v16 = vadd.f32 %v5898_v52, %v1617_v53  ;;  %v6052_v18 = vadd.f32 %v5820_v20, %v6016_v40 }
 0x292   : > { %v1622_v32 = vpop.permute.xlu1 %1621 }
 0x296   : > { %v6058_v51 = vpop.permute.xlu1 %1267 }
 0x339   : > { %v1483_v47 = vpop.f32.mrb[0].mxu1 }
 0x33a   : > { %v1484_v54 = vadd.f32 %v1483_v47, %v1233_v61  ;;  %v1485_v57 = vpop.f32.mrb[1].mxu1 }
 0x33b   : > { %v1486_v25 = vadd.f32 %v1485_v57, %v1233_v61  ;;  %v1487_v4 = vpop.f32.mrb[2].mxu1 }
 0x33c   : > { %v1811_v10 = vmul.f32 %v1733_v41, %v1484_v54  ;;  %v1488_v5 = vadd.f32 %v1487_v4, %v1238_v62  ;;  %v1489_v8 = vpop.f32.mrb[3].mxu1  ;;  %v6036_v54 = vadd.f32 %v5817_v19, %v1577_v38  ;;  %v1759_v4 = vadd.f32 %v5828_v23, %v6016_v40 }
 0x33d   : > { %v1812_v47 = vmul.f32 %v1735_v44, %v1486_v25  ;;  %v1490_v33 = vadd.f32 %v1489_v8, %v1238_v62  ;;  %v6041_v25 = vpop.permute.xlu0 %1262 }
 0x33e   : > { %v1827_v61 = vadd.f32 %v1811_v10, %v1773_v45  ;;  %v1813_v15 = vmul.f32 %v1737_v49, %v1488_v5 }
 0x33f   : > { %v1828_v22 = vadd.f32 %v1812_v47, %v1775_v48  ;;  %v1814_v41 = vmul.f32 %v1739_v50, %v1490_v33 }
 0x340   : > { %v6045_v8 = vsel %vm5673_vm1, 0.0, %v1827_v61  ;;  %v1829_v14 = vadd.f32 %v1813_v15, %v1777_v60 }
 0x341   : > { %v6056_v19 = vsel %vm5677_vm2, 0.0, %v1828_v22  ;;  %v1830_v43 = vadd.f32 %v1814_v41, %v1779_v58  ;;  %v1493_v46 = vpop.f32.mrb[4].mxu1  ;;  %v1587_v53 = vpop.permute.xlu0 %1586 }
 0x342   : > { %v6062_v62 = vsel %vm5673_vm1, 0.0, %v1829_v14  ;;  %v1494_v28 = vadd.f32 %v1493_v46, %v1243_v17  ;;  %v1495_v29 = vpop.f32.mrb[5].mxu1  ;;  %v4823_v52 = vpack.i.bf16 %v6056_v19, %v6045_v8  ;;  %v1763_v23 = vadd.f32 %v5830_v24, %v1587_v53 }
 0x343   : > { %v6068_v20 = vsel %vm5677_vm2, 0.0, %v1830_v43  ;;  %v1496_v34 = vadd.f32 %v1495_v29, %v1243_v17  ;;  %v1497_v38 = vpop.f32.mrb[6].mxu1  ;;  %v1765_v40 = vadd.f32 %v5832_v26, %v1587_v53  ;;  %v7383_v26 = vmov 0  }
 0x344   : > { %v1815_v44 = vmul.f32 %v1743_v59, %v1494_v28  ;;  %v1498_v58 = vadd.f32 %v1497_v38, %v6010_v21  ;;  %v1499_v45 = vpop.f32.mrb[7].mxu1  ;;  %4824 = vrot.lane.b32.xlu1 %v4823_v52, %s5366_s30  ;;  %4809 = vrot.lane.b32.xlu0 %v4823_v52, %s5359_s15  ;;  %v4828_v48 = vpack.i.bf16 %v6068_v20, %v6062_v62  ;;  %v5216_v59 = vld [vmem:[%s7333_s12] sm:$0xff]  }
 0x345   : > { %v1816_v49 = vmul.f32 %v1745_v31, %v1496_v34  ;;  %v1500_v50 = vadd.f32 %v1499_v45, %v6010_v21  ;;  %v2271_v17 = vpack.c.bf16 %v6068_v20, %v6056_v19  ;;  %v2270_v31 = vpack.c.bf16 %v6062_v62, %v6045_v8  ;;  %4460 = vmatmul.mubr.msk.bf16.vlgmr.msra.gmra.mrb[16].mxu1 %vm862_vm0, %v5216_v59  ;;  %v1627_v41 = vpop.permute.xlu0 %1626 }
 0x346   : > { %v1831_v57 = vadd.f32 %v1815_v44, %v1783_v1  ;;  %v1817_v60 = vmul.f32 %v1747_v9, %v1498_v58  ;;  %v1797_v21 = vadd.f32 %v5906_v55, %v1622_v32  ;;  %v1799_v1 = vadd.f32 %v5908_v56, %v1622_v32  ;;  %v1592_v9 = vpop.permute.xlu1 %1591  ;;  %3091 = vmatprep.mubr.bf16.mxu1 %v7383_v26 }
 0x347   : > { %v1832_v10 = vadd.f32 %v1816_v49, %v1785_v6  ;;  %v1818_v5 = vmul.f32 %v1749_v36, %v1500_v50  ;;  %v1803_v58 = vadd.f32 %v5922_v63, %v1627_v41  ;;  %v1769_v50 = vadd.f32 %v5842_v30, %v1592_v9 }
 0x348   : > { %v6089_v47 = vsel %vm5673_vm1, 0.0, %v1831_v57  ;;  %v1833_v33 = vadd.f32 %v1817_v60, %v1787_v11  ;;  %4814 = vrot.lane.b32.xlu0 %v4823_v52, %s5361_s2  ;;  %4829 = vrot.lane.b32.xlu1 %v4828_v48, %s5359_s15 }
 0x349   : > { %v6097_v6 = vsel %vm5677_vm2, 0.0, %v1832_v10  ;;  %v1834_v55 = vadd.f32 %v1818_v5, %v1789_v13  ;;  %v1503_v56 = vpop.f32.mrb[8].mxu1 }
 0x34a   : > { %v6102_v32 = vsel %vm5673_vm1, 0.0, %v1833_v33  ;;  %v1504_v36 = vadd.f32 %v1503_v56, %v6012_v35  ;;  %v1505_v11 = vpop.f32.mrb[9].mxu1  ;;  %v6107_v24 = vpack.i.bf16 %v6097_v6, %v6089_v47  ;;  %v1632_v34 = vpop.permute.xlu1 %1631 }
 0x34b   : > { %v6112_v61 = vsel %vm5677_vm2, 0.0, %v1834_v55  ;;  %v1506_v15 = vadd.f32 %v1505_v11, %v6012_v35  ;;  %v1507_v13 = vpop.f32.mrb[10].mxu1  ;;  %v2273_v22 = vpack.c.bf16 %v6102_v32, %v6089_v47  ;;  %v1807_v63 = vadd.f32 %v5929_v2, %v1632_v34  ;;  %v5218_v55 = vld [vmem:[%s7333_s12 + $0x10] sm:$0xff]   ;;  %v5221_v47 = vld [vmem:[%s7333_s12 + $0x28] sm:$0xff]  }
 0x34c   : > { %v1819_v14 = vmul.f32 %v1753_v39, %v1504_v36  ;;  %v1508_v43 = vadd.f32 %v1507_v13, %v6014_v37  ;;  %v1509_v46 = vpop.f32.mrb[11].mxu1  ;;  %4819 = vrot.lane.b32.xlu0 %v4823_v52, %s5364_s13  ;;  %4834 = vrot.lane.b32.xlu1 %v4828_v48, %s5361_s2  ;;  %v6122_v28 = vpack.i.bf16 %v6112_v61, %v6102_v32  ;;  %v5217_v52 = vld [vmem:[%s7333_s12 + $0x8] sm:$0xff]   ;;  %v5220_v13 = vld [vmem:[%s7333_s12 + $0x20] sm:$0xff]  }
 0x34d   : > { %v1820_v29 = vmul.f32 %v6036_v54, %v1506_v15  ;;  %v1510_v35 = vadd.f32 %v1509_v46, %v6014_v37  ;;  %v2274_v44 = vpack.c.bf16 %v6112_v61, %v6097_v6  ;;  %v1805_v54 = vadd.f32 %v5924_v0, %v1627_v41  ;;  %4461 = vmatmul.mubr.msk.bf16.gmra.mrb[20].mxu1 %vm862_vm0, %v5217_v52  ;;  %v5219_v15 = vld [vmem:[%s7333_s12 + $0x18] sm:$0xff]   ;;  %v5222_v32 = vld [vmem:[%s7333_s12 + $0x30] sm:$0xff]  }
 0x34e   : > { %v1835_v38 = vadd.f32 %v1819_v14, %v6039_v42  ;;  %v1821_v39 = vmul.f32 %v6052_v18, %v1508_v43  ;;  %v1767_v37 = vadd.f32 %v5834_v27, %v1592_v9  ;;  %3101 = vmatprep.mubr.bf16.mxu1 %v7383_v26  ;;  %v1809_v56 = vadd.f32 %v5931_v3, %v1632_v34  ;;  %v6241_v41 = vpop.permute.xlu1 %4754 }
 0x34f   : > { %v1836_v45 = vadd.f32 %v1820_v29, %v6048_v16  ;;  %v1822_v49 = vmul.f32 %v1759_v4, %v1510_v35 }
 0x350   : > { %v6139_v42 = vsel %vm5673_vm1, 0.0, %v1835_v38  ;;  %v1837_v18 = vadd.f32 %v1821_v39, %v1797_v21  ;;  %4844 = vrot.lane.b32.xlu0 %v4828_v48, %s5366_s30  ;;  %4839 = vrot.lane.b32.xlu1 %v4828_v48, %s5364_s13 }
 0x351   : > { %v1852_v16 = vsel %vm5677_vm2, 0.0, %v1836_v45  ;;  %v1838_v53 = vadd.f32 %v1822_v49, %v1799_v1  ;;  %v1513_v0 = vpop.f32.mrb[12].mxu1 }
 0x352   : > { %v1853_v27 = vsel %vm5673_vm1, 0.0, %v1837_v18  ;;  %v1514_v57 = vadd.f32 %v1513_v0, %v6041_v25  ;;  %v1515_v60 = vpop.f32.mrb[13].mxu1  ;;  %v6152_v59 = vpack.i.bf16 %v1852_v16, %v6139_v42  ;;  %v6254_v43 = vpop.permute.xlu1 %4764 }
 0x353   : > { %v1854_v30 = vsel %vm5677_vm2, 0.0, %v1838_v53  ;;  %v1516_v2 = vadd.f32 %v1515_v60, %v6041_v25  ;;  %v1517_v48 = vpop.f32.mrb[14].mxu1  ;;  %v2276_v4 = vpack.c.bf16 %v1853_v27, %v6139_v42 }
 0x354   : > { %v1823_v10 = vmul.f32 %v1763_v23, %v1514_v57  ;;  %v1518_v5 = vadd.f32 %v1517_v48, %v6058_v51  ;;  %v1519_v21 = vpop.f32.mrb[15].mxu1  ;;  %2517 = vrot.lane.b32.xlu1 %v2271_v17, %s7357_s17  ;;  %2515 = vrot.lane.b32.xlu0 %v2270_v31, %s7357_s17  ;;  %v4893_v1 = vpack.i.bf16 %v1854_v30, %v1853_v27 }
 0x355   : > { %v1824_v9 = vmul.f32 %v1765_v40, %v1516_v2  ;;  %v1520_v25 = vadd.f32 %v1519_v21, %v6058_v51  ;;  %v2277_v23 = vpack.c.bf16 %v1854_v30, %v1852_v16  ;;  %4462 = vmatmul.mubr.msk.bf16.gmra.mrb[24].mxu1 %vm862_vm0, %v5218_v55 }
 0x356   : > { %v1839_v33 = vadd.f32 %v1823_v10, %v1803_v58  ;;  %v1825_v6 = vmul.f32 %v1767_v37, %v1518_v5  ;;  %3111 = vmatprep.mubr.bf16.mxu1 %v7383_v26 }
 0x357   : > { %v1840_v19 = vadd.f32 %v1824_v9, %v1805_v54  ;;  %v1826_v20 = vmul.f32 %v1769_v50, %v1520_v25 }
 0x358   : > { %v1855_v17 = vsel %vm5673_vm1, 0.0, %v1839_v33  ;;  %v1841_v8 = vadd.f32 %v1825_v6, %v1807_v63  ;;  %4849 = vrot.lane.b32.xlu1 %v6107_v24, %s5359_s15  ;;  %4864 = vrot.lane.b32.xlu0 %v6122_v28, %s5359_s15 }
 0x359   : > { %v1856_v51 = vsel %vm5677_vm2, 0.0, %v1840_v19  ;;  %v1842_v62 = vadd.f32 %v1826_v20, %v1809_v56 }
 0x35a   : > { %v1857_v3 = vsel %vm5673_vm1, 0.0, %v1841_v8  ;;  %v4908_v31 = vpack.i.bf16 %v1856_v51, %v1855_v17 }
 0x35b   : > { %v1858_v40 = vsel %vm5677_vm2, 0.0, %v1842_v62  ;;  %v2279_v36 = vpack.c.bf16 %v1857_v3, %v1855_v17 }
 0x35c   : > { %4854 = vrot.lane.b32.xlu1 %v6107_v24, %s5361_s2  ;;  %4869 = vrot.lane.b32.xlu0 %v6122_v28, %s5361_s2  ;;  %v4923_v11 = vpack.i.bf16 %v1858_v40, %v1857_v3  ;;  %v2280_v61 = vpack.c.bf16 %v1858_v40, %v1856_v51 }
 0x35d   : > { %4463 = vmatmul.mubr.msk.bf16.gmra.mrb[28].mxu1 %vm862_vm0, %v5219_v15 }
 0x35e   : > { %3121 = vmatprep.mubr.bf16.mxu1 %v7383_v26 }
 0x360   : > { %4859 = vrot.lane.b32.xlu1 %v6107_v24, %s5364_s13  ;;  %4874 = vrot.lane.b32.xlu0 %v6122_v28, %s5364_s13 }
 0x364   : > { %2523 = vrot.lane.b32.xlu0 %v2274_v44, %s7357_s17  ;;  %2521 = vrot.lane.b32.xlu1 %v2273_v22, %s7357_s17  ;;  %v4750_v22 = vpop.permute.xlu0 %4749 }
 0x365   : > { %4464 = vmatmul.mubr.msk.bf16.gmra.mrb[32].mxu1 %vm862_vm0, %v5220_v13  ;;  %v4752_v18 = vunpack.i.h.bf16 %v4750_v22  ;;  %v4751_v16 = vunpack.i.l.bf16 %v4750_v22 }
 0x366   : > { %3131 = vmatprep.mubr.bf16.mxu1 %v7383_v26 }
 0x368   : > { %4879 = vrot.lane.b32.xlu0 %v6152_v59, %s5359_s15  ;;  %4894 = vrot.lane.b32.xlu1 %v4893_v1, %s5359_s15  ;;  %v6252_v14 = vpop.permute.xlu0 %4759 }
 0x36c   : > { %4884 = vrot.lane.b32.xlu0 %v6152_v59, %s5361_s2  ;;  %4899 = vrot.lane.b32.xlu1 %v4893_v1, %s5361_s2  ;;  %v4770_v46 = vpop.permute.xlu0 %4769 }
 0x36d   : > { %4465 = vmatmul.mubr.msk.bf16.gmra.mrb[36].mxu1 %vm862_vm0, %v5221_v47  ;;  %v4772_v2 = vunpack.i.h.bf16 %v4770_v46  ;;  %v4771_v5 = vunpack.i.l.bf16 %v4770_v46 }
 0x36e   : > { %3141 = vmatprep.mubr.bf16.mxu1 %v7383_v26 }
 0x370   : > { %4889 = vrot.lane.b32.xlu0 %v6152_v59, %s5364_s13  ;;  %4904 = vrot.lane.b32.xlu1 %v4893_v1, %s5364_s13  ;;  %v6260_v29 = vpop.permute.xlu0 %4779 }
 0x374   : > { %2529 = vrot.lane.b32.xlu1 %v2277_v23, %s7357_s17  ;;  %2527 = vrot.lane.b32.xlu0 %v2276_v4, %s7357_s17  ;;  %v6264_v34 = vpop.permute.xlu0 %4789 }
 0x375   : > { %4466 = vmatmul.mubr.msk.bf16.gmra.mrb[40].mxu1 %vm862_vm0, %v5222_v32 }
 0x376   : > { %3151 = vmatprep.mubr.bf16.mxu1 %v7383_v26 }
 0x378   : > { %4909 = vrot.lane.b32.xlu1 %v4908_v31, %s5359_s15  ;;  %4924 = vrot.lane.b32.xlu0 %v4923_v11, %s5359_s15  ;;  %v6268_v39 = vpop.permute.xlu0 %4799  ;;  %s7248_s15 = scalar_lea.vmem [#allocation5], %s4388_s26  ;;  %s4216_s26 = scalar_lea.sflag [#allocation6], %s5552_s19 }
 0x379   : > { %s4230_s14 = sshll.u32 %s7248_s15, 4  ;;  %s7259_s14 = int_to_ptr.vmem [resolvable:$true] %s4230_s14 }
 0x37c   : > { %4914 = vrot.lane.b32.xlu1 %v4908_v31, %s5361_s2  ;;  %4929 = vrot.lane.b32.xlu0 %v6107_v24, %s5366_s30  ;;  %v5223_v24 = vld [vmem:[%s7333_s12 + $0x38] sm:$0xff]   ;;  %v2514_v52 = vpop.permute.xlu0 %2513 }
 0x37d   : > { %4467 = vmatmul.mubr.msk.bf16.gmra.mrb[44].mxu1 %vm862_vm0, %v5223_v24 }
 0x380   : > { %4919 = vrot.lane.b32.xlu1 %v4908_v31, %s5364_s13  ;;  %4944 = vrot.lane.b32.xlu0 %v4893_v1, %s5366_s30  ;;  %v6274_v45 = vpop.permute.xlu0 %2525 }
 0x384   : > { %4934 = vrot.lane.b32.xlu1 %v6122_v28, %s5366_s30  ;;  %4949 = vrot.lane.b32.xlu0 %v4908_v31, %s5366_s30  ;;  %v6258_v28 = vpop.permute.xlu1 %4774 }
 0x388   : > { %4939 = vrot.lane.b32.xlu1 %v6152_v59, %s5366_s30  ;;  %4954 = vrot.lane.b32.xlu0 %v4923_v11, %s5361_s2  ;;  %v6262_v35 = vpop.permute.xlu1 %4784 }
 0x38c   : > { %4964 = vrot.lane.b32.xlu1 %v4923_v11, %s5366_s30  ;;  %4959 = vrot.lane.b32.xlu0 %v4923_v11, %s5364_s13  ;;  %v6266_v38 = vpop.permute.xlu1 %4794  ;;  %v4756_v11 = vunpack.i.l.bf16 %v6241_v41  ;;  %s5367_s13 = smov 116  }
 0x390   : > { %2535 = vrot.lane.b32.xlu0 %v2280_v61, %s7357_s17  ;;  %2533 = vrot.lane.b32.xlu1 %v2279_v36, %s7357_s17  ;;  %v6270_v44 = vpop.permute.xlu1 %4804  ;;  %v4757_v36 = vunpack.i.h.bf16 %v6241_v41 }
 0x394   : > { %v6272_v58 = vpop.permute.xlu1 %2519 }
 0x398   : > { %v6276_v49 = vpop.permute.xlu1 %2531 }
 0x3b6   : > { %v4810_v54 = vpop.permute.xlu0 %4809  ;;  %v6278_v37 = vpop.permute.xlu1 %4824 }
 0x3b7   : > { %v4811_v42 = vunpack.i.l.bf16 %v4810_v54  ;;  %v4812_v53 = vunpack.i.h.bf16 %v4810_v54 }
 0x3b9   : > { %v1971_v57 = vsel %vm1077_vm4, %v4751_v16, %v4811_v42  ;;  %v1972_v20 = vsel %vm1077_vm4, %v4811_v42, %v4812_v53  ;;  %v4777_v42 = vunpack.i.h.bf16 %v6258_v28 }
 0x3ba   : > { %v4815_v50 = vpop.permute.xlu0 %4814  ;;  %v4830_v63 = vpop.permute.xlu1 %4829 }
 0x3bb   : > { %v4832_v0 = vunpack.i.h.bf16 %v4830_v63  ;;  %v4831_v27 = vunpack.i.l.bf16 %v4830_v63  ;;  %v4816_v60 = vunpack.i.l.bf16 %v4815_v50  ;;  %v4817_v21 = vunpack.i.h.bf16 %v4815_v50 }
 0x3bd   : > { %v2283_v59 = vpack.c.bf16 %v4832_v0, %v4812_v53  ;;  %v1973_v30 = vsel %vm1077_vm4, %v4752_v18, %v4831_v27  ;;  %v2059_v25 = vsel %vm1167_vm7, %v4771_v5, %v4816_v60  ;;  %v1974_v19 = vsel %vm1077_vm4, %v4831_v27, %v4832_v0 }
 0x3be   : > { %v6282_v48 = vpop.permute.xlu0 %4819  ;;  %v4835_v4 = vpop.permute.xlu1 %4834  ;;  %v2281_v10 = vpack.c.bf16 %v1973_v30, %v1971_v57  ;;  %v2282_v51 = vpack.c.bf16 %v1974_v19, %v1972_v20  ;;  %v2060_v40 = vsel %vm1167_vm7, %v4816_v60, %v4817_v21  ;;  %v4776_v18 = vunpack.i.l.bf16 %v6258_v28 }
 0x3bf   : > { %v4837_v1 = vunpack.i.h.bf16 %v4835_v4  ;;  %v4836_v9 = vunpack.i.l.bf16 %v4835_v4  ;;  %2541 = vrot.lane.b32.xlu1 %v2283_v59, %s7357_s17  ;;  %v4761_v19 = vunpack.i.l.bf16 %v6252_v14 }
 0x3c0   : > { %2537 = vrot.lane.b32.xlu0 %v2281_v10, %s7357_s17 }
 0x3c1   : > { %v2295_v33 = vpack.c.bf16 %v4837_v1, %v4817_v21  ;;  %v2061_v6 = vsel %vm1167_vm7, %v4772_v2, %v4836_v9  ;;  %v2062_v62 = vsel %vm1167_vm7, %v4836_v9, %v4837_v1 }
 0x3c2   : > { %v6288_v23 = vpop.permute.xlu0 %4844  ;;  %v6290_v55 = vpop.permute.xlu1 %4839  ;;  %v2293_v56 = vpack.c.bf16 %v2061_v6, %v2059_v25  ;;  %v2294_v13 = vpack.c.bf16 %v2062_v62, %v2060_v40 }
 0x3c3   : > { %2565 = vrot.lane.b32.xlu1 %v2295_v33, %s7357_s17 }
 0x3c4   : > { %2561 = vrot.lane.b32.xlu0 %v2293_v56, %s7357_s17  ;;  %v4762_v56 = vunpack.i.h.bf16 %v6252_v14 }
 0x3c6   : > { %v2516_v17 = vpop.permute.xlu0 %2515  ;;  %v2518_v8 = vpop.permute.xlu1 %2517 }
 0x3c7   : > { %v2635_v3 = vsel %vm2633_vm8, %v2516_v17, %v2518_v8  ;;  %v2634_v31 = vsel %vm2633_vm8, %v2514_v52, %v2516_v17 }
 0x3c8   : > { %2727 = vmatprep.subr.bf16.mxu0 %v2635_v3  ;;  %2539 = vrot.lane.b32.xlu0 %v2282_v51, %s7357_s17 }
 0x3c9   : > { %2728 = vmatpush1.bf16.msra.mxu0 %v2634_v31 }
 0x3ca   : > { %v4865_v61 = vpop.permute.xlu0 %4864  ;;  %v4850_v15 = vpop.permute.xlu1 %4849 }
 0x3cb   : > { %v4867_v47 = vunpack.i.h.bf16 %v4865_v61  ;;  %v4866_v32 = vunpack.i.l.bf16 %v4865_v61  ;;  %v4852_v22 = vunpack.i.h.bf16 %v4850_v15  ;;  %v4851_v24 = vunpack.i.l.bf16 %v4850_v15 }
 0x3cc   : > { %2563 = vrot.lane.b32.xlu0 %v2294_v13, %s7357_s17 }
 0x3cd   : > { %v1977_v46 = vsel %vm1077_vm4, %v4757_v36, %v4866_v32  ;;  %v2286_v52 = vpack.c.bf16 %v4867_v47, %v4852_v22  ;;  %v1975_v54 = vsel %vm1077_vm4, %v4756_v11, %v4851_v24  ;;  %v1978_v4 = vsel %vm1077_vm4, %v4866_v32, %v4867_v47 }
 0x3ce   : > { %v4870_v50 = vpop.permute.xlu0 %4869  ;;  %v4855_v41 = vpop.permute.xlu1 %4854  ;;  %v2284_v63 = vpack.c.bf16 %v1977_v46, %v1975_v54  ;;  %v1976_v10 = vsel %vm1077_vm4, %v4851_v24, %v4852_v22 }
 0x3cf   : > { %v4872_v16 = vunpack.i.h.bf16 %v4870_v50  ;;  %v4871_v53 = vunpack.i.l.bf16 %v4870_v50  ;;  %v4857_v0 = vunpack.i.h.bf16 %v4855_v41  ;;  %v4856_v27 = vunpack.i.l.bf16 %v4855_v41 }
 0x3d0   : > { %2547 = vrot.lane.b32.xlu0 %v2286_v52, %s7357_s17  ;;  %2543 = vrot.lane.b32.xlu1 %v2284_v63, %s7357_s17  ;;  %v2285_v1 = vpack.c.bf16 %v1978_v4, %v1976_v10 }
 0x3d1   : > { %v2065_v57 = vsel %vm1167_vm7, %v4777_v42, %v4871_v53  ;;  %v2298_v60 = vpack.c.bf16 %v4872_v16, %v4857_v0  ;;  %v2063_v59 = vsel %vm1167_vm7, %v4776_v18, %v4856_v27  ;;  %v2066_v9 = vsel %vm1167_vm7, %v4871_v53, %v4872_v16 }
 0x3d2   : > { %v6312_v30 = vpop.permute.xlu0 %4874  ;;  %v6314_v2 = vpop.permute.xlu1 %4859  ;;  %v2296_v28 = vpack.c.bf16 %v2065_v57, %v2063_v59  ;;  %v2064_v25 = vsel %vm1167_vm7, %v4856_v27, %v4857_v0  ;;  %v4767_v0 = vunpack.i.h.bf16 %v6254_v43  ;;  %v4766_v27 = vunpack.i.l.bf16 %v6254_v43 }
 0x3d3   : > { %v2297_v8 = vpack.c.bf16 %v2066_v9, %v2064_v25 }
 0x3d4   : > { %2571 = vrot.lane.b32.xlu0 %v2298_v60, %s7357_s17  ;;  %2567 = vrot.lane.b32.xlu1 %v2296_v28, %s7357_s17 }
 0x3d6   : > { %v2524_v5 = vpop.permute.xlu0 %2523  ;;  %v2522_v21 = vpop.permute.xlu1 %2521 }
 0x3d7   : > { %v2637_v33 = vsel %vm2633_vm8, %v2522_v21, %v2524_v5  ;;  %v2636_v6 = vsel %vm2633_vm8, %v6272_v58, %v2522_v21  ;;  %v4782_v5 = vunpack.i.h.bf16 %v6260_v29  ;;  %v4781_v21 = vunpack.i.l.bf16 %v6260_v29 }
 0x3d8   : > { %2729 = vmatprep.subr.bf16.mxu0 %v2637_v33  ;;  %2545 = vrot.lane.b32.xlu1 %v2285_v1, %s7357_s17 }
 0x3d9   : > { %2730 = vmatpush1.bf16.msra.mxu0 %v2636_v6 }
 0x3da   : > { %v4880_v20 = vpop.permute.xlu0 %4879  ;;  %v4895_v17 = vpop.permute.xlu1 %4894 }
 0x3db   : > { %v4882_v51 = vunpack.i.h.bf16 %v4880_v20  ;;  %v4881_v62 = vunpack.i.l.bf16 %v4880_v20  ;;  %v4897_v3 = vunpack.i.h.bf16 %v4895_v17  ;;  %v4896_v31 = vunpack.i.l.bf16 %v4895_v17 }
 0x3dc   : > { %2569 = vrot.lane.b32.xlu1 %v2297_v8, %s7357_s17 }
 0x3dd   : > { %v1979_v40 = vsel %vm1077_vm4, %v4761_v19, %v4881_v62  ;;  %v2289_v58 = vpack.c.bf16 %v4897_v3, %v4882_v51  ;;  %v1981_v36 = vsel %vm1077_vm4, %v4762_v56, %v4896_v31  ;;  %v1980_v11 = vsel %vm1077_vm4, %v4881_v62, %v4882_v51 }
 0x3de   : > { %v1982_v61 = vsel %vm1077_vm4, %v4896_v31, %v4897_v3  ;;  %v4885_v15 = vpop.permute.xlu0 %4884  ;;  %v4900_v14 = vpop.permute.xlu1 %4899  ;;  %v2287_v13 = vpack.c.bf16 %v1981_v36, %v1979_v40  ;;  %v4842_v36 = vunpack.i.h.bf16 %v6290_v55 }
 0x3df   : > { %v4887_v47 = vunpack.i.h.bf16 %v4885_v15  ;;  %v4886_v32 = vunpack.i.l.bf16 %v4885_v15  ;;  %v4902_v22 = vunpack.i.h.bf16 %v4900_v14  ;;  %v4901_v24 = vunpack.i.l.bf16 %v4900_v14 }
 0x3e0   : > { %2549 = vrot.lane.b32.xlu0 %v2287_v13, %s7357_s17  ;;  %2553 = vrot.lane.b32.xlu1 %v2289_v58, %s7357_s17  ;;  %v2288_v54 = vpack.c.bf16 %v1982_v61, %v1980_v11  ;;  %v4787_v58 = vunpack.i.h.bf16 %v6262_v35  ;;  %v4841_v11 = vunpack.i.l.bf16 %v6290_v55  ;;  %v4786_v14 = vunpack.i.l.bf16 %v6262_v35 }
 0x3e1   : > { %v2068_v42 = vsel %vm1167_vm7, %v4886_v32, %v4887_v47  ;;  %v2070_v18 = vsel %vm1167_vm7, %v4901_v24, %v4902_v22  ;;  %v2067_v25 = vsel %vm1167_vm7, %v4781_v21, %v4886_v32  ;;  %v2069_v33 = vsel %vm1167_vm7, %v4782_v5, %v4901_v24 }
 0x3e2   : > { %v6335_v46 = vpop.permute.xlu0 %4889  ;;  %v6337_v52 = vpop.permute.xlu1 %4904  ;;  %v2300_v63 = vpack.c.bf16 %v2070_v18, %v2068_v42  ;;  %v2299_v29 = vpack.c.bf16 %v2069_v33, %v2067_v25  ;;  %v2301_v62 = vpack.c.bf16 %v4902_v22, %v4887_v47  ;;  %v4822_v22 = vunpack.i.h.bf16 %v6282_v48 }
 0x3e3   : > { %v4821_v24 = vunpack.i.l.bf16 %v6282_v48  ;;  %v2151_v55 = vsel %vm2147_vm9, %v4841_v11, %v4842_v36  ;;  %v4791_v48 = vunpack.i.l.bf16 %v6264_v34  ;;  %v4907_v25 = vunpack.i.h.bf16 %v6337_v52 }
 0x3e4   : > { %2551 = vrot.lane.b32.xlu0 %v2288_v54, %s7357_s17  ;;  %v4906_v33 = vunpack.i.l.bf16 %v6337_v52 }
 0x3e6   : > { %v2528_v50 = vpop.permute.xlu0 %2527  ;;  %v2530_v41 = vpop.permute.xlu1 %2529 }
 0x3e7   : > { %v2639_v16 = vsel %vm2633_vm8, %v2528_v50, %v2530_v41  ;;  %v2638_v53 = vsel %vm2633_vm8, %v6274_v45, %v2528_v50 }
 0x3e8   : > { %2731 = vmatprep.subr.bf16.mxu0 %v2639_v16  ;;  %2575 = vrot.lane.b32.xlu0 %v2300_v63, %s7357_s17  ;;  %v4792_v63 = vunpack.i.h.bf16 %v6264_v34  ;;  %v2149_v16 = vsel %vm2147_vm9, %v4821_v24, %v4822_v22 }
 0x3e9   : > { %2732 = vmatpush1.bf16.msra.mxu0 %v2638_v53  ;;  %v2307_v53 = vpack.c.bf16 %v4842_v36, %v4822_v22  ;;  %v4801_v36 = vunpack.i.l.bf16 %v6268_v39 }
 0x3ea   : > { %v4925_v57 = vpop.permute.xlu0 %4924  ;;  %v4910_v60 = vpop.permute.xlu1 %4909 }
 0x3eb   : > { %v4927_v59 = vunpack.i.h.bf16 %v4925_v57  ;;  %v4926_v28 = vunpack.i.l.bf16 %v4925_v57  ;;  %v4912_v4 = vunpack.i.h.bf16 %v4910_v60  ;;  %v4911_v10 = vunpack.i.l.bf16 %v4910_v60 }
 0x3ec   : > { %v4877_v57 = vunpack.i.h.bf16 %v6312_v30  ;;  %v4876_v60 = vunpack.i.l.bf16 %v6312_v30  ;;  %v4892_v30 = vunpack.i.h.bf16 %v6335_v46 }
 0x3ed   : > { %v1985_v45 = vsel %vm1077_vm4, %v4767_v0, %v4926_v28  ;;  %v2292_v1 = vpack.c.bf16 %v4927_v59, %v4912_v4  ;;  %v1983_v9 = vsel %vm1077_vm4, %v4766_v27, %v4911_v10  ;;  %v1986_v19 = vsel %vm1077_vm4, %v4926_v28, %v4927_v59 }
 0x3ee   : > { %v6354_v43 = vpop.permute.xlu0 %4929  ;;  %v4915_v6 = vpop.permute.xlu1 %4914  ;;  %v2290_v56 = vpack.c.bf16 %v1985_v45, %v1983_v9  ;;  %v1984_v20 = vsel %vm1077_vm4, %v4911_v10, %v4912_v4  ;;  %v2306_v0 = vpack.c.bf16 %v2151_v55, %v2149_v16  ;;  %v2150_v27 = vsel %vm2147_vm9, %v4792_v63, %v4841_v11 }
 0x3ef   : > { %2559 = vrot.lane.b32.xlu0 %v2292_v1, %s7357_s17  ;;  %v2291_v51 = vpack.c.bf16 %v1986_v19, %v1984_v20  ;;  %v4916_v40 = vunpack.i.l.bf16 %v4915_v6  ;;  %v4917_v13 = vunpack.i.h.bf16 %v4915_v6  ;;  %v4862_v59 = vunpack.i.h.bf16 %v6314_v2 }
 0x3f0   : > { %2555 = vrot.lane.b32.xlu1 %v2290_v56, %s7357_s17  ;;  %v4861_v10 = vunpack.i.l.bf16 %v6314_v2  ;;  %v2148_v45 = vsel %vm2147_vm9, %v4791_v48, %v4821_v24  ;;  %v4891_v9 = vunpack.i.l.bf16 %v6335_v46  ;;  %v4797_v19 = vunpack.i.h.bf16 %v6266_v38 }
 0x3f1   : > { %v2071_v54 = vsel %vm1167_vm7, %v4786_v14, %v4916_v40  ;;  %v2072_v1 = vsel %vm1167_vm7, %v4916_v40, %v4917_v13  ;;  %v2305_v2 = vpack.c.bf16 %v2150_v27, %v2148_v45  ;;  %v4796_v20 = vunpack.i.l.bf16 %v6266_v38 }
 0x3f2   : > { %v6360_v17 = vpop.permute.xlu0 %4944  ;;  %v6362_v8 = vpop.permute.xlu1 %4919  ;;  %v2153_v56 = vsel %vm2147_vm9, %v4861_v10, %v4862_v59  ;;  %v2157_v46 = vsel %vm2147_vm9, %v4891_v9, %v4892_v30  ;;  %v2154_v52 = vsel %vm2147_vm9, %v4797_v19, %v4876_v60  ;;  %v2156_v38 = vsel %vm2147_vm9, %v4801_v36, %v4891_v9 }
 0x3f3   : > { %2573 = vrot.lane.b32.xlu0 %v2299_v29, %s7357_s17  ;;  %v2310_v29 = vpack.c.bf16 %v4877_v57, %v4862_v59  ;;  %v2152_v40 = vsel %vm2147_vm9, %v4796_v20, %v4861_v10  ;;  %v4847_v24 = vunpack.i.h.bf16 %v6288_v23  ;;  %v4931_v10 = vunpack.i.l.bf16 %v6354_v43 }
 0x3f4   : > { %2557 = vrot.lane.b32.xlu1 %v2291_v51, %s7357_s17  ;;  %v2159_v51 = vsel %vm2147_vm9, %v4906_v33, %v4907_v25  ;;  %v2308_v14 = vpack.c.bf16 %v2154_v52, %v2152_v40 }
 0x3f5   : > { %v2312_v11 = vpack.c.bf16 %v2159_v51, %v2157_v46 }
 0x3f6   : > { %v6366_v3 = vpop.permute.xlu0 %4949  ;;  %v6368_v31 = vpop.permute.xlu1 %4934 }
 0x3f7   : > { %v4937_v59 = vunpack.i.h.bf16 %v6368_v31  ;;  %v4951_v19 = vunpack.i.l.bf16 %v6366_v3 }
 0x3f8   : > { %2577 = vrot.lane.b32.xlu1 %v2301_v62, %s7357_s17 }
 0x3fa   : > { %v4955_v61 = vpop.permute.xlu0 %4954  ;;  %v6374_v15 = vpop.permute.xlu1 %4939 }
 0x3fb   : > { %v4957_v47 = vunpack.i.h.bf16 %v4955_v61  ;;  %v4956_v32 = vunpack.i.l.bf16 %v4955_v61 }
 0x3fd   : > { %v2073_v42 = vsel %vm1167_vm7, %v4787_v58, %v4956_v32  ;;  %v2304_v18 = vpack.c.bf16 %v4957_v47, %v4917_v13  ;;  %v2074_v5 = vsel %vm1167_vm7, %v4956_v32, %v4957_v47  ;;  %v4802_v58 = vunpack.i.h.bf16 %v6268_v39 }
 0x3fe   : > { %v6382_v50 = vpop.permute.xlu0 %4959  ;;  %v6384_v41 = vpop.permute.xlu1 %4964  ;;  %v2302_v35 = vpack.c.bf16 %v2073_v42, %v2071_v54  ;;  %v2303_v6 = vpack.c.bf16 %v2074_v5, %v2072_v1  ;;  %v4922_v32 = vunpack.i.h.bf16 %v6362_v8  ;;  %v4921_v39 = vunpack.i.l.bf16 %v6362_v8 }
 0x3ff   : > { %2583 = vrot.lane.b32.xlu0 %v2304_v18, %s7357_s17  ;;  %v2158_v61 = vsel %vm2147_vm9, %v4802_v58, %v4906_v33  ;;  %v4962_v13 = vunpack.i.h.bf16 %v6382_v50  ;;  %v4961_v47 = vunpack.i.l.bf16 %v6382_v50  ;;  %v4846_v54 = vunpack.i.l.bf16 %v6288_v23  ;;  %v5226_v18 = vld [vmem:[%s7331_s10 + $0x4] ss:$12 sps:$4 sm:$0xff]  }
 0x400   : > { %2579 = vrot.lane.b32.xlu1 %v2302_v35, %s7357_s17  ;;  %v2311_v22 = vpack.c.bf16 %v2158_v61, %v2156_v38  ;;  %v2313_v42 = vpack.c.bf16 %v4907_v25, %v4892_v30  ;;  %v4827_v50 = vunpack.i.h.bf16 %v6278_v37  ;;  %v4826_v35 = vunpack.i.l.bf16 %v6278_v37  ;;  %2759 = vmatprep.mubr.bf16.mxu0 %v5226_v18  ;;  %v2345_v38 = vld [vmem:[%s7332_s11] sm:$0xff] }
 0x401   : > { %v2163_v55 = vsel %vm2147_vm9, %v4961_v47, %v4962_v13  ;;  %v4807_v8 = vunpack.i.h.bf16 %v6270_v44  ;;  %v2161_v23 = vsel %vm2147_vm9, %v4921_v39, %v4922_v32  ;;  %v2316_v63 = vpack.c.bf16 %v4962_v13, %v4922_v32 }
 0x402   : > { %v2536_v28 = vpop.permute.xlu0 %2535  ;;  %v2534_v4 = vpop.permute.xlu1 %2533  ;;  %v2238_v16 = vsel %vm2236_vm10, %v4846_v54, %v4847_v24  ;;  %v2315_v48 = vpack.c.bf16 %v2163_v55, %v2161_v23  ;;  %v2237_v37 = vsel %vm2236_vm10, %v4826_v35, %v4827_v50  ;;  %v2319_v5 = vpack.c.bf16 %v4847_v24, %v4827_v50 }
 0x403   : > { %2587 = vrot.lane.b32.xlu0 %v2306_v0, %s7357_s17  ;;  %v2641_v34 = vsel %vm2633_vm8, %v2534_v4, %v2536_v28  ;;  %v2640_v21 = vsel %vm2633_vm8, %v6276_v49, %v2534_v4  ;;  %v2155_v49 = vsel %vm2147_vm9, %v4876_v60, %v4877_v57  ;;  %v2162_v0 = vsel %vm2147_vm9, %v4807_v8, %v4961_v47  ;;  %v2897_v8 = vld [vmem:[%s7384_s18 + $0x40] sm:$0xff] }
 0x404   : > { %2733 = vmatprep.subr.bf16.mxu0 %v2641_v34  ;;  %2589 = vrot.lane.b32.xlu1 %v2307_v53, %s7357_s17  ;;  %v2309_v62 = vpack.c.bf16 %v2155_v49, %v2153_v56  ;;  %v4806_v53 = vunpack.i.l.bf16 %v6270_v44  ;;  %v2318_v57 = vpack.c.bf16 %v2238_v16, %v2237_v37  ;;  %v4936_v28 = vunpack.i.l.bf16 %v6368_v31 }
 0x405   : > { %2734 = vmatpush1.bf16.msra.mxu0 %v2640_v21  ;;  %v2317_v44 = vpack.c.bf16 %v4846_v54, %v4826_v35  ;;  %v4932_v4 = vunpack.i.h.bf16 %v6354_v43  ;;  %v4942_v34 = vunpack.i.h.bf16 %v6374_v15  ;;  %v4941_v21 = vunpack.i.l.bf16 %v6374_v15  ;;  %v2346_v54 = vld [vmem:[%s7332_s11 + $0x8] sm:$0xff] }
 0x406   : > { %v2160_v27 = vsel %vm2147_vm9, %v4806_v53, %v4921_v39  ;;  %v2240_v45 = vsel %vm2236_vm10, %v4936_v28, %v4937_v59  ;;  %v4947_v31 = vunpack.i.h.bf16 %v6360_v17  ;;  %v4946_v30 = vunpack.i.l.bf16 %v6360_v17 }
 0x407   : > { %2585 = vrot.lane.b32.xlu0 %v2305_v2, %s7357_s17  ;;  %v2314_v60 = vpack.c.bf16 %v2162_v0, %v2160_v27  ;;  %v2239_v1 = vsel %vm2236_vm10, %v4931_v10, %v4932_v4  ;;  %v2322_v2 = vpack.c.bf16 %v4937_v59, %v4932_v4  ;;  %v2241_v43 = vsel %vm2236_vm10, %v4941_v21, %v4942_v34  ;;  %v2347_v0 = vld [vmem:[%s7332_s11 + $0x10] sm:$0xff]  ;;  %v2898_v27 = vld [vmem:[%s7384_s18 + $0x48] sm:$0xff]  ;;  %v2348_v4 = vld [vmem:[%s7332_s11 + $0x18] sm:$0xff] }
 0x408   : > { %2581 = vrot.lane.b32.xlu1 %v2303_v6, %s7357_s17  ;;  %v2321_v9 = vpack.c.bf16 %v2240_v45, %v2239_v1  ;;  %v2242_v15 = vsel %vm2236_vm10, %v4946_v30, %v4947_v31  ;;  %v2320_v33 = vpack.c.bf16 %v4936_v28, %v4931_v10  ;;  %v4967_v6 = vunpack.i.h.bf16 %v6384_v41  ;;  %v2349_v1 = vld [vmem:[%s7332_s11 + $0x20] sm:$0xff] }
 0x409   : > { %v2324_v25 = vpack.c.bf16 %v2242_v15, %v2241_v43  ;;  %v4966_v17 = vunpack.i.l.bf16 %v6384_v41  ;;  %v4952_v56 = vunpack.i.h.bf16 %v6366_v3  ;;  %v2323_v20 = vpack.c.bf16 %v4946_v30, %v4941_v21  ;;  %v2892_v21 = vld [vmem:[%s7384_s18 + $0x18] sm:$0xff] }
 0x40a   : > { %v2325_v46 = vpack.c.bf16 %v4947_v31, %v4942_v34  ;;  %v2899_v34 = vld [vmem:[%s7384_s18 + $0x50] sm:$0xff]  ;;  %v2900_v43 = vld [vmem:[%s7384_s18 + $0x58] sm:$0xff] }
 0x40b   : > { %2595 = vrot.lane.b32.xlu0 %v2310_v29, %s7357_s17  ;;  %v2244_v51 = vsel %vm2236_vm10, %v4966_v17, %v4967_v6  ;;  %v2243_v52 = vsel %vm2236_vm10, %v4951_v19, %v4952_v56  ;;  %v2328_v40 = vpack.c.bf16 %v4967_v6, %v4952_v56  ;;  %v2326_v13 = vpack.c.bf16 %v4966_v17, %v4951_v19  ;;  %v2893_v17 = vld [vmem:[%s7384_s18 + $0x20] sm:$0xff]  ;;  %v2350_v56 = vld [vmem:[%s7332_s11 + $0x28] sm:$0xff] }
 0x40c   : > { %2593 = vrot.lane.b32.xlu1 %v2309_v62, %s7357_s17  ;;  %v2327_v3 = vpack.c.bf16 %v2244_v51, %v2243_v52  ;;  %v2894_v51 = vld [vmem:[%s7384_s18 + $0x28] sm:$0xff] }
 0x40f   : > { %2599 = vrot.lane.b32.xlu0 %v2312_v11, %s7357_s17 }
 0x410   : > { %2591 = vrot.lane.b32.xlu1 %v2308_v14, %s7357_s17 }
 0x413   : > { %2597 = vrot.lane.b32.xlu0 %v2311_v22, %s7357_s17  ;;  %v2889_v22 = vld [vmem:[%s7384_s18] sm:$0xff] }
 0x414   : > { %2601 = vrot.lane.b32.xlu1 %v2313_v42, %s7357_s17 }
 0x417   : > { %2607 = vrot.lane.b32.xlu0 %v2316_v63, %s7357_s17  ;;  %v2890_v63 = vld [vmem:[%s7384_s18 + $0x8] sm:$0xff] }
 0x418   : > { %2605 = vrot.lane.b32.xlu1 %v2315_v48, %s7357_s17  ;;  %v6471_v49 = vpop.f32.mrb[16].mxu1 }
 0x419   : > { %v6475_v29 = vpop.f32.mrb[17].mxu1 }
 0x41a   : > { %v6479_v62 = vpop.f32.mrb[18].mxu1 }
 0x41b   : > { %2611 = vrot.lane.b32.xlu0 %v2318_v57, %s7357_s17  ;;  %v6482_v41 = vpop.f32.mrb[19].mxu1 }
 0x41c   : > { %2603 = vrot.lane.b32.xlu1 %v2314_v60, %s7357_s17 }
 0x41f   : > { %2609 = vrot.lane.b32.xlu0 %v2317_v44, %s7357_s17  ;;  %v2891_v44 = vld [vmem:[%s7384_s18 + $0x10] sm:$0xff] }
 0x420   : > { %2613 = vrot.lane.b32.xlu1 %v2319_v5, %s7357_s17  ;;  %v6485_v58 = vpop.f32.mrb[20].mxu1 }
 0x421   : > { %v6487_v36 = vpop.f32.mrb[21].mxu1 }
 0x422   : > { %v6490_v11 = vpop.f32.mrb[22].mxu1 }
 0x423   : > { %2619 = vrot.lane.b32.xlu0 %v2322_v2, %s7357_s17  ;;  %v6496_v61 = vpop.f32.mrb[23].mxu1 }
 0x424   : > { %2617 = vrot.lane.b32.xlu1 %v2321_v9, %s7357_s17 }
 0x427   : > { %2623 = vrot.lane.b32.xlu0 %v2324_v25, %s7357_s17 }
 0x428   : > { %2615 = vrot.lane.b32.xlu1 %v2320_v33, %s7357_s17  ;;  %v6498_v14 = vpop.f32.mrb[24].mxu1 }
 0x429   : > { %v6500_v32 = vpop.f32.mrb[25].mxu1 }
 0x42a   : > { %v6502_v39 = vpop.f32.mrb[26].mxu1 }
 0x42b   : > { %2621 = vrot.lane.b32.xlu0 %v2323_v20, %s7357_s17  ;;  %v6508_v24 = vpop.f32.mrb[27].mxu1 }
 0x42c   : > { %2625 = vrot.lane.b32.xlu1 %v2325_v46, %s7357_s17  ;;  %v2901_v46 = vld [vmem:[%s7384_s18 + $0x60] sm:$0xff] }
 0x42f   : > { %2631 = vrot.lane.b32.xlu0 %v2328_v40, %s7357_s17  ;;  %v2351_v40 = vld [vmem:[%s7332_s11 + $0x30] sm:$0xff] }
 0x430   : > { %2629 = vrot.lane.b32.xlu1 %v2327_v3, %s7357_s17  ;;  %v6513_v42 = vpop.f32.mrb[28].mxu1 }
 0x431   : > { %v6517_v55 = vpop.f32.mrb[29].mxu1  ;;  %v2542_v35 = vpop.permute.xlu1 %2541 }
 0x432   : > { %v2538_v47 = vpop.permute.xlu0 %2537  ;;  %v6519_v50 = vpop.f32.mrb[30].mxu1 }
 0x433   : > { %2355 = vperm.xlu0 %4636, %v2345_v38   ;;  %v6524_v23 = vpop.f32.mrb[31].mxu1 }
 0x434   : > { %2627 = vrot.lane.b32.xlu1 %v2326_v13, %s7357_s17  ;;  %v2902_v13 = vld [vmem:[%s7384_s18 + $0x68] sm:$0xff] }
 0x435   : > { %v6541_v60 = vpop.permute.xlu1 %2565 }
 0x436   : > { %v6515_v18 = vpop.permute.xlu0 %2561 }
 0x437   : > { %2907 = vperm.xlu0 %4636, %v2889_v22  }
 0x438   : > { %2360 = vperm.xlu1 %4637, %v2346_v54   ;;  %v6534_v37 = vpop.f32.mrb[32].mxu1 }
 0x439   : > { %v6539_v57 = vpop.f32.mrb[33].mxu1 }
 0x43a   : > { %v2540_v16 = vpop.permute.xlu0 %2539  ;;  %v6543_v59 = vpop.f32.mrb[34].mxu1 }
 0x43b   : > { %2947 = vperm.xlu0 %4636, %v2897_v8   ;;  %v2643_v48 = vsel %vm2633_vm8, %v2540_v16, %v2542_v35  ;;  %v2642_v53 = vsel %vm2633_vm8, %v2538_v47, %v2540_v16  ;;  %v6545_v28 = vpop.f32.mrb[35].mxu1  ;;  %v2895_v16 = vld [vmem:[%s7384_s18 + $0x30] sm:$0xff] }
 0x43c   : > { %2735 = vmatprep.subr.bf16.mxu0 %v2643_v48  ;;  %2912 = vperm.xlu1 %4637, %v2890_v63   ;;  %v2352_v48 = vld [vmem:[%s7332_s11 + $0x38] sm:$0xff] }
 0x43d   : > { %2736 = vmatpush1.bf16.msra.mxu0 %v2642_v53  ;;  %v2903_v53 = vld [vmem:[%s7384_s18 + $0x70] sm:$0xff] }
 0x43e   : > { %v6553_v10 = vpop.permute.xlu0 %2563 }
 0x43f   : > { %2365 = vperm.xlu0 %4636, %v2347_v0   ;;  %v2896_v0 = vld [vmem:[%s7384_s18 + $0x38] sm:$0xff] }
 0x440   : > { %2952 = vperm.xlu1 %4637, %v2898_v27   ;;  %v6563_v31 = vpop.f32.mrb[36].mxu1 }
 0x441   : > { %v6568_v2 = vpop.f32.mrb[37].mxu1 }
 0x442   : > { %v2544_v5 = vpop.permute.xlu1 %2543  ;;  %v2548_v30 = vpop.permute.xlu0 %2547 }
 0x443   : > { %2917 = vperm.xlu0 %4636, %v2891_v44   ;;  %v6573_v9 = vpop.f32.mrb[38].mxu1 }
 0x444   : > { %2370 = vperm.xlu1 %4637, %v2348_v4   ;;  %v6577_v6 = vpop.f32.mrb[39].mxu1 }
 0x446   : > { %v6561_v45 = vpop.permute.xlu1 %2567  ;;  %v2572_v19 = vpop.permute.xlu0 %2571 }
 0x447   : > { %2957 = vperm.xlu0 %4636, %v2899_v34  }
 0x448   : > { %2922 = vperm.xlu1 %4637, %v2892_v21   ;;  %v6594_v3 = vpop.f32.mrb[40].mxu1 }
 0x449   : > { %v6599_v47 = vpop.f32.mrb[41].mxu1 }
 0x44a   : > { %v2546_v15 = vpop.permute.xlu1 %2545  ;;  %v6601_v54 = vpop.f32.mrb[42].mxu1 }
 0x44b   : > { %2375 = vperm.xlu0 %4636, %v2349_v1   ;;  %v2645_v25 = vsel %vm2633_vm8, %v2546_v15, %v2548_v30  ;;  %v2644_v33 = vsel %vm2633_vm8, %v2544_v5, %v2546_v15  ;;  %v6605_v63 = vpop.f32.mrb[43].mxu1  ;;  %v2904_v5 = vld [vmem:[%s7384_s18 + $0x78] sm:$0xff]  ;;  %v7385_v15 = vmov 0.0  }
 0x44c   : > { %2962 = vperm.xlu1 %4637, %v2900_v43   ;;  %2737 = vmatprep.subr.bf16.mxu0 %v2645_v25 }
 0x44d   : > { %2738 = vmatpush1.bf16.msra.mxu0 %v2644_v33 }
 0x44e   : > { %v2570_v20 = vpop.permute.xlu1 %2569 }
 0x44f   : > { %2927 = vperm.xlu0 %4636, %v2893_v17   ;;  %v2651_v17 = vsel %vm2633_vm8, %v6553_v10, %v6541_v60  ;;  %v2652_v60 = vsel %vm2633_vm8, %v6561_v45, %v2570_v20 }
 0x450   : > { %2380 = vperm.xlu1 %4637, %v2350_v56   ;;  %v6619_v27 = vpop.f32.mrb[44].mxu1  ;;  %v2650_v56 = vsel %vm2633_vm8, %v6515_v18, %v6553_v10 }
 0x451   : > { %v6621_v44 = vpop.f32.mrb[45].mxu1 }
 0x452   : > { %v2550_v52 = vpop.permute.xlu0 %2549  ;;  %v2554_v38 = vpop.permute.xlu1 %2553 }
 0x453   : > { %2967 = vperm.xlu0 %4636, %v2901_v46   ;;  %v6623_v4 = vpop.f32.mrb[46].mxu1 }
 0x454   : > { %2932 = vperm.xlu1 %4637, %v2894_v51   ;;  %v6628_v34 = vpop.f32.mrb[47].mxu1  ;;  %v2653_v51 = vsel %vm2633_vm8, %v2570_v20, %v2572_v19 }
 0x456   : > { %v2552_v22 = vpop.permute.xlu0 %2551 }
 0x457   : > { %2385 = vperm.xlu0 %4636, %v2351_v40   ;;  %v2647_v35 = vsel %vm2633_vm8, %v2552_v22, %v2554_v38  ;;  %v2646_v8 = vsel %vm2633_vm8, %v2550_v52, %v2552_v22 }
 0x458   : > { %2972 = vperm.xlu1 %4637, %v2902_v13   ;;  %2739 = vmatprep.subr.bf16.mxu0 %v2647_v35 }
 0x459   : > { %2740 = vmatpush1.bf16.msra.mxu0 %v2646_v8 }
 0x45a   : > { %v2576_v21 = vpop.permute.xlu0 %2575 }
 0x45b   : > { %2937 = vperm.xlu0 %4636, %v2895_v16  }
 0x45c   : > { %2390 = vperm.xlu1 %4637, %v2352_v48  }
 0x45f   : > { %2977 = vperm.xlu0 %4636, %v2903_v53  }
 0x460   : > { %2942 = vperm.xlu1 %4637, %v2896_v0  }
 0x461   : > { %v2560_v1 = vpop.permute.xlu0 %2559 }
 0x462   : > { %v2556_v30 = vpop.permute.xlu1 %2555 }
 0x463   : > { %4969 = vrot.lane.b32.xlu0 %v7385_v15, %s5361_s2 }
 0x464   : > { %2982 = vperm.xlu1 %4637, %v2904_v5  }
 0x465   : > { %v2574_v46 = vpop.permute.xlu0 %2573 }
 0x466   : > { %v2558_v43 = vpop.permute.xlu1 %2557  ;;  %v2654_v19 = vsel %vm2633_vm8, %v2574_v46, %v2576_v21 }
 0x467   : > { %v2649_v25 = vsel %vm2633_vm8, %v2558_v43, %v2560_v1  ;;  %v2648_v33 = vsel %vm2633_vm8, %v2556_v30, %v2558_v43  ;;  %4979 = vrot.lane.b32.xlu0 %v7385_v15, %s5361_s2 }
 0x468   : > { %2741 = vmatprep.subr.bf16.mxu0 %v2649_v25  ;;  %4974 = vrot.lane.b32.xlu1 %v7385_v15, %s5361_s2 }
 0x469   : > { %2742 = vmatpush1.bf16.msra.mxu0 %v2648_v33 }
 0x46a   : > { %2743 = vmatprep.subr.bf16.mxu0 %v2651_v17  ;;  %v2578_v52 = vpop.permute.xlu1 %2577 }
 0x46b   : > { %4989 = vrot.lane.b32.xlu0 %v7385_v15, %s5366_s30  ;;  %v2655_v18 = vsel %vm2633_vm8, %v2576_v21, %v2578_v52 }
 0x46c   : > { %4984 = vrot.lane.b32.xlu1 %v7385_v15, %s5361_s2 }
 0x46d   : > { %2744 = vmatpush1.bf16.msra.mxu0 %v2650_v56 }
 0x46e   : > { %2745 = vmatprep.subr.bf16.mxu0 %v2653_v51 }
 0x46f   : > { %4999 = vrot.lane.b32.xlu0 %v7385_v15, %s5366_s30 }
 0x470   : > { %4994 = vrot.lane.b32.xlu1 %v7385_v15, %s5366_s30 }
 0x471   : > { %v2584_v40 = vpop.permute.xlu0 %2583  ;;  %2746 = vmatpush1.bf16.msra.mxu0 %v2652_v60  ;;  %v5224_v60 = vld [vmem:[%s7331_s10] ss:$12 sps:$4 sm:$0xff]  }
 0x472   : > { %2747 = vmatprep.subr.bf16.mxu0 %v2655_v18  ;;  %v2580_v10 = vpop.permute.xlu1 %2579 }
 0x473   : > { %5009 = vrot.lane.b32.xlu0 %v7385_v15, %s5367_s13 }
 0x474   : > { %5004 = vrot.lane.b32.xlu1 %v7385_v15, %s5366_s30 }
 0x475   : > { %v2588_v38 = vpop.permute.xlu0 %2587  ;;  %2748 = vmatpush1.bf16.msra.mxu0 %v2654_v19 }
 0x476   : > { %v2590_v45 = vpop.permute.xlu1 %2589 }
 0x477   : > { %5019 = vrot.lane.b32.xlu0 %v7385_v15, %s5367_s13  ;;  %v2659_v16 = vsel %vm2633_vm8, %v2588_v38, %v2590_v45 }
 0x478   : > { %5014 = vrot.lane.b32.xlu1 %v7385_v15, %s5367_s13 }
 0x479   : > { %v2586_v20 = vpop.permute.xlu0 %2585 }
 0x47a   : > { %v2582_v13 = vpop.permute.xlu1 %2581  ;;  %v2658_v53 = vsel %vm2633_vm8, %v2586_v20, %v2588_v38 }
 0x47b   : > { %v2657_v22 = vsel %vm2633_vm8, %v2582_v13, %v2584_v40  ;;  %v2656_v35 = vsel %vm2633_vm8, %v2580_v10, %v2582_v13  ;;  %v5227_v40 = vld [vmem:[%s7331_s10 + $0x1c] ss:$12 sps:$4 sm:$0xff]  }
 0x47c   : > { %2749 = vmatprep.subr.bf16.mxu0 %v2657_v22  ;;  %5024 = vrot.lane.b32.xlu1 %v7385_v15, %s5367_s13  ;;  %v5229_v22 = vld [vmem:[%s7331_s10 + $0x18] ss:$12 sps:$4 sm:$0xff]  }
 0x47d   : > { %v2596_v8 = vpop.permute.xlu0 %2595  ;;  %2750 = vmatpush1.bf16.msra.mxu0 %v2656_v35  ;;  %v5230_v35 = vld [vmem:[%s7331_s10 + $0x34] ss:$12 sps:$4 sm:$0xff]  }
 0x47e   : > { %2751 = vmatprep.subr.bf16.mxu0 %v2659_v16  ;;  %v2594_v48 = vpop.permute.xlu1 %2593 }
 0x47f   : > { %v2661_v5 = vsel %vm2633_vm8, %v2594_v48, %v2596_v8 }
 0x481   : > { %v2600_v0 = vpop.permute.xlu0 %2599  ;;  %2752 = vmatpush1.bf16.msra.mxu0 %v2658_v53 }
 0x482   : > { %2753 = vmatprep.subr.bf16.mxu0 %v2661_v5  ;;  %v2592_v21 = vpop.permute.xlu1 %2591 }
 0x483   : > { %v2660_v30 = vsel %vm2633_vm8, %v2592_v21, %v2594_v48  ;;  %v5232_v21 = vld [vmem:[%s7331_s10 + $0x30] ss:$12 sps:$4 sm:$0xff]  }
 0x485   : > { %v2598_v1 = vpop.permute.xlu0 %2597  ;;  %2754 = vmatpush1.bf16.msra.mxu0 %v2660_v30 }
 0x486   : > { %v2602_v43 = vpop.permute.xlu1 %2601  ;;  %v2662_v25 = vsel %vm2633_vm8, %v2598_v1, %v2600_v0  ;;  %v5233_v1 = vld [vmem:[%s7331_s10 + $0x4c] ss:$12 sps:$4 sm:$0xff]  }
 0x487   : > { %v2663_v15 = vsel %vm2633_vm8, %v2600_v0, %v2602_v43 }
 0x488   : > { %2755 = vmatprep.subr.bf16.mxu0 %v2663_v15 }
 0x489   : > { %v2608_v33 = vpop.permute.xlu0 %2607  ;;  %2756 = vmatpush1.bf16.msra.mxu0 %v2662_v25 }
 0x48a   : > { %v2606_v17 = vpop.permute.xlu1 %2605 }
 0x48b   : > { %v2665_v56 = vsel %vm2633_vm8, %v2606_v17, %v2608_v33 }
 0x48c   : > { %2757 = vmatprep.subr.bf16.mxu0 %v2665_v56  ;;  %v5235_v56 = vld [vmem:[%s7331_s10 + $0x48] ss:$12 sps:$4 sm:$0xff]  }
 0x48d   : > { %v2612_v46 = vpop.permute.xlu0 %2611 }
 0x48e   : > { %v2604_v51 = vpop.permute.xlu1 %2603 }
 0x48f   : > { %v2664_v52 = vsel %vm2633_vm8, %v2604_v51, %v2606_v17  ;;  %v5237_v51 = vld [vmem:[%s7331_s10 + $0x20] ss:$12 sps:$4 sm:$0xff]  }
 0x490   : > { %2758 = vmatpush1.bf16.msra.mxu0 %v2664_v52  ;;  %v5238_v52 = vld [vmem:[%s7331_s10 + $0x38] ss:$12 sps:$4 sm:$0xff]  }
 0x491   : > { %v2610_v18 = vpop.permute.xlu0 %2609 }
 0x492   : > { %v2614_v10 = vpop.permute.xlu1 %2613  ;;  %v2666_v38 = vsel %vm2633_vm8, %v2610_v18, %v2612_v46 }
 0x493   : > { %2760 = vmatmul.mubr.bf16.vlgmr.msra.gmra.mrb[48].mxu0 %v5224_v60  ;;  %v2667_v19 = vsel %vm2633_vm8, %v2612_v46, %v2614_v10  ;;  %v5236_v46 = vld [vmem:[%s7331_s10 + $0x8] ss:$12 sps:$4 sm:$0xff]   ;;  %v5239_v60 = vld [vmem:[%s7331_s10 + $0x50] ss:$12 sps:$4 sm:$0xff]  }
 0x494   : > { %2800 = vmatprep.subr.bf16.mxu0 %v2667_v19  ;;  %2769 = vmatprep.mubr.bf16.mxu0 %v5227_v40  ;;  %v7386_v40 = vmov 0.0|0.0  }
 0x495   : > { %v2620_v45 = vpop.permute.xlu0 %2619  ;;  %2801 = vmatpush1.bf16.msra.mxu0 %v2666_v38  ;;  %3864 = vrot.lane.b32.xlu0 %v7386_v40, %s5368_s29 }
 0x496   : > { %v2618_v20 = vpop.permute.xlu1 %2617  ;;  %3870 = vrot.lane.b32.xlu1 %v7386_v40, %s5368_s29 }
 0x497   : > { %v2669_v13 = vsel %vm2633_vm8, %v2618_v20, %v2620_v45 }
 0x498   : > { %2802 = vmatprep.subr.bf16.mxu0 %v2669_v13 }
 0x499   : > { %v2624_v8 = vpop.permute.xlu0 %2623  ;;  %3876 = vrot.lane.b32.xlu0 %v7386_v40, %s5368_s29 }
 0x49a   : > { %v2616_v16 = vpop.permute.xlu1 %2615  ;;  %3882 = vrot.lane.b32.xlu1 %v7386_v40, %s5368_s29 }
 0x49b   : > { %v2668_v48 = vsel %vm2633_vm8, %v2616_v16, %v2618_v20  ;;  %2770 = vmatmul.mubr.bf16.gmra.mrb[52].mxu0 %v5229_v22 }
 0x49c   : > { %2803 = vmatpush1.bf16.msra.mxu0 %v2668_v48  ;;  %2779 = vmatprep.mubr.bf16.mxu0 %v5230_v35 }
 0x49d   : > { %v2622_v53 = vpop.permute.xlu0 %2621 }
 0x49e   : > { %v2626_v0 = vpop.permute.xlu1 %2625  ;;  %v2670_v30 = vsel %vm2633_vm8, %v2622_v53, %v2624_v8 }
 0x49f   : > { %v2671_v5 = vsel %vm2633_vm8, %v2624_v8, %v2626_v0 }
 0x4a0   : > { %2804 = vmatprep.subr.bf16.mxu0 %v2671_v5 }
 0x4a1   : > { %v2632_v43 = vpop.permute.xlu0 %2631  ;;  %2805 = vmatpush1.bf16.msra.mxu0 %v2670_v30 }
 0x4a2   : > { %v2630_v15 = vpop.permute.xlu1 %2629 }
 0x4a3   : > { %2780 = vmatmul.mubr.bf16.gmra.mrb[56].mxu0 %v5232_v21  ;;  %v2673_v25 = vsel %vm2633_vm8, %v2630_v15, %v2632_v43 }
 0x4a4   : > { %2806 = vmatprep.subr.bf16.mxu0 %v2673_v25  ;;  %2789 = vmatprep.mubr.bf16.mxu0 %v5233_v1 }
 0x4a6   : > { %v2628_v33 = vpop.permute.xlu1 %2627 }
 0x4a7   : > { %v2672_v17 = vsel %vm2633_vm8, %v2628_v33, %v2630_v15 }
 0x4a8   : > { %2807 = vmatpush1.bf16.msra.mxu0 %v2672_v17 }
 0x4ab   : > { %2790 = vmatmul.mubr.bf16.gmra.mrb[60].mxu0 %v5235_v56 }
 0x4ac   : > { %2832 = vmatprep.mubr.bf16.mxu0 %v7383_v26 }
 0x4b2   : > { %v2356_v18 = vpop.permute.xlu0 %2355 }
 0x4b3   : > { %4448 = vmatmul.mubr.msk.bf16.vlgmr.msra.gmra.mrb[48].mxu0 %vm2714_vm11, %v5236_v46 }
 0x4b4   : > { %2842 = vmatprep.mubr.bf16.mxu0 %v7383_v26 }
 0x4b6   : > { %v2908_v19 = vpop.permute.xlu0 %2907 }
 0x4b7   : > { %v2361_v10 = vpop.permute.xlu1 %2360  ;;  %v3084_v30 = vadd.f32 %v6471_v49, %v2908_v19  ;;  %v3086_v1 = vadd.f32 %v6475_v29, %v2908_v19 }
 0x4ba   : > { %v2948_v45 = vpop.permute.xlu0 %2947 }
 0x4bb   : > { %4449 = vmatmul.mubr.msk.bf16.gmra.mrb[52].mxu0 %vm2714_vm11, %v5237_v51  ;;  %v2913_v38 = vpop.permute.xlu1 %2912  ;;  %v3124_v43 = vadd.f32 %v6534_v37, %v2948_v45  ;;  %v3126_v25 = vadd.f32 %v6539_v57, %v2948_v45 }
 0x4bc   : > { %2852 = vmatprep.mubr.bf16.mxu0 %v7383_v26  ;;  %v3088_v33 = vadd.f32 %v6479_v62, %v2913_v38  ;;  %v3090_v17 = vadd.f32 %v6482_v41, %v2913_v38 }
 0x4be   : > { %v2366_v13 = vpop.permute.xlu0 %2365 }
 0x4bf   : > { %v2953_v20 = vpop.permute.xlu1 %2952 }
 0x4c2   : > { %v2918_v35 = vpop.permute.xlu0 %2917 }
 0x4c3   : > { %4450 = vmatmul.mubr.msk.bf16.gmra.mrb[56].mxu0 %vm2714_vm11, %v5238_v52  ;;  %v6735_v22 = vpop.permute.xlu1 %2370  ;;  %v3128_v52 = vadd.f32 %v6543_v59, %v2953_v20  ;;  %v3094_v49 = vadd.f32 %v6485_v58, %v2918_v35  ;;  %v3096_v37 = vadd.f32 %v6487_v36, %v2918_v35 }
 0x4c4   : > { %2862 = vmatprep.mubr.bf16.mxu0 %v7383_v26 }
 0x4c6   : > { %v2958_v16 = vpop.permute.xlu0 %2957 }
 0x4c7   : > { %v2923_v8 = vpop.permute.xlu1 %2922  ;;  %v3134_v19 = vadd.f32 %v6563_v31, %v2958_v16  ;;  %v3136_v41 = vadd.f32 %v6568_v2, %v2958_v16 }
 0x4c8   : > { %v3098_v38 = vadd.f32 %v6490_v11, %v2923_v8 }
 0x4ca   : > { %v6737_v53 = vpop.permute.xlu0 %2375 }
 0x4cb   : > { %4451 = vmatmul.mubr.msk.bf16.gmra.mrb[60].mxu0 %vm2714_vm11, %v5239_v60  ;;  %v2963_v48 = vpop.permute.xlu1 %2962  ;;  %v3130_v60 = vadd.f32 %v6545_v28, %v2953_v20  ;;  %v3100_v28 = vadd.f32 %v6496_v61, %v2923_v8 }
 0x4cc   : > { %4174 = vmatprep.mubr.bf16.mxu0 %v7383_v26  ;;  %v3138_v58 = vadd.f32 %v6573_v9, %v2963_v48  ;;  %v3140_v36 = vadd.f32 %v6577_v6, %v2963_v48 }
 0x4ce   : > { %v2928_v5 = vpop.permute.xlu0 %2927 }
 0x4cf   : > { %v6739_v0 = vpop.permute.xlu1 %2380  ;;  %v3104_v31 = vadd.f32 %v6498_v14, %v2928_v5 }
 0x4d2   : > { %v2968_v56 = vpop.permute.xlu0 %2967 }
 0x4d3   : > { %v6741_v21 = vpop.permute.xlu1 %2932  ;;  %v6762_v2 = vadd.f32 %v6594_v3, %v2968_v56  ;;  %v6771_v9 = vadd.f32 %v6599_v47, %v2968_v56 }
 0x4d4   : > { %v3108_v14 = vadd.f32 %v6502_v39, %v6741_v21 }
 0x4d6   : > { %v6764_v11 = vpop.permute.xlu0 %2385 }
 0x4d7   : > { %v2973_v57 = vpop.permute.xlu1 %2972 }
 0x586   : > { %v2834_v15 = vpop.f32.mrb[48].mxu0 }
 0x587   : > { %v4497_v46 = vadd.f32 %v2834_v15, %v2356_v18  ;;  %v2836_v51 = vpop.f32.mrb[49].mxu0 }
 0x588   : > { %v4498_v40 = vadd.f32 %v2836_v51, %v2356_v18  ;;  %v2838_v29 = vpop.f32.mrb[50].mxu0 }
 0x589   : > { %v3162_v45 = vmul.f32 %v4497_v46, %v3084_v30  ;;  %v4499_v62 = vadd.f32 %v2838_v29, %v2361_v10  ;;  %v2840_v26 = vpop.f32.mrb[51].mxu0  ;;  %v3106_v46 = vadd.f32 %v6500_v32, %v2928_v5 }
 0x58a   : > { %v3163_v15 = vmul.f32 %v4498_v40, %v3086_v1  ;;  %v4500_v59 = vadd.f32 %v2840_v26, %v2361_v10  ;;  %v6779_v10 = vpop.permute.xlu1 %2390 }
 0x58b   : > { %v3178_v18 = vadd.f32 %v3162_v45, %v3124_v43  ;;  %v3164_v20 = vmul.f32 %v4499_v62, %v3088_v33 }
 0x58c   : > { %v3179_v35 = vadd.f32 %v3163_v15, %v3126_v25  ;;  %v3165_v30 = vmul.f32 %v4500_v59, %v3090_v17  ;;  %v3148_v15 = vadd.f32 %v6601_v54, %v2973_v57 }
 0x58d   : > { %v6768_v26 = vsel %vm5673_vm1, 0.0, %v3178_v18  ;;  %v3180_v61 = vadd.f32 %v3164_v20, %v3128_v52  ;;  %v2938_v52 = vpop.permute.xlu0 %2937 }
 0x58e   : > { %v6777_v6 = vsel %vm5677_vm2, 0.0, %v3179_v35  ;;  %v3181_v32 = vadd.f32 %v3165_v30, %v3130_v60  ;;  %v2844_v3 = vpop.f32.mrb[52].mxu0  ;;  %v2943_v59 = vpop.permute.xlu1 %2942 }
 0x58f   : > { %v6783_v8 = vsel %vm5673_vm1, 0.0, %v3180_v61  ;;  %v4501_v16 = vadd.f32 %v2844_v3, %v2366_v13  ;;  %v2846_v48 = vpop.f32.mrb[53].mxu0  ;;  %v5043_v47 = vpack.i.bf16 %v6777_v6, %v6768_v26 }
 0x590   : > { %v6789_v39 = vsel %vm5677_vm2, 0.0, %v3181_v32  ;;  %v4502_v5 = vadd.f32 %v2846_v48, %v2366_v13  ;;  %v2848_v1 = vpop.f32.mrb[54].mxu0  ;;  %v3621_v62 = vpack.c.bf16 %v6783_v8, %v6768_v26 }
 0x591   : > { %v3166_v43 = vmul.f32 %v4501_v16, %v3094_v49  ;;  %v4503_v25 = vadd.f32 %v2848_v1, %v6735_v22  ;;  %v2850_v33 = vpop.f32.mrb[55].mxu0  ;;  %5044 = vrot.lane.b32.xlu1 %v5043_v47, %s5369_s21  ;;  %5029 = vrot.lane.b32.xlu0 %v5043_v47, %s5361_s2  ;;  %v5048_v17 = vpack.i.bf16 %v6789_v39, %v6783_v8 }
 0x592   : > { %v3167_v56 = vmul.f32 %v4502_v5, %v3096_v37  ;;  %v4504_v51 = vadd.f32 %v2850_v33, %v6735_v22  ;;  %v3622_v13 = vpack.c.bf16 %v6789_v39, %v6777_v6  ;;  %v3110_v49 = vadd.f32 %v6508_v24, %v6741_v21  ;;  %v2983_v32 = vpop.permute.xlu1 %2982 }
 0x593   : > { %v3182_v60 = vadd.f32 %v3166_v43, %v3134_v19  ;;  %v3168_v40 = vmul.f32 %v4503_v25, %v3098_v38  ;;  %v3150_v37 = vadd.f32 %v6605_v63, %v2973_v57  ;;  %v3114_v24 = vadd.f32 %v6513_v42, %v2938_v52 }
 0x594   : > { %v3183_v29 = vadd.f32 %v3167_v56, %v3136_v41  ;;  %v3169_v45 = vmul.f32 %v4504_v51, %v3100_v28  ;;  %v3116_v21 = vadd.f32 %v6517_v55, %v2938_v52  ;;  %v3118_v5 = vadd.f32 %v6519_v50, %v2943_v59 }
 0x595   : > { %v6807_v22 = vsel %vm5673_vm1, 0.0, %v3182_v60  ;;  %v3184_v19 = vadd.f32 %v3168_v40, %v3138_v58  ;;  %5034 = vrot.lane.b32.xlu0 %v5043_v47, %s5366_s30  ;;  %5049 = vrot.lane.b32.xlu1 %v5048_v17, %s5361_s2 }
 0x596   : > { %v6815_v41 = vsel %vm5677_vm2, 0.0, %v3183_v29  ;;  %v3185_v54 = vadd.f32 %v3169_v45, %v3140_v36  ;;  %v2854_v63 = vpop.f32.mrb[56].mxu0  ;;  %v2978_v36 = vpop.permute.xlu0 %2977 }
 0x597   : > { %v6819_v57 = vsel %vm5673_vm1, 0.0, %v3184_v19  ;;  %v4505_v38 = vadd.f32 %v2854_v63, %v6737_v53  ;;  %v2856_v28 = vpop.f32.mrb[57].mxu0  ;;  %v6824_v58 = vpack.i.bf16 %v6815_v41, %v6807_v22  ;;  %v3154_v16 = vadd.f32 %v6619_v27, %v2978_v36  ;;  %v6910_v12 = vpop.permute.xlu1 %4974 }
 0x598   : > { %v6828_v42 = vsel %vm5677_vm2, 0.0, %v3185_v54  ;;  %v4506_v55 = vadd.f32 %v2856_v28, %v6737_v53  ;;  %v2858_v18 = vpop.f32.mrb[58].mxu0  ;;  %v3624_v20 = vpack.c.bf16 %v6819_v57, %v6807_v22  ;;  %v3156_v39 = vadd.f32 %v6621_v44, %v2978_v36 }
 0x599   : > { %v3170_v35 = vmul.f32 %v4505_v38, %v3104_v31  ;;  %v4507_v30 = vadd.f32 %v2858_v18, %v6739_v0  ;;  %v2860_v26 = vpop.f32.mrb[59].mxu0  ;;  %5039 = vrot.lane.b32.xlu0 %v5043_v47, %s5367_s13  ;;  %5054 = vrot.lane.b32.xlu1 %v5048_v17, %s5366_s30  ;;  %v6838_v61 = vpack.i.bf16 %v6828_v42, %v6819_v57 }
 0x59a   : > { %v3171_v6 = vmul.f32 %v4506_v55, %v3106_v46  ;;  %v4508_v53 = vadd.f32 %v2860_v26, %v6739_v0  ;;  %v3625_v31 = vpack.c.bf16 %v6828_v42, %v6815_v41  ;;  %v4970_v7 = vpop.permute.xlu0 %4969 }
 0x59b   : > { %v3186_v3 = vadd.f32 %v3170_v35, %v6762_v2  ;;  %v3172_v8 = vmul.f32 %v4507_v30, %v3108_v14  ;;  %v3120_v2 = vadd.f32 %v6524_v23, %v2943_v59  ;;  %v3158_v14 = vadd.f32 %v6623_v4, %v2983_v32  ;;  %v6918_v57 = vpop.permute.xlu1 %4984 }
 0x59c   : > { %v3187_v48 = vadd.f32 %v3171_v6, %v6771_v9  ;;  %v3173_v47 = vmul.f32 %v4508_v53, %v3110_v49 }
 0x59d   : > { %v3202_v46 = vsel %vm5673_vm1, 0.0, %v3186_v3  ;;  %v3188_v0 = vadd.f32 %v3172_v8, %v3148_v15  ;;  %5064 = vrot.lane.b32.xlu0 %v5048_v17, %s5369_s21  ;;  %5059 = vrot.lane.b32.xlu1 %v5048_v17, %s5367_s13  ;;  %v4972_v3 = vunpack.i.h.bf16 %v4970_v7 }
 0x59e   : > { %v3203_v27 = vsel %vm5677_vm2, 0.0, %v3187_v48  ;;  %v3189_v9 = vadd.f32 %v3173_v47, %v3150_v37  ;;  %v2864_v1 = vpop.f32.mrb[60].mxu0  ;;  %v3160_v37 = vadd.f32 %v6628_v34, %v2983_v32  ;;  %v6916_v22 = vpop.permute.xlu0 %4979 }
 0x59f   : > { %v3204_v50 = vsel %vm5673_vm1, 0.0, %v3188_v0  ;;  %v4509_v44 = vadd.f32 %v2864_v1, %v6764_v11  ;;  %v2866_v43 = vpop.f32.mrb[61].mxu0  ;;  %v5098_v25 = vpack.i.bf16 %v3203_v27, %v3202_v46  ;;  %v6922_v28 = vpop.permute.xlu1 %4994 }
 0x5a0   : > { %v3205_v33 = vsel %vm5677_vm2, 0.0, %v3189_v9  ;;  %v4510_v17 = vadd.f32 %v2866_v43, %v6764_v11  ;;  %v2868_v23 = vpop.f32.mrb[62].mxu0  ;;  %v3627_v56 = vpack.c.bf16 %v3204_v50, %v3202_v46 }
 0x5a1   : > { %v3174_v4 = vmul.f32 %v4509_v44, %v3114_v24  ;;  %v4511_v51 = vadd.f32 %v2868_v23, %v6779_v10  ;;  %v2870_v52 = vpop.f32.mrb[63].mxu0  ;;  %3868 = vrot.lane.b32.xlu1 %v3622_v13, %s5368_s29  ;;  %3866 = vrot.lane.b32.xlu0 %v3621_v62, %s5368_s29  ;;  %v5113_v60 = vpack.i.bf16 %v3205_v33, %v3204_v50 }
 0x5a2   : > { %v3175_v40 = vmul.f32 %v4510_v17, %v3116_v21  ;;  %v4512_v49 = vadd.f32 %v2870_v52, %v6779_v10  ;;  %v3628_v15 = vpack.c.bf16 %v3205_v33, %v3203_v27  ;;  %v4990_v38 = vpop.permute.xlu0 %4989 }
 0x5a3   : > { %v3190_v29 = vadd.f32 %v3174_v4, %v3154_v16  ;;  %v3176_v45 = vmul.f32 %v4511_v51, %v3118_v5  ;;  %v6926_v42 = vpop.permute.xlu1 %5004  ;;  %v4971_v16 = vunpack.i.l.bf16 %v4970_v7  ;;  %v4992_v44 = vunpack.i.h.bf16 %v4990_v38 }
 0x5a4   : > { %v3191_v11 = vadd.f32 %v3175_v40, %v3156_v39  ;;  %v3177_v59 = vmul.f32 %v4512_v49, %v3120_v2  ;;  %v4991_v43 = vunpack.i.l.bf16 %v4990_v38 }
 0x5a5   : > { %v3206_v19 = vsel %vm5673_vm1, 0.0, %v3190_v29  ;;  %v3192_v24 = vadd.f32 %v3176_v45, %v3158_v14  ;;  %5069 = vrot.lane.b32.xlu1 %v6824_v58, %s5361_s2  ;;  %5084 = vrot.lane.b32.xlu0 %v6838_v61, %s5361_s2 }
 0x5a6   : > { %v3207_v10 = vsel %vm5677_vm2, 0.0, %v3191_v11  ;;  %v3193_v13 = vadd.f32 %v3177_v59, %v3160_v37 }
 0x5a7   : > { %v3208_v62 = vsel %vm5673_vm1, 0.0, %v3192_v24  ;;  %v5128_v34 = vpack.i.bf16 %v3207_v10, %v3206_v19  ;;  %v6930_v18 = vpop.permute.xlu1 %5014 }
 0x5a8   : > { %v3209_v21 = vsel %vm5677_vm2, 0.0, %v3193_v13  ;;  %v3630_v41 = vpack.c.bf16 %v3208_v62, %v3206_v19 }
 0x5a9   : > { %5074 = vrot.lane.b32.xlu1 %v6824_v58, %s5366_s30  ;;  %5089 = vrot.lane.b32.xlu0 %v6838_v61, %s5366_s30  ;;  %v5143_v54 = vpack.i.bf16 %v3209_v21, %v3208_v62  ;;  %v3631_v63 = vpack.c.bf16 %v3209_v21, %v3207_v10 }
 0x5ab   : > { %v6934_v36 = vpop.permute.xlu1 %5024 }
 0x5ad   : > { %5079 = vrot.lane.b32.xlu1 %v6824_v58, %s5367_s13  ;;  %5094 = vrot.lane.b32.xlu0 %v6838_v61, %s5367_s13 }
 0x5af   : > { %v6936_v30 = vpop.permute.xlu1 %3870 }
 0x5b1   : > { %3874 = vrot.lane.b32.xlu0 %v3625_v31, %s5368_s29  ;;  %3872 = vrot.lane.b32.xlu1 %v3624_v20, %s5368_s29 }
 0x5b5   : > { %5099 = vrot.lane.b32.xlu0 %v5098_v25, %s5361_s2  ;;  %5114 = vrot.lane.b32.xlu1 %v5113_v60, %s5361_s2 }
 0x5b9   : > { %5104 = vrot.lane.b32.xlu0 %v5098_v25, %s5366_s30  ;;  %5119 = vrot.lane.b32.xlu1 %v5113_v60, %s5366_s30 }
 0x5bd   : > { %5109 = vrot.lane.b32.xlu0 %v5098_v25, %s5367_s13  ;;  %5124 = vrot.lane.b32.xlu1 %v5113_v60, %s5367_s13 }
 0x5c1   : > { %3880 = vrot.lane.b32.xlu1 %v3628_v15, %s5368_s29  ;;  %3878 = vrot.lane.b32.xlu0 %v3627_v56, %s5368_s29 }
 0x5c5   : > { %5129 = vrot.lane.b32.xlu1 %v5128_v34, %s5361_s2  ;;  %5144 = vrot.lane.b32.xlu0 %v5143_v54, %s5361_s2 }
 0x5c9   : > { %5134 = vrot.lane.b32.xlu1 %v5128_v34, %s5366_s30  ;;  %5149 = vrot.lane.b32.xlu0 %v6824_v58, %s5369_s21  ;;  %v6924_v58 = vpop.permute.xlu0 %4999 }
 0x5cd   : > { %5139 = vrot.lane.b32.xlu1 %v5128_v34, %s5367_s13  ;;  %5164 = vrot.lane.b32.xlu0 %v5113_v60, %s5369_s21  ;;  %v6928_v55 = vpop.permute.xlu0 %5009 }
 0x5d1   : > { %5154 = vrot.lane.b32.xlu1 %v6838_v61, %s5369_s21  ;;  %5169 = vrot.lane.b32.xlu0 %v5128_v34, %s5369_s21  ;;  %v6932_v20 = vpop.permute.xlu0 %5019  ;;  %v6940_v61 = vpop.permute.xlu1 %3882 }
 0x5d5   : > { %5159 = vrot.lane.b32.xlu1 %v5098_v25, %s5369_s21  ;;  %5174 = vrot.lane.b32.xlu0 %v5143_v54, %s5366_s30  ;;  %v3865_v35 = vpop.permute.xlu0 %3864 }
 0x5d9   : > { %5184 = vrot.lane.b32.xlu1 %v5143_v54, %s5369_s21  ;;  %5179 = vrot.lane.b32.xlu0 %v5143_v54, %s5367_s13  ;;  %v6938_v26 = vpop.permute.xlu0 %3876  ;;  %v4977_v54 = vunpack.i.h.bf16 %v6910_v12  ;;  %s7387_s13 = sld [smem:[#allocation20_spill]] }
 0x5dd   : > { %3886 = vrot.lane.b32.xlu0 %v3631_v63, %s5368_s29  ;;  %3884 = vrot.lane.b32.xlu1 %v3630_v41, %s5368_s29  ;;  %v4976_v63 = vunpack.i.l.bf16 %v6910_v12 }
 0x603   : > { %v5030_v6 = vpop.permute.xlu0 %5029  ;;  %v5045_v53 = vpop.permute.xlu1 %5044 }
 0x604   : > { %v5031_v32 = vunpack.i.l.bf16 %v5030_v6  ;;  %v5032_v48 = vunpack.i.h.bf16 %v5030_v6  ;;  %v5047_v33 = vunpack.i.h.bf16 %v5045_v53  ;;  %v5046_v17 = vunpack.i.l.bf16 %v5045_v53 }
 0x606   : > { %v3322_v5 = vsel %vm1167_vm7, %v4971_v16, %v5031_v32  ;;  %v6955_v45 = vsel %vm3587_vm12, %v5046_v17, %v5047_v33  ;;  %v3323_v59 = vsel %vm1167_vm7, %v5031_v32, %v5032_v48 }
 0x607   : > { %v5035_v8 = vpop.permute.xlu0 %5034  ;;  %v5050_v31 = vpop.permute.xlu1 %5049 }
 0x608   : > { %v5052_v47 = vunpack.i.h.bf16 %v5050_v31  ;;  %v5051_v39 = vunpack.i.l.bf16 %v5050_v31  ;;  %v5036_v2 = vunpack.i.l.bf16 %v5035_v8  ;;  %v5037_v1 = vunpack.i.h.bf16 %v5035_v8 }
 0x60a   : > { %v3634_v46 = vpack.c.bf16 %v5052_v47, %v5032_v48  ;;  %v3324_v0 = vsel %vm1167_vm7, %v4972_v3, %v5051_v39  ;;  %v3410_v56 = vsel %vm2236_vm10, %v4991_v43, %v5036_v2  ;;  %v3325_v29 = vsel %vm1167_vm7, %v5051_v39, %v5052_v47 }
 0x60b   : > { %v3632_v14 = vpack.c.bf16 %v3324_v0, %v3322_v5  ;;  %v6944_v27 = vpop.permute.xlu0 %5039  ;;  %v5055_v9 = vpop.permute.xlu1 %5054  ;;  %v3633_v13 = vpack.c.bf16 %v3325_v29, %v3323_v59  ;;  %v3411_v41 = vsel %vm2236_vm10, %v5036_v2, %v5037_v1  ;;  %v4997_v5 = vunpack.i.h.bf16 %v6922_v28 }
 0x60c   : > { %v5057_v50 = vunpack.i.h.bf16 %v5055_v9  ;;  %3892 = vrot.lane.b32.xlu1 %v3634_v46, %s5368_s29  ;;  %v5056_v25 = vunpack.i.l.bf16 %v5055_v9  ;;  %v4996_v2 = vunpack.i.l.bf16 %v6922_v28  ;;  %v4981_v29 = vunpack.i.l.bf16 %v6916_v22 }
 0x60d   : > { %3888 = vrot.lane.b32.xlu0 %v3632_v14, %s5368_s29 }
 0x60e   : > { %v3646_v23 = vpack.c.bf16 %v5057_v50, %v5037_v1  ;;  %v3412_v4 = vsel %vm2236_vm10, %v4992_v44, %v5056_v25  ;;  %v3413_v62 = vsel %vm2236_vm10, %v5056_v25, %v5057_v50 }
 0x60f   : > { %v5065_v51 = vpop.permute.xlu0 %5064  ;;  %v6950_v52 = vpop.permute.xlu1 %5059  ;;  %v3644_v60 = vpack.c.bf16 %v3412_v4, %v3410_v56  ;;  %v3645_v7 = vpack.c.bf16 %v3413_v62, %v3411_v41 }
 0x610   : > { %v5067_v40 = vunpack.i.h.bf16 %v5065_v51  ;;  %v5066_v49 = vunpack.i.l.bf16 %v5065_v51  ;;  %3916 = vrot.lane.b32.xlu1 %v3646_v23, %s5368_s29 }
 0x611   : > { %3912 = vrot.lane.b32.xlu0 %v3644_v60, %s5368_s29 }
 0x612   : > { %v6958_v15 = vsel %vm3587_vm12, %v5066_v49, %v5067_v40  ;;  %v6960_v37 = vpack.c.bf16 %v5066_v49, %v5046_v17  ;;  %v6962_v11 = vpack.c.bf16 %v5067_v40, %v5047_v33  ;;  %v4982_v49 = vunpack.i.h.bf16 %v6916_v22 }
 0x613   : > { %v3669_v19 = vpack.c.bf16 %v6958_v15, %v6955_v45  ;;  %v3867_v24 = vpop.permute.xlu0 %3866  ;;  %v3869_v10 = vpop.permute.xlu1 %3868 }
 0x614   : > { %v3985_v34 = vsel %vm3984_vm13, %v3865_v35, %v3867_v24  ;;  %v3986_v21 = vsel %vm3984_vm13, %v3867_v24, %v3869_v10 }
 0x615   : > { %4077 = vmatprep.subr.bf16.mxu1 %v3986_v21  ;;  %3890 = vrot.lane.b32.xlu0 %v3633_v13, %s5368_s29 }
 0x616   : > { %4078 = vmatpush1.bf16.msra.mxu1 %v3985_v34 }
 0x617   : > { %v5085_v38 = vpop.permute.xlu0 %5084  ;;  %v5070_v6 = vpop.permute.xlu1 %5069 }
 0x618   : > { %v5087_v53 = vunpack.i.h.bf16 %v5085_v38  ;;  %v5086_v32 = vunpack.i.l.bf16 %v5085_v38  ;;  %v5072_v3 = vunpack.i.h.bf16 %v5070_v6  ;;  %v5071_v8 = vunpack.i.l.bf16 %v5070_v6 }
 0x619   : > { %3914 = vrot.lane.b32.xlu0 %v3645_v7, %s5368_s29 }
 0x61a   : > { %v3328_v35 = vsel %vm1167_vm7, %v4977_v54, %v5086_v32  ;;  %v3637_v31 = vpack.c.bf16 %v5087_v53, %v5072_v3  ;;  %v3326_v16 = vsel %vm1167_vm7, %v4976_v63, %v5071_v8  ;;  %v3329_v25 = vsel %vm1167_vm7, %v5086_v32, %v5087_v53 }
 0x61b   : > { %v3635_v48 = vpack.c.bf16 %v3328_v35, %v3326_v16  ;;  %v5090_v47 = vpop.permute.xlu0 %5089  ;;  %v5075_v39 = vpop.permute.xlu1 %5074  ;;  %v3327_v33 = vsel %vm1167_vm7, %v5071_v8, %v5072_v3 }
 0x61c   : > { %v5092_v12 = vunpack.i.h.bf16 %v5090_v47  ;;  %v5091_v46 = vunpack.i.l.bf16 %v5090_v47  ;;  %v5077_v0 = vunpack.i.h.bf16 %v5075_v39  ;;  %v5076_v14 = vunpack.i.l.bf16 %v5075_v39 }
 0x61d   : > { %3894 = vrot.lane.b32.xlu1 %v3635_v48, %s5368_s29  ;;  %3898 = vrot.lane.b32.xlu0 %v3637_v31, %s5368_s29  ;;  %v3636_v28 = vpack.c.bf16 %v3329_v25, %v3327_v33 }
 0x61e   : > { %v3416_v9 = vsel %vm2236_vm10, %v4997_v5, %v5091_v46  ;;  %v3649_v1 = vpack.c.bf16 %v5092_v12, %v5077_v0  ;;  %v3414_v50 = vsel %vm2236_vm10, %v4996_v2, %v5076_v14  ;;  %v3417_v4 = vsel %vm2236_vm10, %v5091_v46, %v5092_v12 }
 0x61f   : > { %v6984_v44 = vpop.permute.xlu0 %5094  ;;  %v6986_v43 = vpop.permute.xlu1 %5079  ;;  %v3647_v17 = vpack.c.bf16 %v3416_v9, %v3414_v50  ;;  %v3415_v51 = vsel %vm2236_vm10, %v5076_v14, %v5077_v0  ;;  %v4987_v2 = vunpack.i.h.bf16 %v6918_v57  ;;  %v4986_v14 = vunpack.i.l.bf16 %v6918_v57 }
 0x620   : > { %v3648_v59 = vpack.c.bf16 %v3417_v4, %v3415_v51 }
 0x621   : > { %3922 = vrot.lane.b32.xlu0 %v3649_v1, %s5368_s29  ;;  %3918 = vrot.lane.b32.xlu1 %v3647_v17, %s5368_s29 }
 0x623   : > { %v3875_v23 = vpop.permute.xlu0 %3874  ;;  %v3873_v56 = vpop.permute.xlu1 %3872 }
 0x624   : > { %v3987_v60 = vsel %vm3984_vm13, %v6936_v30, %v3873_v56  ;;  %v3988_v40 = vsel %vm3984_vm13, %v3873_v56, %v3875_v23 }
 0x625   : > { %4079 = vmatprep.subr.bf16.mxu1 %v3988_v40  ;;  %3896 = vrot.lane.b32.xlu1 %v3636_v28, %s5368_s29  ;;  %v5002_v28 = vunpack.i.h.bf16 %v6924_v58 }
 0x626   : > { %4080 = vmatpush1.bf16.msra.mxu1 %v3987_v60 }
 0x627   : > { %v5100_v24 = vpop.permute.xlu0 %5099  ;;  %v5115_v10 = vpop.permute.xlu1 %5114 }
 0x628   : > { %v5102_v13 = vunpack.i.h.bf16 %v5100_v24  ;;  %v5101_v62 = vunpack.i.l.bf16 %v5100_v24  ;;  %v5117_v34 = vunpack.i.h.bf16 %v5115_v10  ;;  %v5116_v21 = vunpack.i.l.bf16 %v5115_v10 }
 0x629   : > { %3920 = vrot.lane.b32.xlu1 %v3648_v59, %s5368_s29 }
 0x62a   : > { %v3330_v41 = vsel %vm1167_vm7, %v4981_v29, %v5101_v62  ;;  %v3640_v30 = vpack.c.bf16 %v5117_v34, %v5102_v13  ;;  %v3332_v54 = vsel %vm1167_vm7, %v4982_v49, %v5116_v21  ;;  %v3331_v63 = vsel %vm1167_vm7, %v5101_v62, %v5102_v13 }
 0x62b   : > { %v3638_v7 = vpack.c.bf16 %v3332_v54, %v3330_v41  ;;  %v5105_v38 = vpop.permute.xlu0 %5104  ;;  %v5120_v6 = vpop.permute.xlu1 %5119  ;;  %v3333_v22 = vsel %vm1167_vm7, %v5116_v21, %v5117_v34  ;;  %v5062_v54 = vunpack.i.h.bf16 %v6950_v52 }
 0x62c   : > { %v5107_v53 = vunpack.i.h.bf16 %v5105_v38  ;;  %v5106_v32 = vunpack.i.l.bf16 %v5105_v38  ;;  %v5122_v3 = vunpack.i.h.bf16 %v5120_v6  ;;  %v5121_v8 = vunpack.i.l.bf16 %v5120_v6 }
 0x62d   : > { %3900 = vrot.lane.b32.xlu0 %v3638_v7, %s5368_s29  ;;  %3904 = vrot.lane.b32.xlu1 %v3640_v30, %s5368_s29  ;;  %v3639_v35 = vpack.c.bf16 %v3333_v22, %v3331_v63  ;;  %v5007_v30 = vunpack.i.h.bf16 %v6926_v42  ;;  %v5061_v63 = vunpack.i.l.bf16 %v6950_v52  ;;  %v5006_v6 = vunpack.i.l.bf16 %v6926_v42 }
 0x62e   : > { %v3419_v48 = vsel %vm2236_vm10, %v5106_v32, %v5107_v53  ;;  %v3421_v47 = vsel %vm2236_vm10, %v5121_v8, %v5122_v3  ;;  %v3420_v60 = vsel %vm2236_vm10, %v5002_v28, %v5121_v8  ;;  %v3652_v62 = vpack.c.bf16 %v5122_v3, %v5107_v53 }
 0x62f   : > { %v7007_v31 = vpop.permute.xlu0 %5109  ;;  %v7009_v16 = vpop.permute.xlu1 %5124  ;;  %v3651_v39 = vpack.c.bf16 %v3421_v47, %v3419_v48  ;;  %v5042_v3 = vunpack.i.h.bf16 %v6944_v27  ;;  %v5041_v8 = vunpack.i.l.bf16 %v6944_v27  ;;  %v3502_v52 = vsel %vm3498_vm14, %v5061_v63, %v5062_v54 }
 0x630   : > { %v5012_v42 = vunpack.i.h.bf16 %v6928_v55  ;;  %v5011_v27 = vunpack.i.l.bf16 %v6928_v55 }
 0x631   : > { %3902 = vrot.lane.b32.xlu0 %v3639_v35, %s5368_s29 }
 0x633   : > { %v3879_v5 = vpop.permute.xlu0 %3878  ;;  %v3881_v12 = vpop.permute.xlu1 %3880 }
 0x634   : > { %v3989_v46 = vsel %vm3984_vm13, %v6938_v26, %v3879_v5  ;;  %v3990_v0 = vsel %vm3984_vm13, %v3879_v5, %v3881_v12  ;;  %v5001_v26 = vunpack.i.l.bf16 %v6924_v58 }
 0x635   : > { %4081 = vmatprep.subr.bf16.mxu1 %v3990_v0  ;;  %3926 = vrot.lane.b32.xlu0 %v3651_v39, %s5368_s29  ;;  %v3658_v0 = vpack.c.bf16 %v5062_v54, %v5042_v3  ;;  %v5021_v54 = vunpack.i.l.bf16 %v6932_v20 }
 0x636   : > { %4082 = vmatpush1.bf16.msra.mxu1 %v3989_v46  ;;  %v3418_v51 = vsel %vm2236_vm10, %v5001_v26, %v5106_v32  ;;  %v3500_v46 = vsel %vm3498_vm14, %v5041_v8, %v5042_v3 }
 0x637   : > { %v5145_v9 = vpop.permute.xlu0 %5144  ;;  %v5130_v1 = vpop.permute.xlu1 %5129  ;;  %v3650_v58 = vpack.c.bf16 %v3420_v60, %v3418_v51  ;;  %v5127_v51 = vunpack.i.h.bf16 %v7009_v16 }
 0x638   : > { %v5147_v50 = vunpack.i.h.bf16 %v5145_v9  ;;  %v5146_v25 = vunpack.i.l.bf16 %v5145_v9  ;;  %v5132_v33 = vunpack.i.h.bf16 %v5130_v1  ;;  %v5131_v17 = vunpack.i.l.bf16 %v5130_v1 }
 0x639   : > { %v5097_v9 = vunpack.i.h.bf16 %v6984_v44  ;;  %v5096_v1 = vunpack.i.l.bf16 %v6984_v44 }
 0x63a   : > { %v3336_v23 = vsel %vm1167_vm7, %v4987_v2, %v5146_v25  ;;  %v3643_v56 = vpack.c.bf16 %v5147_v50, %v5132_v33  ;;  %v3334_v4 = vsel %vm1167_vm7, %v4986_v14, %v5131_v17  ;;  %v3337_v29 = vsel %vm1167_vm7, %v5146_v25, %v5147_v50 }
 0x63b   : > { %v3641_v57 = vpack.c.bf16 %v3336_v23, %v3334_v4  ;;  %v7026_v40 = vpop.permute.xlu0 %5149  ;;  %v5135_v49 = vpop.permute.xlu1 %5134  ;;  %v3335_v59 = vsel %vm1167_vm7, %v5131_v17, %v5132_v33  ;;  %v3657_v2 = vpack.c.bf16 %v3502_v52, %v3500_v46  ;;  %v3501_v14 = vsel %vm3498_vm14, %v5012_v42, %v5061_v63 }
 0x63c   : > { %3910 = vrot.lane.b32.xlu0 %v3643_v56, %s5368_s29  ;;  %v3642_v24 = vpack.c.bf16 %v3337_v29, %v3335_v59  ;;  %v5136_v41 = vunpack.i.l.bf16 %v5135_v49  ;;  %v5137_v22 = vunpack.i.h.bf16 %v5135_v49  ;;  %v5082_v50 = vunpack.i.h.bf16 %v6986_v43 }
 0x63d   : > { %3906 = vrot.lane.b32.xlu1 %v3641_v57, %s5368_s29  ;;  %v5081_v17 = vunpack.i.l.bf16 %v6986_v43  ;;  %v3499_v23 = vsel %vm3498_vm14, %v5011_v27, %v5041_v8  ;;  %v5112_v56 = vunpack.i.h.bf16 %v7007_v31  ;;  %v5111_v43 = vunpack.i.l.bf16 %v7007_v31 }
 0x63e   : > { %v3422_v35 = vsel %vm2236_vm10, %v5006_v6, %v5136_v41  ;;  %v3656_v44 = vpack.c.bf16 %v3501_v14, %v3499_v23  ;;  %v3423_v4 = vsel %vm2236_vm10, %v5136_v41, %v5137_v22  ;;  %v3506_v57 = vsel %vm3498_vm14, %v5096_v1, %v5097_v9 }
 0x63f   : > { %v7032_v10 = vpop.permute.xlu0 %5164  ;;  %v7034_v13 = vpop.permute.xlu1 %5139  ;;  %v3504_v49 = vsel %vm3498_vm14, %v5081_v17, %v5082_v50  ;;  %v5017_v29 = vunpack.i.h.bf16 %v6930_v18  ;;  %v5016_v59 = vunpack.i.l.bf16 %v6930_v18  ;;  %v3508_v31 = vsel %vm3498_vm14, %v5111_v43, %v5112_v56 }
 0x640   : > { %3924 = vrot.lane.b32.xlu0 %v3650_v58, %s5368_s29  ;;  %v3661_v58 = vpack.c.bf16 %v5097_v9, %v5082_v50  ;;  %v5142_v3 = vunpack.i.h.bf16 %v7034_v13  ;;  %v3664_v8 = vpack.c.bf16 %v5127_v51, %v5112_v56  ;;  %v5151_v14 = vunpack.i.l.bf16 %v7026_v40 }
 0x641   : > { %3908 = vrot.lane.b32.xlu1 %v3642_v24, %s5368_s29  ;;  %v3660_v24 = vpack.c.bf16 %v3506_v57, %v3504_v49  ;;  %v3503_v41 = vsel %vm3498_vm14, %v5016_v59, %v5081_v17  ;;  %v5166_v45 = vunpack.i.l.bf16 %v7032_v10  ;;  %v3700_v49 = vld [vmem:[%s7389_s20 + $0x20] sm:$0xff] }
 0x643   : > { %v7038_v34 = vpop.permute.xlu0 %5169  ;;  %v7040_v21 = vpop.permute.xlu1 %5154 }
 0x645   : > { %3928 = vrot.lane.b32.xlu1 %v3652_v62, %s5368_s29 }
 0x647   : > { %v5175_v7 = vpop.permute.xlu0 %5174  ;;  %v7046_v38 = vpop.permute.xlu1 %5159 }
 0x648   : > { %v5177_v53 = vunpack.i.h.bf16 %v5175_v7  ;;  %v5176_v32 = vunpack.i.l.bf16 %v5175_v7  ;;  %v3507_v7 = vsel %vm3498_vm14, %v5021_v54, %v5111_v43  ;;  %v5162_v9 = vunpack.i.h.bf16 %v7046_v38 }
 0x64a   : > { %v3424_v48 = vsel %vm2236_vm10, %v5007_v30, %v5176_v32  ;;  %v3655_v47 = vpack.c.bf16 %v5177_v53, %v5137_v22  ;;  %v3425_v28 = vsel %vm2236_vm10, %v5176_v32, %v5177_v53  ;;  %v5022_v30 = vunpack.i.h.bf16 %v6932_v20 }
 0x64b   : > { %v3653_v39 = vpack.c.bf16 %v3424_v48, %v3422_v35  ;;  %v7054_v5 = vpop.permute.xlu0 %5179  ;;  %v7056_v12 = vpop.permute.xlu1 %5184  ;;  %v3654_v60 = vpack.c.bf16 %v3425_v28, %v3423_v4  ;;  %v5141_v20 = vunpack.i.l.bf16 %v7034_v13  ;;  %v5242_v35 = vld [vmem:[%s7387_s13 + $0x4] ss:$12 sps:$4 sm:$0xff]   ;;  %v5026_v13 = vunpack.i.l.bf16 %v6934_v36 }
 0x64c   : > { %3934 = vrot.lane.b32.xlu0 %v3655_v47, %s5368_s29  ;;  %v5182_v22 = vunpack.i.h.bf16 %v7054_v5  ;;  %v5181_v53 = vunpack.i.l.bf16 %v7054_v5  ;;  %4109 = vmatprep.mubr.bf16.mxu1 %v5242_v35  ;;  %v5027_v47 = vunpack.i.h.bf16 %v6934_v36  ;;  %v5152_v36 = vunpack.i.h.bf16 %v7026_v40 }
 0x64d   : > { %3930 = vrot.lane.b32.xlu1 %v3653_v39, %s5368_s29  ;;  %v3512_v52 = vsel %vm3498_vm14, %v5141_v20, %v5142_v3  ;;  %v3511_v46 = vsel %vm3498_vm14, %v5026_v13, %v5141_v20  ;;  %v5187_v17 = vunpack.i.h.bf16 %v7056_v12  ;;  %v5171_v28 = vunpack.i.l.bf16 %v7038_v34 }
 0x64e   : > { %v3514_v48 = vsel %vm3498_vm14, %v5181_v53, %v5182_v22  ;;  %v3667_v39 = vpack.c.bf16 %v5182_v22, %v5142_v3  ;;  %v3513_v42 = vsel %vm3498_vm14, %v5027_v47, %v5181_v53  ;;  %v3590_v15 = vsel %vm3587_vm12, %v5151_v14, %v5152_v36 }
 0x64f   : > { %v3887_v25 = vpop.permute.xlu0 %3886  ;;  %v3885_v33 = vpop.permute.xlu1 %3884  ;;  %v3666_v5 = vpack.c.bf16 %v3514_v48, %v3512_v52  ;;  %v3665_v27 = vpack.c.bf16 %v3513_v42, %v3511_v46 }
 0x650   : > { %v3991_v26 = vsel %vm3984_vm13, %v6940_v61, %v3885_v33  ;;  %3938 = vrot.lane.b32.xlu0 %v3657_v2, %s5368_s29  ;;  %v3992_v55 = vsel %vm3984_vm13, %v3885_v33, %v3887_v25  ;;  %v5126_v61 = vunpack.i.l.bf16 %v7009_v16  ;;  %v3505_v16 = vsel %vm3498_vm14, %v5017_v29, %v5096_v1  ;;  %v3699_v29 = vld [vmem:[%s7389_s20 + $0x18] sm:$0xff] }
 0x651   : > { %4083 = vmatprep.subr.bf16.mxu1 %v3992_v55  ;;  %3940 = vrot.lane.b32.xlu1 %v3658_v0, %s5368_s29  ;;  %v3659_v18 = vpack.c.bf16 %v3505_v16, %v3503_v41  ;;  %v5157_v0 = vunpack.i.h.bf16 %v7040_v21  ;;  %v5156_v2 = vunpack.i.l.bf16 %v7040_v21  ;;  %v5161_v1 = vunpack.i.l.bf16 %v7046_v38  ;;  %v3703_v41 = vld [vmem:[%s7389_s20 + $0x38] sm:$0xff] }
 0x652   : > { %4084 = vmatpush1.bf16.msra.mxu1 %v3991_v26  ;;  %v3510_v62 = vsel %vm3498_vm14, %v5126_v61, %v5127_v51  ;;  %v3509_v6 = vsel %vm3498_vm14, %v5022_v30, %v5126_v61  ;;  %v5167_v21 = vunpack.i.h.bf16 %v7032_v10  ;;  %v5186_v10 = vunpack.i.l.bf16 %v7056_v12  ;;  %v3698_v51 = vld [vmem:[%s7389_s20 + $0x10] sm:$0xff]  ;;  %v3697_v61 = vld [vmem:[%s7389_s20 + $0x8] sm:$0xff] }
 0x653   : > { %v3663_v63 = vpack.c.bf16 %v3510_v62, %v3508_v31  ;;  %v3662_v32 = vpack.c.bf16 %v3509_v6, %v3507_v7  ;;  %v3591_v50 = vsel %vm3587_vm12, %v5156_v2, %v5157_v0  ;;  %v3592_v25 = vsel %vm3587_vm12, %v5161_v1, %v5162_v9  ;;  %v3702_v31 = vld [vmem:[%s7389_s20 + $0x30] sm:$0xff]  ;;  %v3701_v62 = vld [vmem:[%s7389_s20 + $0x28] sm:$0xff] }
 0x654   : > { %3936 = vrot.lane.b32.xlu0 %v3656_v44, %s5368_s29  ;;  %v3672_v40 = vpack.c.bf16 %v3591_v50, %v3590_v15  ;;  %v3593_v38 = vsel %vm3587_vm12, %v5166_v45, %v5167_v21  ;;  %v3671_v33 = vpack.c.bf16 %v5156_v2, %v5151_v14  ;;  %v3674_v26 = vpack.c.bf16 %v5166_v45, %v5161_v1 }
 0x655   : > { %3932 = vrot.lane.b32.xlu1 %v3654_v60, %s5368_s29  ;;  %v3676_v55 = vpack.c.bf16 %v5167_v21, %v5162_v9  ;;  %v3595_v23 = vsel %vm3587_vm12, %v5186_v10, %v5187_v17  ;;  %v3677_v4 = vpack.c.bf16 %v5186_v10, %v5171_v28 }
 0x658   : > { %3946 = vrot.lane.b32.xlu0 %v3661_v58, %s5368_s29 }
 0x659   : > { %3944 = vrot.lane.b32.xlu1 %v3660_v24, %s5368_s29 }
 0x65c   : > { %3950 = vrot.lane.b32.xlu0 %v3663_v63, %s5368_s29 }
 0x65d   : > { %3942 = vrot.lane.b32.xlu1 %v3659_v18, %s5368_s29 }
 0x660   : > { %3948 = vrot.lane.b32.xlu0 %v3662_v32, %s5368_s29 }
 0x661   : > { %3952 = vrot.lane.b32.xlu1 %v3664_v8, %s5368_s29 }
 0x664   : > { %3958 = vrot.lane.b32.xlu0 %v3667_v39, %s5368_s29 }
 0x665   : > { %3956 = vrot.lane.b32.xlu1 %v3666_v5, %s5368_s29 }
 0x668   : > { %3962 = vrot.lane.b32.xlu0 %v3669_v19, %s5368_s29  ;;  %v3673_v19 = vpack.c.bf16 %v5157_v0, %v5152_v36 }
 0x669   : > { %3954 = vrot.lane.b32.xlu1 %v3665_v27, %s5368_s29 }
 0x66c   : > { %3960 = vrot.lane.b32.xlu0 %v6960_v37, %s5368_s29  ;;  %v3675_v37 = vpack.c.bf16 %v3593_v38, %v3592_v25 }
 0x66d   : > { %3964 = vrot.lane.b32.xlu1 %v6962_v11, %s5368_s29  ;;  %v5172_v11 = vunpack.i.h.bf16 %v7038_v34  ;;  %v3696_v34 = vld [vmem:[%s7388_s27] sm:$0xff] }
 0x66f   : > { %v3594_v44 = vsel %vm3587_vm12, %v5171_v28, %v5172_v11  ;;  %v3679_v56 = vpack.c.bf16 %v5187_v17, %v5172_v11 }
 0x670   : > { %3970 = vrot.lane.b32.xlu0 %v3673_v19, %s5368_s29  ;;  %v3678_v12 = vpack.c.bf16 %v3595_v23, %v3594_v44 }
 0x671   : > { %3968 = vrot.lane.b32.xlu1 %v3672_v40, %s5368_s29 }
 0x674   : > { %3974 = vrot.lane.b32.xlu0 %v3675_v37, %s5368_s29 }
 0x675   : > { %3966 = vrot.lane.b32.xlu1 %v3671_v33, %s5368_s29 }
 0x678   : > { %3972 = vrot.lane.b32.xlu0 %v3674_v26, %s5368_s29 }
 0x679   : > { %3976 = vrot.lane.b32.xlu1 %v3676_v55, %s5368_s29 }
 0x67c   : > { %3982 = vrot.lane.b32.xlu0 %v3679_v56, %s5368_s29 }
 0x67d   : > { %3980 = vrot.lane.b32.xlu1 %v3678_v12, %s5368_s29 }
 0x67e   : > { %v3893_v57 = vpop.permute.xlu1 %3892 }
 0x67f   : > { %v3889_v43 = vpop.permute.xlu0 %3888 }
 0x680   : > { %3706 = vperm.xlu0 %4636, %v3696_v34  }
 0x681   : > { %3978 = vrot.lane.b32.xlu1 %v3677_v4, %s5368_s29  ;;  %s4485_s29 = sshll.u32 %s5342_s25, 4 }
 0x682   : > { %v3917_v16 = vpop.permute.xlu1 %3916  ;;  %s4227_s27 = sadd.s32 %s5338_s24, %s4485_s29  ;;  %s7392_s24 = sld [smem:[#allocation22_spill]] }
 0x683   : > { %v3913_v60 = vpop.permute.xlu0 %3912  ;;  %s4486_s0 = sshll.u32 %s4227_s27, 7  ;;  %s5260_s29 = scalar_lea.vmem %s7259_s14, 1024 }
 0x684   : > { %3716 = vperm.xlu0 %4636, %v3698_v51   ;;  %p5261_p3 = scmp.ne.s32.totalorder %s7259_s14, %s5260_s29  ;;  %s5370_s27 = smov [#allocation5]  }
 0x685   : > { %3711 = vperm.xlu1 %4637, %v3697_v61   ;;  %s5264_s17 = sshll.u32 %s5370_s27, 4  ;;  %s5265_s17 = int_to_ptr.vmem [resolvable:$false] %s5264_s17 }
 0x686   : > { %p5262_p4 = pnand %p5261_p3, %p5518_p8  ;;  %s5266_s1 = scalar_lea.vmem %s5265_s17, 2048 }
 0x687   : > { %v3891_v59 = vpop.permute.xlu0 %3890  ;;  %p5267_p6 = scmp.lt.s32.totalorder %s7259_s14, %s5265_s17  ;;  %p5268_p7 = scmp.lt.s32.totalorder %s5266_s1, %s5260_s29 }
 0x688   : > { %3726 = vperm.xlu0 %4636, %v3700_v49   ;;  %v3993_v58 = vsel %vm3984_vm13, %v3889_v43, %v3891_v59  ;;  %v3994_v24 = vsel %vm3984_vm13, %v3891_v59, %v3893_v57  ;;  %v5240_v57 = vld [vmem:[%s7387_s13] ss:$12 sps:$4 sm:$0xff]   ;;  %v5243_v59 = vld [vmem:[%s7387_s13 + $0x1c] ss:$12 sps:$4 sm:$0xff]   ;;  %s7393_s2 = smov %s7392_s24  ;;  %s7265_s30 = scalar_lea.hbm %s7392_s24, %s4486_s0 }
 0x689   : > { %3721 = vperm.xlu1 %4637, %v3699_v29   ;;  %4085 = vmatprep.subr.bf16.mxu1 %v3994_v24  ;;  %p5263_p5 = pneg %p5262_p4  ;;  %p5269_p10 = por %p5268_p7, %p5267_p6 }
 0x68a   : > { %4086 = vmatpush1.bf16.msra.mxu1 %v3993_v58 }
 0x68b   : > { %v3915_v30 = vpop.permute.xlu0 %3914  ;;  %p5270_p11 = pnand %p5269_p10, %p5263_p5 }
 0x68c   : > { %3736 = vperm.xlu0 %4636, %v3702_v31   ;;  %v4002_v46 = vsel %vm3984_vm13, %v3915_v30, %v3917_v16  ;;  %v4001_v27 = vsel %vm3984_vm13, %v3913_v60, %v3915_v30 }
 0x68d   : > { %3731 = vperm.xlu1 %4637, %v3701_v62  }
 0x68f   : > { %v3895_v54 = vpop.permute.xlu1 %3894  ;;  %v3899_v18 = vpop.permute.xlu0 %3898 }
 0x691   : > { %3741 = vperm.xlu1 %4637, %v3703_v41   ;;  %v5245_v41 = vld [vmem:[%s7387_s13 + $0x18] ss:$12 sps:$4 sm:$0xff]  }
 0x693   : > { %v3919_v63 = vpop.permute.xlu1 %3918  ;;  %v3923_v53 = vpop.permute.xlu0 %3922 }
 0x697   : > { %v3897_v7 = vpop.permute.xlu1 %3896 }
 0x698   : > { %v3995_v6 = vsel %vm3984_vm13, %v3895_v54, %v3897_v7  ;;  %v3996_v22 = vsel %vm3984_vm13, %v3897_v7, %v3899_v18  ;;  %v5246_v54 = vld [vmem:[%s7387_s13 + $0x34] ss:$12 sps:$4 sm:$0xff]  }
 0x699   : > { %4087 = vmatprep.subr.bf16.mxu1 %v3996_v22 }
 0x69a   : > { %4088 = vmatpush1.bf16.msra.mxu1 %v3995_v6 }
 0x69b   : > { %v3921_v32 = vpop.permute.xlu1 %3920 }
 0x69c   : > { %v4004_v2 = vsel %vm3984_vm13, %v3921_v32, %v3923_v53  ;;  %v4003_v14 = vsel %vm3984_vm13, %v3919_v63, %v3921_v32  ;;  %v5248_v53 = vld [vmem:[%s7387_s13 + $0x30] ss:$12 sps:$4 sm:$0xff]  }
 0x69f   : > { %v3901_v3 = vpop.permute.xlu0 %3900  ;;  %v3905_v20 = vpop.permute.xlu1 %3904 }
 0x6a3   : > { %v3903_v8 = vpop.permute.xlu0 %3902 }
 0x6a4   : > { %v3997_v35 = vsel %vm3984_vm13, %v3901_v3, %v3903_v8  ;;  %v3998_v48 = vsel %vm3984_vm13, %v3903_v8, %v3905_v20  ;;  %v5249_v20 = vld [vmem:[%s7387_s13 + $0x4c] ss:$12 sps:$4 sm:$0xff]  }
 0x6a5   : > { %4089 = vmatprep.subr.bf16.mxu1 %v3998_v48 }
 0x6a6   : > { %4090 = vmatpush1.bf16.msra.mxu1 %v3997_v35 }
 0x6a7   : > { %v3927_v47 = vpop.permute.xlu0 %3926 }
 0x6ae   : > { %v3911_v39 = vpop.permute.xlu0 %3910 }
 0x6af   : > { %v3907_v52 = vpop.permute.xlu1 %3906 }
 0x6b2   : > { %v3925_v0 = vpop.permute.xlu0 %3924 }
 0x6b3   : > { %v3909_v5 = vpop.permute.xlu1 %3908  ;;  %v4005_v21 = vsel %vm3984_vm13, %v3925_v0, %v3927_v47 }
 0x6b4   : > { %v3999_v13 = vsel %vm3984_vm13, %v3907_v52, %v3909_v5  ;;  %v4000_v42 = vsel %vm3984_vm13, %v3909_v5, %v3911_v39  ;;  %v5251_v52 = vld [vmem:[%s7387_s13 + $0x48] ss:$12 sps:$4 sm:$0xff]   ;;  %v7390_v5 = vmov 0  }
 0x6b5   : > { %4091 = vmatprep.subr.bf16.mxu1 %v4000_v42  ;;  %v5252_v39 = vld [vmem:[%s7387_s13 + $0x8] ss:$12 sps:$4 sm:$0xff]   ;;  %v5254_v42 = vld [vmem:[%s7387_s13 + $0x38] ss:$12 sps:$4 sm:$0xff]  }
 0x6b6   : > { %4092 = vmatpush1.bf16.msra.mxu1 %v3999_v13  ;;  %v5253_v13 = vld [vmem:[%s7387_s13 + $0x20] ss:$12 sps:$4 sm:$0xff]  }
 0x6b7   : > { %4093 = vmatprep.subr.bf16.mxu1 %v4002_v46  ;;  %v3929_v36 = vpop.permute.xlu1 %3928  ;;  %v5255_v46 = vld [vmem:[%s7387_s13 + $0x50] ss:$12 sps:$4 sm:$0xff]  }
 0x6b8   : > { %v4006_v1 = vsel %vm3984_vm13, %v3927_v47, %v3929_v36 }
 0x6ba   : > { %4094 = vmatpush1.bf16.msra.mxu1 %v4001_v27 }
 0x6bb   : > { %4095 = vmatprep.subr.bf16.mxu1 %v4004_v2 }
 0x6be   : > { %v3935_v9 = vpop.permute.xlu0 %3934  ;;  %4096 = vmatpush1.bf16.msra.mxu1 %v4003_v14 }
 0x6bf   : > { %4097 = vmatprep.subr.bf16.mxu1 %v4006_v1  ;;  %v3931_v50 = vpop.permute.xlu1 %3930 }
 0x6c2   : > { %v3939_v45 = vpop.permute.xlu0 %3938  ;;  %4098 = vmatpush1.bf16.msra.mxu1 %v4005_v21 }
 0x6c3   : > { %v3941_v15 = vpop.permute.xlu1 %3940 }
 0x6c4   : > { %v4010_v33 = vsel %vm3984_vm13, %v3939_v45, %v3941_v15 }
 0x6c6   : > { %v3937_v19 = vpop.permute.xlu0 %3936 }
 0x6c7   : > { %v3933_v40 = vpop.permute.xlu1 %3932  ;;  %v4009_v10 = vsel %vm3984_vm13, %v3937_v19, %v3939_v45 }
 0x6c8   : > { %v4007_v25 = vsel %vm3984_vm13, %v3931_v50, %v3933_v40  ;;  %v4008_v38 = vsel %vm3984_vm13, %v3933_v40, %v3935_v9 }
 0x6c9   : > { %4099 = vmatprep.subr.bf16.mxu1 %v4008_v38 }
 0x6ca   : > { %v3947_v37 = vpop.permute.xlu0 %3946  ;;  %4100 = vmatpush1.bf16.msra.mxu1 %v4007_v25 }
 0x6cb   : > { %4101 = vmatprep.subr.bf16.mxu1 %v4010_v33  ;;  %v3945_v17 = vpop.permute.xlu1 %3944 }
 0x6cc   : > { %v4012_v28 = vsel %vm3984_vm13, %v3945_v17, %v3947_v37 }
 0x6ce   : > { %v3951_v11 = vpop.permute.xlu0 %3950  ;;  %4102 = vmatpush1.bf16.msra.mxu1 %v4009_v10 }
 0x6cf   : > { %4103 = vmatprep.subr.bf16.mxu1 %v4012_v28  ;;  %v3943_v26 = vpop.permute.xlu1 %3942 }
 0x6d0   : > { %v4011_v55 = vsel %vm3984_vm13, %v3943_v26, %v3945_v17 }
 0x6d2   : > { %v3949_v23 = vpop.permute.xlu0 %3948  ;;  %4104 = vmatpush1.bf16.msra.mxu1 %v4011_v55 }
 0x6d3   : > { %v3953_v44 = vpop.permute.xlu1 %3952  ;;  %v4013_v12 = vsel %vm3984_vm13, %v3949_v23, %v3951_v11 }
 0x6d4   : > { %v4014_v56 = vsel %vm3984_vm13, %v3951_v11, %v3953_v44 }
 0x6d5   : > { %4105 = vmatprep.subr.bf16.mxu1 %v4014_v56 }
 0x6d6   : > { %v3959_v34 = vpop.permute.xlu0 %3958  ;;  %4106 = vmatpush1.bf16.msra.mxu1 %v4013_v12 }
 0x6d7   : > { %v3957_v4 = vpop.permute.xlu1 %3956 }
 0x6d8   : > { %v4016_v43 = vsel %vm3984_vm13, %v3957_v4, %v3959_v34 }
 0x6d9   : > { %4107 = vmatprep.subr.bf16.mxu1 %v4016_v43 }
 0x6da   : > { %v3963_v51 = vpop.permute.xlu0 %3962 }
 0x6db   : > { %v3955_v61 = vpop.permute.xlu1 %3954 }
 0x6dc   : > { %v4015_v60 = vsel %vm3984_vm13, %v3955_v61, %v3957_v4 }
 0x6dd   : > { %4108 = vmatpush1.bf16.msra.mxu1 %v4015_v60 }
 0x6de   : > { %v3961_v49 = vpop.permute.xlu0 %3960 }
 0x6df   : > { %v3965_v29 = vpop.permute.xlu1 %3964  ;;  %v4017_v24 = vsel %vm3984_vm13, %v3961_v49, %v3963_v51 }
 0x6e0   : > { %4110 = vmatmul.mubr.bf16.vlgmr.msra.gmra.mrb[48].mxu1 %v5240_v57  ;;  %v4018_v58 = vsel %vm3984_vm13, %v3963_v51, %v3965_v29 }
 0x6e1   : > { %4142 = vmatprep.subr.bf16.mxu0 %v4018_v58  ;;  %4489 = vmatprep.subr.bf16.mxu1 %v4018_v58 }
 0x6e2   : > { %v3971_v31 = vpop.permute.xlu0 %3970  ;;  %4143 = vmatpush1.bf16.msra.mxu0 %v4017_v24  ;;  %4493 = vmatpush1.bf16.msra.mxu1 %v4017_v24 }
 0x6e3   : > { %v3969_v62 = vpop.permute.xlu1 %3968  ;;  %4117 = vmatprep.mubr.bf16.mxu1 %v5243_v59 }
 0x6e4   : > { %v4020_v16 = vsel %vm3984_vm13, %v3969_v62, %v3971_v31 }
 0x6e5   : > { %4144 = vmatprep.subr.bf16.mxu0 %v4020_v16  ;;  %4490 = vmatprep.subr.bf16.mxu1 %v4020_v16 }
 0x6e6   : > { %v3975_v30 = vpop.permute.xlu0 %3974 }
 0x6e7   : > { %v3967_v63 = vpop.permute.xlu1 %3966 }
 0x6e8   : > { %v4019_v18 = vsel %vm3984_vm13, %v3967_v63, %v3969_v62  ;;  %4118 = vmatmul.mubr.bf16.gmra.mrb[52].mxu1 %v5245_v41 }
 0x6e9   : > { %4145 = vmatpush1.bf16.msra.mxu0 %v4019_v18  ;;  %4494 = vmatpush1.bf16.msra.mxu1 %v4019_v18 }
 0x6ea   : > { %v3973_v7 = vpop.permute.xlu0 %3972  ;;  %4125 = vmatprep.mubr.bf16.mxu1 %v5246_v54 }
 0x6eb   : > { %v3977_v6 = vpop.permute.xlu1 %3976  ;;  %v4021_v32 = vsel %vm3984_vm13, %v3973_v7, %v3975_v30 }
 0x6ec   : > { %v4022_v22 = vsel %vm3984_vm13, %v3975_v30, %v3977_v6 }
 0x6ed   : > { %4146 = vmatprep.subr.bf16.mxu0 %v4022_v22  ;;  %4491 = vmatprep.subr.bf16.mxu1 %v4022_v22 }
 0x6ee   : > { %v3983_v3 = vpop.permute.xlu0 %3982  ;;  %4147 = vmatpush1.bf16.msra.mxu0 %v4021_v32  ;;  %4495 = vmatpush1.bf16.msra.mxu1 %v4021_v32 }
 0x6ef   : > { %v3981_v8 = vpop.permute.xlu1 %3980 }
 0x6f0   : > { %4126 = vmatmul.mubr.bf16.gmra.mrb[56].mxu1 %v5248_v53  ;;  %v4024_v35 = vsel %vm3984_vm13, %v3981_v8, %v3983_v3 }
 0x6f1   : > { %4148 = vmatprep.subr.bf16.mxu0 %v4024_v35  ;;  %4492 = vmatprep.subr.bf16.mxu1 %v4024_v35 }
 0x6f2   : > { %4133 = vmatprep.mubr.bf16.mxu1 %v5249_v20 }
 0x6f3   : > { %v3979_v48 = vpop.permute.xlu1 %3978 }
 0x6f4   : > { %v4023_v47 = vsel %vm3984_vm13, %v3979_v48, %v3981_v8 }
 0x6f5   : > { %4149 = vmatpush1.bf16.msra.mxu0 %v4023_v47  ;;  %4496 = vmatpush1.bf16.msra.mxu1 %v4023_v47 }
 0x6f8   : > { %4134 = vmatmul.mubr.bf16.gmra.mrb[60].mxu1 %v5251_v52  ;;  %4480 = vmatmul.mubr.msk.bf16.vlgmr.msra.gmra.mrb[64].mxu0 %vm2714_vm11, %v5252_v39 }
 0x6f9   : > { %4182 = vmatprep.mubr.bf16.mxu0 %v7390_v5  ;;  %4190 = vmatprep.mubr.bf16.mxu1 %v7390_v5 }
 0x6ff   : > { %v3707_v21 = vpop.permute.xlu0 %3706 }
 0x700   : > { %4481 = vmatmul.mubr.msk.bf16.gmra.mrb[68].mxu0 %vm2714_vm11, %v5253_v13  ;;  %4482 = vmatmul.mubr.msk.bf16.vlgmr.msra.gmra.mrb[56].mxu1 %vm2714_vm11, %v5254_v42 }
 0x701   : > { %4198 = vmatprep.mubr.bf16.mxu1 %v7390_v5 }
 0x703   : > { %v3717_v15 = vpop.permute.xlu0 %3716 }
 0x704   : > { %v3712_v45 = vpop.permute.xlu1 %3711 }
 0x707   : > { %v3727_v28 = vpop.permute.xlu0 %3726 }
 0x708   : > { %4483 = vmatmul.mubr.msk.bf16.gmra.mrb[60].mxu1 %vm2714_vm11, %v5255_v46  ;;  %v3722_v25 = vpop.permute.xlu1 %3721 }
 0x70b   : > { %v3737_v58 = vpop.permute.xlu0 %3736 }
 0x70c   : > { %v3732_v26 = vpop.permute.xlu1 %3731 }
 0x710   : > { %v3742_v16 = vpop.permute.xlu1 %3741 }
 0x7b3   : > { %v4111_v27 = vpop.f32.mrb[48].mxu1 }
 0x7b4   : > { %v4112_v0 = vpop.f32.mrb[49].mxu1 }
 0x7b5   : > { %v4114_v2 = vpop.f32.mrb[50].mxu1  ;;  %v4113_v19 = vadd.f32 %v4112_v0, %v3707_v21 }
 0x7b6   : > { %v4115_v36 = vpop.f32.mrb[51].mxu1 }
 0x7b7   : > { %v4116_v37 = vadd.f32 %v4115_v36, %v3712_v45 }
 0x7bb   : > { %v4119_v14 = vpop.f32.mrb[52].mxu1 }
 0x7bc   : > { %v4120_v9 = vpop.f32.mrb[53].mxu1 }
 0x7bd   : > { %v4122_v1 = vpop.f32.mrb[54].mxu1  ;;  %v4121_v55 = vadd.f32 %v4120_v9, %v3717_v15 }
 0x7be   : > { %v4123_v50 = vpop.f32.mrb[55].mxu1 }
 0x7bf   : > { %v4124_v34 = vadd.f32 %v4123_v50, %v3722_v25 }
 0x7cb   : > { %v4176_v40 = vpop.f32.mrb[64].mxu0 }
 0x7cc   : > { %v4177_v38 = vpop.f32.mrb[65].mxu0 }
 0x7cd   : > { %v4178_v33 = vadd.f32 %v4177_v38, %v4113_v19  ;;  %v4179_v17 = vpop.f32.mrb[66].mxu0 }
 0x7ce   : > { %v4180_v10 = vpop.f32.mrb[67].mxu0 }
 0x7cf   : > { %4207 = vst [vmem:[%s7248_s15] sm:$0xff] %v4178_v33  ;;  %v4181_v11 = vadd.f32 %v4180_v10, %v4116_v37 }
 0x7d1   : > { %4208 = vst [vmem:[%s7248_s15 + $0x8] sm:$0xff] %v4181_v11 }
 0x7d3   : > { %v4184_v23 = vpop.f32.mrb[68].mxu0  ;;  %v4192_v44 = vpop.f32.mrb[56].mxu1 }
 0x7d4   : > { %v4185_v56 = vpop.f32.mrb[69].mxu0  ;;  %v4193_v12 = vpop.f32.mrb[57].mxu1 }
 0x7d5   : > { %v4186_v4 = vadd.f32 %v4185_v56, %v4121_v55  ;;  %v4521_v43 = vadd.f32 %v4193_v12, %v3727_v28  ;;  %v4187_v51 = vpop.f32.mrb[70].mxu0  ;;  %v4195_v61 = vpop.f32.mrb[58].mxu1 }
 0x7d6   : > { %v4188_v60 = vpop.f32.mrb[71].mxu0  ;;  %v4196_v57 = vpop.f32.mrb[59].mxu1 }
 0x7d7   : > { %4209 = vst [vmem:[%s7248_s15 + $0x10] sm:$0xff] %v4186_v4  ;;  %4211 = vst [vmem:[%s7248_s15 + $0x20] sm:$0xff] %v4521_v43  ;;  %v4189_v49 = vadd.f32 %v4188_v60, %v4124_v34  ;;  %v4522_v29 = vadd.f32 %v4196_v57, %v3732_v26 }
 0x7d9   : > { %4210 = vst [vmem:[%s7248_s15 + $0x18] sm:$0xff] %v4189_v49  ;;  %4212 = vst [vmem:[%s7248_s15 + $0x28] sm:$0xff] %v4522_v29 }
 0x7db   : > { %v4200_v59 = vpop.f32.mrb[60].mxu1 }
 0x7dc   : > { %v4201_v24 = vpop.f32.mrb[61].mxu1 }
 0x7dd   : > { %v4523_v31 = vadd.f32 %v4201_v24, %v3737_v58  ;;  %v4203_v62 = vpop.f32.mrb[62].mxu1 }
 0x7de   : > { %v4204_v41 = vpop.f32.mrb[63].mxu1 }
 0x7df   : > { %4213 = vst [vmem:[%s7248_s15 + $0x30] sm:$0xff] %v4523_v31  ;;  %v4524_v30 = vadd.f32 %v4204_v41, %v3742_v16 }
 0x7e1   : > { %4214 = vst [vmem:[%s7248_s15 + $0x38] sm:$0xff] %v4524_v30 }
 0x7e2   : > { %5273 = shalt.err (!%p5270_p11)
}
 0x7e3   : > { %s5274_s15 = scalar_lea.hbm %s7265_s30, 1024  ;;  %s5278_s21 = scalar_lea.hbm %s7393_s2, 4096 }
 0x7e4   : > { %p5275_p12 = scmp.ne.s32.totalorder %s7265_s30, %s5274_s15  ;;  %p5279_p1 = scmp.lt.u32.totalorder %s7265_s30, %s7393_s2 }
 0x7e5   : > { %p5280_p2 = scmp.lt.u32.totalorder %s5278_s21, %s5274_s15  ;;  %p5282_p4 = scmp.lt.u32.totalorder %s5274_s15, %s7265_s30 }
 0x7e6   : > { %p5276_p13 = pnand %p5275_p12, %p5518_p8 }
 0x7e7   : > { %p5281_p3 = por %p5280_p2, %p5279_p1 }
 0x7e8   : > { %p5277_p0 = pneg %p5276_p13 }
 0x7e9   : > { %p5283_p5 = por %p5282_p4, %p5281_p3 }
 0x7eb   : > { %p5284_p6 = pnand %p5283_p5, %p5277_p0 }
 0x7ed   : > { %5287 = shalt.err (!%p5284_p6)
}
 0x7ee   : > { %s5371_s1 = smov 128   ;;  %s5372_s29 = smov 256  }
 0x7ef   : > { %s7394_s27 = smov 8  }
 0x7f0   : > { %4549 = dma.vmem_to_hbm [thread:$0]  (%p5518_p8), %s7259_s14, 1024, %s7265_s30, %s4216_s26, %s5371_s1, %s5372_s29, %s7394_s27  }
 0x7f1 PF: > { %s7395_s0 = sld [smem:[#allocation8_spill]]  ;;  %p4555_p7 = scmp.ge.s32.totalorder %s5354_s28, 2 }
 0x7f3   : > { %p4552_p10 = pnand %p4555_p7, %p5522_p9 }
 0x7f7   : > { %s4245_s21 = sand.u32 1, %s7395_s0  }
 0x7f8   : > { %s4246_s15 = scalar_lea.sflag [#allocation6], %s4245_s21 }
 0x7f9   : > { %5321 = dma.done.wait (!%p4552_p10), %s4246_s15, 1024  }
 0x7fa   : > { %5323 = vsyncadd (!%p4552_p10), %s4246_s15, 4294966272  ;;  %s29_s28 = sadd.s32 1, %s5354_s28   ;;  %s7397_s16 = sld [smem:[#allocation15_spill]] }
 0x7fb   : > { %p26_p11 = scmp.ge.s32.totalorder %s29_s28, 6   ;;  %s7398_s24 = sld [smem:[#allocation9_spill]] }
 0x7fc   : > { %s7399_s25 = sld [smem:[#allocation10_spill]]  ;;  %s7400_s26 = sld [smem:[#allocation11_spill]] }
 0x7fd   : > { %s7401_s27 = sld [smem:[#allocation12_spill]]  ;;  %s7402_s21 = smov %s5330_s22 }
 0x7fe   : > { %s7403_s22 = smov %s5334_s23  ;;  %28 = sbr.rel (!%p26_p11) target bundleno = 13 (0xd), region = 217 }
 0x800   : > { %s7404_s23 = smov %s7397_s16 }
 0x805   :  { %4251 = vsyncpa [#allocation6], 1 }
 0x806   :  { %4253 = vsyncpa [#allocation6 + $0x1], 1 }

</bundles_post_ra>
